<compile_context>
chip_gen: v7x
topology: tpu7x:2x2x1
jax: 0.10.0
libtpu: 0.0.40
codegen_flags: <defaults>
</compile_context>

<pallas_src>
import functools

import jax
import jax.numpy as jnp
from jax.experimental import pallas as pl
from jax.experimental.pallas import tpu as pltpu

# ----------------------------- scaled-down config -----------------------------
HIDDEN_SIZE = 32      # orig 768
N_EMBD      = 32      # GPT-2 n_embd, orig 768
N_LAYER     = 2       # orig 12
N_HEAD      = 4       # orig 12
HEAD_DIM    = N_EMBD // N_HEAD
VOCAB       = 64      # orig 50257
VOCAB_PAD   = 128     # lane-dense LM head / CE (padded cols masked in-kernel)
N_POS       = 16      # orig 1024
FEAT        = 16      # resnet backbone feature dim, orig 512
STEM_C      = 16      # conv channel width (stand-in for 64..512)
LN_EPS      = 1e-5
MASK_VAL    = -1e9    # single mask magnitude (attention + vocab padding)


# ------------------------------- small helpers --------------------------------
def _const_spec(shape):
    """Whole-array block, same block for every grid step (weights)."""
    nd = len(shape)
    return pl.BlockSpec(tuple(shape), lambda b, _nd=nd: (0,) * _nd)


def _batch_spec(shape):
    """Per-batch block along the leading axis (grid=(B,))."""
    nd = len(shape)
    blk = (1,) + tuple(shape[1:])
    return pl.BlockSpec(blk, lambda b, _nd=nd: (b,) + (0,) * (_nd - 1))


def _mm(a, w_bf16):
    """MXU matmul: bf16 operands (weights pre-cast at init), f32 accumulation."""
    return jnp.dot(a.astype(jnp.bfloat16), w_bf16,
                   preferred_element_type=jnp.float32)


def _ln(x, g, b):
    mu = jnp.mean(x, axis=-1, keepdims=True)
    var = jnp.mean((x - mu) ** 2, axis=-1, keepdims=True)
    return (x - mu) * jax.lax.rsqrt(var + LN_EPS) * g + b


def _gelu_new(x):
    return 0.5 * x * (1.0 + jnp.tanh(0.7978845608028654 *
                                     (x + 0.044715 * x * x * x)))


# ========================== fused vision-path kernel ===========================
def _vision_kernel(p1_ref, w1_ref, b1_ref, w2_ref, b2_ref, w3_ref, b3_ref,
                   fcw_ref, fcb_ref, lw_ref, lb_ref, o_ref, pad_ref, *, oh, ow):
    """One batch element: stem GEMM -> conv2 -> conv3(+res) -> pool -> fc -> proj."""
    C = STEM_C
    hw = oh * ow

    # stem conv (stride 2, via wrapper-side im2col) + ReLU
    y1 = jnp.maximum(_mm(p1_ref[0], w1_ref[...]) + b1_ref[...], 0.0)   # (hw, C)

    def conv3x3(y_in, w_ref, b_ref):
        # zero-padded activation lives in a VMEM scratch; 9 shifted matmuls.
        pad_ref[...] = jnp.zeros_like(pad_ref)
        pad_ref[1:1 + oh, 1:1 + ow, :] = y_in.reshape(oh, ow, C)
        acc = jnp.zeros((hw, C), jnp.float32) + b_ref[...]
        for ki in range(3):
            for kj in range(3):
                win = pad_ref[ki:ki + oh, kj:kj + ow, :].reshape(hw, C)
                acc = acc + _mm(win, w_ref[ki * 3 + kj])
        return acc

    y2 = jnp.maximum(conv3x3(y1, w2_ref, b2_ref), 0.0)
    y3 = jnp.maximum(conv3x3(y2, w3_ref, b3_ref) + y1, 0.0)            # residual

    pooled = jnp.mean(y3, axis=0, keepdims=True)                       # (1, C)
    f = _mm(pooled, fcw_ref[...]) + fcb_ref[...]                       # (1, HIDDEN)
    o = _mm(f, lw_ref[...]) + lb_ref[...]                              # (1, N_EMBD)
    o_ref[0] = o.astype(o_ref.dtype)


def vision_pallas(patches, vp, *, oh, ow):
    B = patches.shape[0]
    args = [patches, vp["w1"], vp["b1"], vp["w2"], vp["b2"], vp["w3"], vp["b3"],
            vp["fc_w"], vp["fc_b"], vp["lin_w"], vp["lin_b"]]
    in_specs = [_batch_spec(patches.shape)] + [_const_spec(a.shape) for a in args[1:]]
    out = pl.pallas_call(
        functools.partial(_vision_kernel, oh=oh, ow=ow),
        out_shape=jax.ShapeDtypeStruct((B, 1, N_EMBD), jnp.float32),
        grid=(B,),
        in_specs=in_specs,
        out_specs=_batch_spec((B, 1, N_EMBD)),
        scratch_shapes=[pltpu.VMEM((oh + 2, ow + 2, STEM_C), jnp.float32)],
        compiler_params=pltpu.CompilerParams(dimension_semantics=("parallel",)),
    )(*args)
    return out.reshape(B, N_EMBD)


def _im2col_nhwc(x_nhwc, kh, kw, stride, pad):
    """NHWC patch extraction for the stride-2 stem conv (XLA glue).
    Feature order (c outer, kh*kw inner) matches w.reshape(OC, C*KH*KW)."""
    B, H, W, C = x_nhwc.shape
    xp = jnp.pad(x_nhwc, ((0, 0), (pad, pad), (pad, pad), (0, 0)))
    OH = (H + 2 * pad - kh) // stride + 1
    OW = (W + 2 * pad - kw) // stride + 1
    patches = [xp[:, i:i + stride * OH:stride, j:j + stride * OW:stride, :]
               for i in range(kh) for j in range(kw)]
    p = jnp.stack(patches, axis=-1)                       # (B, OH, OW, C, KH*KW)
    return p.reshape(B, OH * OW, C * kh * kw), OH, OW


def vision_features(params, images_nchw):
    x = jnp.transpose(images_nchw, (0, 2, 3, 1))          # single NCHW -> NHWC
    # TODO(synk): the stride-2 stem im2col stays as XLA glue (strided window
    #             extraction inside the kernel would need strided ref reads).
    patches, OH, OW = _im2col_nhwc(x, 3, 3, 2, 1)         # (B, 64, 27)
    return vision_pallas(patches, params["vision"], oh=OH, ow=OW)


# ========================= fused text-decoder kernel ===========================
def _decoder_kernel(h_ref, bias_ref,
                    ln1g_ref, ln1b_ref, attnw_ref, attnb_ref,
                    projw_ref, projb_ref, ln2g_ref, ln2b_ref,
                    fcw_ref, fcb_ref, mpw_ref, mpb_ref,
                    lnfg_ref, lnfb_ref, lmw_ref, *rest, seq, compute_loss):
    """One batch element: N_LAYER GPT-2 blocks + final LN + LM head [+ CE sum]."""
    if compute_loss:
        lab_ref, logits_ref, loss_ref = rest
    else:
        (logits_ref,) = rest

    D = N_EMBD
    h = h_ref[0].astype(jnp.float32)                       # (T, D)
    bias = bias_ref[0]                                     # (T, T) causal+padding
    scale = float(HEAD_DIM) ** -0.5

    for l in range(N_LAYER):
        # ---- attention block ----
        x = _ln(h, ln1g_ref[l], ln1b_ref[l])
        qkv = _mm(x, attnw_ref[l]) + attnb_ref[l]          # (T, 3D)
        heads = []
        # TODO(synk): heads stay a short unrolled loop -- a single
        #             'bqhd,bkhd->bhqk' einsum needs multi-batch-dim dot_general
        #             which the Mosaic lowering does not support.
        for hh in range(N_HEAD):
            lo = hh * HEAD_DIM
            q = qkv[:, lo:lo + HEAD_DIM]
            k = qkv[:, D + lo:D + lo + HEAD_DIM]
            v = qkv[:, 2 * D + lo:2 * D + lo + HEAD_DIM]
            s = jnp.einsum('qd,kd->qk',
                           q.astype(jnp.bfloat16), k.astype(jnp.bfloat16),
                           preferred_element_type=jnp.float32) * scale
            s = s + bias
            m = jnp.max(s, axis=-1, keepdims=True)
            p = jnp.exp(s - m)
            p = p * pl.reciprocal(jnp.sum(p, axis=-1, keepdims=True), approx=True)
            heads.append(jnp.dot(p.astype(jnp.bfloat16), v.astype(jnp.bfloat16),
                                 preferred_element_type=jnp.float32))
        attn = jnp.concatenate(heads, axis=-1)             # (T, D)
        h = h + _mm(attn, projw_ref[l]) + projb_ref[l]

        # ---- MLP block ----
        x = _ln(h, ln2g_ref[l], ln2b_ref[l])
        m1 = _gelu_new(_mm(x, fcw_ref[l]) + fcb_ref[l])
        h = h + _mm(m1, mpw_ref[l]) + mpb_ref[l]

    # ---- final LN + tied LM head (lane-dense 128-wide store) ----
    x = _ln(h, lnfg_ref[...], lnfb_ref[...])
    logits = _mm(x, lmw_ref[...])                          # (T, VOCAB_PAD)
    logits_ref[0] = logits.astype(logits_ref.dtype)

    # ---- cross-entropy partial sum (skipped when labels is None) ----
    if compute_loss:
        lab = lab_ref[0]                                   # (T, 1) int32, -1 = ignore
        colv = jax.lax.broadcasted_iota(jnp.int32, (seq, VOCAB_PAD), 1)
        lg = jnp.where(colv < VOCAB, logits, MASK_VAL)     # mask padded vocab cols
        m = jnp.max(lg, axis=-1, keepdims=True)
        lse = jnp.log(jnp.sum(jnp.exp(lg - m), axis=-1, keepdims=True)) + m
        correct = jnp.sum(jnp.where(colv == lab, lg, 0.0), axis=-1, keepdims=True)
        valid = (lab >= 0).astype(jnp.float32)
        per_tok = (lse - correct) * valid                  # (T, 1)
        loss_ref[0] = jnp.sum(per_tok, axis=0, keepdims=True)   # (1, 1)


def decoder_pallas(dec, h0, bias, shift_labels):
    B, T, D = h0.shape
    compute_loss = shift_labels is not None
    args = [h0, bias,
            dec["ln1_g"], dec["ln1_b"], dec["attn_w"], dec["attn_b"],
            dec["proj_w"], dec["proj_b"], dec["ln2_g"], dec["ln2_b"],
            dec["fc_w"], dec["fc_b"], dec["mp_w"], dec["mp_b"],
            dec["ln_f_g"], dec["ln_f_b"], dec["lm_head_w"]]
    in_specs = [_batch_spec(h0.shape), _batch_spec(bias.shape)]
    in_specs += [_const_spec(a.shape) for a in args[2:]]
    if compute_loss:
        lab = shift_labels.reshape(B, T, 1)
        args.append(lab)
        in_specs.append(_batch_spec(lab.shape))
        out_shape = (jax.ShapeDtypeStruct((B, T, VOCAB_PAD), jnp.float32),
                     jax.ShapeDtypeStruct((B, 1, 1), jnp.float32))
        out_specs = (_batch_spec((B, T, VOCAB_PAD)), _batch_spec((B, 1, 1)))
    else:
        out_shape = jax.ShapeDtypeStruct((B, T, VOCAB_PAD), jnp.float32)
        out_specs = _batch_spec((B, T, VOCAB_PAD))
    return pl.pallas_call(
        functools.partial(_decoder_kernel, seq=T, compute_loss=compute_loss),
        out_shape=out_shape,
        grid=(B,),
        in_specs=in_specs,
        out_specs=out_specs,
        compiler_params=pltpu.CompilerParams(dimension_semantics=("parallel",)),
    )(*args)


def text_decoder(params, input_ids, attention_mask=None, labels=None):
    dec = params["decoder"]
    B, T = input_ids.shape
    # TODO(synk): token-embedding gather + wpe add stay as XLA glue; they could
    #             move in-kernel via PrefetchScalarGridSpec scalar prefetch.
    h0 = jnp.take(dec["wte"], input_ids, axis=0) + dec["wpe"][:T][None]   # (B,T,D)

    if attention_mask is None:
        attention_mask = jnp.ones((B, T), jnp.float32)
    row = jnp.arange(T, dtype=jnp.int32)[:, None]
    col = jnp.arange(T, dtype=jnp.int32)[None, :]
    allowed = (col <= row)[None, :, :] & (attention_mask > 0)[:, None, :]  # (B,T,T)
    bias = jnp.where(allowed, 0.0, MASK_VAL).astype(jnp.float32)

    if labels is not None:
        shift_labels = jnp.concatenate(
            [labels[:, 1:].astype(jnp.int32), jnp.full((B, 1), -1, jnp.int32)],
            axis=1)                                        # -1 = ignore
        logits_pad, loss_sums = decoder_pallas(dec, h0, bias, shift_labels)
        count = jnp.maximum(jnp.sum((shift_labels >= 0).astype(jnp.float32)), 1.0)
        loss = jnp.sum(loss_sums) / count
    else:
        logits_pad = decoder_pallas(dec, h0, bias, None)
        loss = None

    logits = logits_pad[:, :, :VOCAB]                      # (B, T, VOCAB)
    return {"loss": loss, "logits": logits}


def vision_language_model(params, images, input_ids, attention_mask=None, labels=None):
    """Matches VisionLanguageModel.forward: torch returns only the text-decoder
    output (visual features computed then discarded); we also return the visual
    features so the vision-path Pallas kernel is not DCE'd."""
    visual = vision_features(params, images)
    output = text_decoder(params, input_ids, attention_mask=attention_mask,
                          labels=labels)
    return output, visual


# ================================ parameter init ===============================
def init_params(key):
    ks = iter(jax.random.split(key, 64))
    nrm = lambda k, shp, s=0.02: jax.random.normal(k, shp, jnp.float32) * s
    bf = lambda a: a.astype(jnp.bfloat16)
    D, L = N_EMBD, N_LAYER

    # --- vision encoder (abbreviated resnet18), PyTorch layouts then rearrange ---
    conv1_w = nrm(next(ks), (STEM_C, 3, 3, 3), 0.05)       # (OC, C, KH, KW)
    conv2_w = nrm(next(ks), (STEM_C, STEM_C, 3, 3), 0.05)
    conv3_w = nrm(next(ks), (STEM_C, STEM_C, 3, 3), 0.05)
    vision = {
        # stem im2col GEMM weight: (C*KH*KW, OC)
        "w1": bf(conv1_w.reshape(STEM_C, 3 * 9).T),
        "b1": jnp.zeros((1, STEM_C), jnp.float32),
        # 3x3 convs as 9 shifted matmuls: (KH*KW, C_in, OC)
        "w2": bf(jnp.transpose(conv2_w, (2, 3, 1, 0)).reshape(9, STEM_C, STEM_C)),
        "b2": jnp.zeros((1, STEM_C), jnp.float32),
        "w3": bf(jnp.transpose(conv3_w, (2, 3, 1, 0)).reshape(9, STEM_C, STEM_C)),
        "b3": jnp.zeros((1, STEM_C), jnp.float32),
        "fc_w": bf(nrm(next(ks), (FEAT, HIDDEN_SIZE))),
        "fc_b": jnp.zeros((1, HIDDEN_SIZE), jnp.float32),
        # self.linear = nn.Linear(HIDDEN_SIZE, n_embd)
        "lin_w": bf(nrm(next(ks), (HIDDEN_SIZE, N_EMBD))),
        "lin_b": jnp.zeros((1, N_EMBD), jnp.float32),
    }

    # --- GPT-2 style decoder, per-layer weights stacked on a leading L axis ---
    wte = nrm(next(ks), (VOCAB, N_EMBD))
    decoder = {
        "wte": wte,
        "wpe": nrm(next(ks), (N_POS, N_EMBD), 0.01),
        "ln_f_g": jnp.ones((1, D), jnp.float32),
        "ln_f_b": jnp.zeros((1, D), jnp.float32),
        # tied LM head: wte.T, vocab padded 64 -> 128 (lane-dense logits store)
        "lm_head_w": bf(jnp.pad(wte, ((0, VOCAB_PAD - VOCAB), (0, 0))).T),
        "ln1_g": jnp.ones((L, 1, D), jnp.float32),
        "ln1_b": jnp.zeros((L, 1, D), jnp.float32),
        "attn_w": bf(nrm(next(ks), (L, D, 3 * D))),
        "attn_b": jnp.zeros((L, 1, 3 * D), jnp.float32),
        "proj_w": bf(nrm(next(ks), (L, D, D))),
        "proj_b": jnp.zeros((L, 1, D), jnp.float32),
        "ln2_g": jnp.ones((L, 1, D), jnp.float32),
        "ln2_b": jnp.zeros((L, 1, D), jnp.float32),
        "fc_w": bf(nrm(next(ks), (L, D, 4 * D))),
        "fc_b": jnp.zeros((L, 1, 4 * D), jnp.float32),
        "mp_w": bf(nrm(next(ks), (L, 4 * D, D))),
        "mp_b": jnp.zeros((L, 1, D), jnp.float32),
    }
    return {"vision": vision, "decoder": decoder}


# ===================================== main ====================================
if __name__ == "__main__":
    k_params, k_img, k_ids = jax.random.split(jax.random.PRNGKey(0), 3)
    params = init_params(k_params)

    B, T = 2, 8
    images = jax.random.normal(k_img, (B, 3, 16, 16), jnp.float32)     # NCHW API
    input_ids = jax.random.randint(k_ids, (B, T), 0, VOCAB, jnp.int32)
    attention_mask = jnp.ones((B, T), jnp.float32)
    labels = input_ids

    fwd = jax.jit(vision_language_model)
    output, visual_features = fwd(params, images, input_ids, attention_mask, labels)
    jax.block_until_ready((output["loss"], output["logits"], visual_features))

    assert output["logits"].shape == (B, T, VOCAB)
    assert visual_features.shape == (B, N_EMBD)
    assert bool(jnp.isfinite(output["loss"]))
    print("KERNEL_OK")
</pallas_src>

<mosaic_0001>
module attributes {stable_mosaic.version = 11 : i64} {
  func.func @_vision_kernel(%arg0: i32, %arg1: memref<1x64x27xf32, #tpu.memory_space<vmem>>, %arg2: memref<27x16xbf16, #tpu.memory_space<vmem>>, %arg3: memref<1x16xf32, #tpu.memory_space<vmem>>, %arg4: memref<9x16x16xbf16, #tpu.memory_space<vmem>>, %arg5: memref<1x16xf32, #tpu.memory_space<vmem>>, %arg6: memref<9x16x16xbf16, #tpu.memory_space<vmem>>, %arg7: memref<1x16xf32, #tpu.memory_space<vmem>>, %arg8: memref<16x32xbf16, #tpu.memory_space<vmem>>, %arg9: memref<1x32xf32, #tpu.memory_space<vmem>>, %arg10: memref<32x32xbf16, #tpu.memory_space<vmem>>, %arg11: memref<1x32xf32, #tpu.memory_space<vmem>>, %arg12: memref<1x1x32xf32, #tpu.memory_space<vmem>>, %arg13: memref<10x10x16xf32, #tpu.memory_space<vmem>>) attributes {dimension_semantics = [#tpu.dimension_semantics<parallel>], iteration_bounds = array<i64: 2>, scalar_prefetch = 0 : i64, scratch_operands = 1 : i64, tpu.core_type = #tpu.core_type<tc>, window_params = [{transform_indices = @transform_0, window_bounds = array<i64: 1, 64, 27>}, {pipeline_mode = #tpu.pipeline_mode<synchronous>, transform_indices = @transform_1, window_bounds = array<i64: 27, 16>}, {pipeline_mode = #tpu.pipeline_mode<synchronous>, transform_indices = @transform_2, window_bounds = array<i64: 1, 16>}, {pipeline_mode = #tpu.pipeline_mode<synchronous>, transform_indices = @transform_3, window_bounds = array<i64: 9, 16, 16>}, {pipeline_mode = #tpu.pipeline_mode<synchronous>, transform_indices = @transform_4, window_bounds = array<i64: 1, 16>}, {pipeline_mode = #tpu.pipeline_mode<synchronous>, transform_indices = @transform_5, window_bounds = array<i64: 9, 16, 16>}, {pipeline_mode = #tpu.pipeline_mode<synchronous>, transform_indices = @transform_6, window_bounds = array<i64: 1, 16>}, {pipeline_mode = #tpu.pipeline_mode<synchronous>, transform_indices = @transform_7, window_bounds = array<i64: 16, 32>}, {pipeline_mode = #tpu.pipeline_mode<synchronous>, transform_indices = @transform_8, window_bounds = array<i64: 1, 32>}, {pipeline_mode = #tpu.pipeline_mode<synchronous>, transform_indices = @transform_9, window_bounds = array<i64: 32, 32>}, {pipeline_mode = #tpu.pipeline_mode<synchronous>, transform_indices = @transform_10, window_bounds = array<i64: 1, 32>}, {transform_indices = @transform_11, window_bounds = array<i64: 1, 1, 32>}]} {
    %c0 = arith.constant 0 : index
    %c0_0 = arith.constant 0 : index
    %c0_1 = arith.constant 0 : index
    %0 = vector.load %arg1[%c0, %c0_0, %c0_1] : memref<1x64x27xf32, #tpu.memory_space<vmem>>, vector<1x64x27xf32>
    %1 = vector.shape_cast %0 : vector<1x64x27xf32> to vector<64x27xf32>
    %c0_2 = arith.constant 0 : index
    %c0_3 = arith.constant 0 : index
    %2 = vector.load %arg2[%c0_2, %c0_3] : memref<27x16xbf16, #tpu.memory_space<vmem>>, vector<27x16xbf16>
    %3 = arith.truncf %1 : vector<64x27xf32> to vector<64x27xbf16>
    %cst = arith.constant dense<0.000000e+00> : vector<64x16xf32>
    %4 = tpu.matmul %3, %2, %cst {dimension_numbers = #tpu.dot_dimension_numbers<[1], [0], [0], [1], [0, 0, 1, 1], [], []>} : vector<64x27xbf16>, vector<27x16xbf16>, vector<64x16xf32> -> vector<64x16xf32>
    %c0_4 = arith.constant 0 : index
    %c0_5 = arith.constant 0 : index
    %5 = vector.load %arg3[%c0_4, %c0_5] : memref<1x16xf32, #tpu.memory_space<vmem>>, vector<1x16xf32>
    %6 = vector.broadcast %5 : vector<1x16xf32> to vector<64x16xf32>
    %7 = arith.addf %4, %6 : vector<64x16xf32>
    %cst_6 = arith.constant 0.000000e+00 : f32
    %8 = vector.broadcast %cst_6 : f32 to vector<64x16xf32>
    %9 = arith.maximumf %7, %8 : vector<64x16xf32>
    %cst_7 = arith.constant 0.000000e+00 : f32
    %10 = vector.broadcast %cst_7 : f32 to vector<10x10x16xf32>
    %c0_8 = arith.constant 0 : index
    %c0_9 = arith.constant 0 : index
    %c0_10 = arith.constant 0 : index
    %11 = vector.load %arg13[%c0_8, %c0_9, %c0_10] : memref<10x10x16xf32, #tpu.memory_space<vmem>>, vector<10x10x16xf32>
    tpu.vector_store %arg13[%c0_8, %c0_9, %c0_10], %10 {strides = array<i32>} : memref<10x10x16xf32, #tpu.memory_space<vmem>>, vector<10x10x16xf32>,
    %12 = vector.shape_cast %9 : vector<64x16xf32> to vector<8x8x16xf32>
    %c1 = arith.constant 1 : index
    %c1_11 = arith.constant 1 : index
    %c0_12 = arith.constant 0 : index
    %13 = vector.load %arg13[%c1, %c1_11, %c0_12] : memref<10x10x16xf32, #tpu.memory_space<vmem>>, vector<8x8x16xf32>
    tpu.vector_store %arg13[%c1, %c1_11, %c0_12], %12 {strides = array<i32>} : memref<10x10x16xf32, #tpu.memory_space<vmem>>, vector<8x8x16xf32>,
    %cst_13 = arith.constant 0.000000e+00 : f32
    %14 = vector.broadcast %cst_13 : f32 to vector<64x16xf32>
    %c0_14 = arith.constant 0 : index
    %c0_15 = arith.constant 0 : index
    %15 = vector.load %arg5[%c0_14, %c0_15] : memref<1x16xf32, #tpu.memory_space<vmem>>, vector<1x16xf32>
    %16 = vector.broadcast %15 : vector<1x16xf32> to vector<64x16xf32>
    %17 = arith.addf %14, %16 : vector<64x16xf32>
    %c0_16 = arith.constant 0 : index
    %c0_17 = arith.constant 0 : index
    %c0_18 = arith.constant 0 : index
    %18 = vector.load %arg13[%c0_16, %c0_17, %c0_18] : memref<10x10x16xf32, #tpu.memory_space<vmem>>, vector<8x8x16xf32>
    %19 = vector.shape_cast %18 : vector<8x8x16xf32> to vector<64x16xf32>
    %c0_19 = arith.constant 0 : index
    %c0_20 = arith.constant 0 : index
    %c0_21 = arith.constant 0 : index
    %20 = vector.load %arg4[%c0_19, %c0_20, %c0_21] : memref<9x16x16xbf16, #tpu.memory_space<vmem>>, vector<1x16x16xbf16>
    %21 = vector.shape_cast %20 : vector<1x16x16xbf16> to vector<16x16xbf16>
    %22 = arith.truncf %19 : vector<64x16xf32> to vector<64x16xbf16>
    %cst_22 = arith.constant dense<0.000000e+00> : vector<64x16xf32>
    %23 = tpu.matmul %22, %21, %cst_22 {dimension_numbers = #tpu.dot_dimension_numbers<[1], [0], [0], [1], [0, 0, 1, 1], [], []>} : vector<64x16xbf16>, vector<16x16xbf16>, vector<64x16xf32> -> vector<64x16xf32>
    %24 = arith.addf %17, %23 : vector<64x16xf32>
    %c0_23 = arith.constant 0 : index
    %c1_24 = arith.constant 1 : index
    %c0_25 = arith.constant 0 : index
    %25 = vector.load %arg13[%c0_23, %c1_24, %c0_25] : memref<10x10x16xf32, #tpu.memory_space<vmem>>, vector<8x8x16xf32>
    %26 = vector.shape_cast %25 : vector<8x8x16xf32> to vector<64x16xf32>
    %c1_26 = arith.constant 1 : index
    %c0_27 = arith.constant 0 : index
    %c0_28 = arith.constant 0 : index
    %27 = vector.load %arg4[%c1_26, %c0_27, %c0_28] : memref<9x16x16xbf16, #tpu.memory_space<vmem>>, vector<1x16x16xbf16>
    %28 = vector.shape_cast %27 : vector<1x16x16xbf16> to vector<16x16xbf16>
    %29 = arith.truncf %26 : vector<64x16xf32> to vector<64x16xbf16>
    %cst_29 = arith.constant dense<0.000000e+00> : vector<64x16xf32>
    %30 = tpu.matmul %29, %28, %cst_29 {dimension_numbers = #tpu.dot_dimension_numbers<[1], [0], [0], [1], [0, 0, 1, 1], [], []>} : vector<64x16xbf16>, vector<16x16xbf16>, vector<64x16xf32> -> vector<64x16xf32>
    %31 = arith.addf %24, %30 : vector<64x16xf32>
    %c0_30 = arith.constant 0 : index
    %c2 = arith.constant 2 : index
    %c0_31 = arith.constant 0 : index
    %32 = vector.load %arg13[%c0_30, %c2, %c0_31] : memref<10x10x16xf32, #tpu.memory_space<vmem>>, vector<8x8x16xf32>
    %33 = vector.shape_cast %32 : vector<8x8x16xf32> to vector<64x16xf32>
    %c2_32 = arith.constant 2 : index
    %c0_33 = arith.constant 0 : index
    %c0_34 = arith.constant 0 : index
    %34 = vector.load %arg4[%c2_32, %c0_33, %c0_34] : memref<9x16x16xbf16, #tpu.memory_space<vmem>>, vector<1x16x16xbf16>
    %35 = vector.shape_cast %34 : vector<1x16x16xbf16> to vector<16x16xbf16>
    %36 = arith.truncf %33 : vector<64x16xf32> to vector<64x16xbf16>
    %cst_35 = arith.constant dense<0.000000e+00> : vector<64x16xf32>
    %37 = tpu.matmul %36, %35, %cst_35 {dimension_numbers = #tpu.dot_dimension_numbers<[1], [0], [0], [1], [0, 0, 1, 1], [], []>} : vector<64x16xbf16>, vector<16x16xbf16>, vector<64x16xf32> -> vector<64x16xf32>
    %38 = arith.addf %31, %37 : vector<64x16xf32>
    %c1_36 = arith.constant 1 : index
    %c0_37 = arith.constant 0 : index
    %c0_38 = arith.constant 0 : index
    %39 = vector.load %arg13[%c1_36, %c0_37, %c0_38] : memref<10x10x16xf32, #tpu.memory_space<vmem>>, vector<8x8x16xf32>
    %40 = vector.shape_cast %39 : vector<8x8x16xf32> to vector<64x16xf32>
    %c3 = arith.constant 3 : index
    %c0_39 = arith.constant 0 : index
    %c0_40 = arith.constant 0 : index
    %41 = vector.load %arg4[%c3, %c0_39, %c0_40] : memref<9x16x16xbf16, #tpu.memory_space<vmem>>, vector<1x16x16xbf16>
    %42 = vector.shape_cast %41 : vector<1x16x16xbf16> to vector<16x16xbf16>
    %43 = arith.truncf %40 : vector<64x16xf32> to vector<64x16xbf16>
    %cst_41 = arith.constant dense<0.000000e+00> : vector<64x16xf32>
    %44 = tpu.matmul %43, %42, %cst_41 {dimension_numbers = #tpu.dot_dimension_numbers<[1], [0], [0], [1], [0, 0, 1, 1], [], []>} : vector<64x16xbf16>, vector<16x16xbf16>, vector<64x16xf32> -> vector<64x16xf32>
    %45 = arith.addf %38, %44 : vector<64x16xf32>
    %c1_42 = arith.constant 1 : index
    %c1_43 = arith.constant 1 : index
    %c0_44 = arith.constant 0 : index
    %46 = vector.load %arg13[%c1_42, %c1_43, %c0_44] : memref<10x10x16xf32, #tpu.memory_space<vmem>>, vector<8x8x16xf32>
    %47 = vector.shape_cast %46 : vector<8x8x16xf32> to vector<64x16xf32>
    %c4 = arith.constant 4 : index
    %c0_45 = arith.constant 0 : index
    %c0_46 = arith.constant 0 : index
    %48 = vector.load %arg4[%c4, %c0_45, %c0_46] : memref<9x16x16xbf16, #tpu.memory_space<vmem>>, vector<1x16x16xbf16>
    %49 = vector.shape_cast %48 : vector<1x16x16xbf16> to vector<16x16xbf16>
    %50 = arith.truncf %47 : vector<64x16xf32> to vector<64x16xbf16>
    %cst_47 = arith.constant dense<0.000000e+00> : vector<64x16xf32>
    %51 = tpu.matmul %50, %49, %cst_47 {dimension_numbers = #tpu.dot_dimension_numbers<[1], [0], [0], [1], [0, 0, 1, 1], [], []>} : vector<64x16xbf16>, vector<16x16xbf16>, vector<64x16xf32> -> vector<64x16xf32>
    %52 = arith.addf %45, %51 : vector<64x16xf32>
    %c1_48 = arith.constant 1 : index
    %c2_49 = arith.constant 2 : index
    %c0_50 = arith.constant 0 : index
    %53 = vector.load %arg13[%c1_48, %c2_49, %c0_50] : memref<10x10x16xf32, #tpu.memory_space<vmem>>, vector<8x8x16xf32>
    %54 = vector.shape_cast %53 : vector<8x8x16xf32> to vector<64x16xf32>
    %c5 = arith.constant 5 : index
    %c0_51 = arith.constant 0 : index
    %c0_52 = arith.constant 0 : index
    %55 = vector.load %arg4[%c5, %c0_51, %c0_52] : memref<9x16x16xbf16, #tpu.memory_space<vmem>>, vector<1x16x16xbf16>
    %56 = vector.shape_cast %55 : vector<1x16x16xbf16> to vector<16x16xbf16>
    %57 = arith.truncf %54 : vector<64x16xf32> to vector<64x16xbf16>
    %cst_53 = arith.constant dense<0.000000e+00> : vector<64x16xf32>
    %58 = tpu.matmul %57, %56, %cst_53 {dimension_numbers = #tpu.dot_dimension_numbers<[1], [0], [0], [1], [0, 0, 1, 1], [], []>} : vector<64x16xbf16>, vector<16x16xbf16>, vector<64x16xf32> -> vector<64x16xf32>
    %59 = arith.addf %52, %58 : vector<64x16xf32>
    %c2_54 = arith.constant 2 : index
    %c0_55 = arith.constant 0 : index
    %c0_56 = arith.constant 0 : index
    %60 = vector.load %arg13[%c2_54, %c0_55, %c0_56] : memref<10x10x16xf32, #tpu.memory_space<vmem>>, vector<8x8x16xf32>
    %61 = vector.shape_cast %60 : vector<8x8x16xf32> to vector<64x16xf32>
    %c6 = arith.constant 6 : index
    %c0_57 = arith.constant 0 : index
    %c0_58 = arith.constant 0 : index
    %62 = vector.load %arg4[%c6, %c0_57, %c0_58] : memref<9x16x16xbf16, #tpu.memory_space<vmem>>, vector<1x16x16xbf16>
    %63 = vector.shape_cast %62 : vector<1x16x16xbf16> to vector<16x16xbf16>
    %64 = arith.truncf %61 : vector<64x16xf32> to vector<64x16xbf16>
    %cst_59 = arith.constant dense<0.000000e+00> : vector<64x16xf32>
    %65 = tpu.matmul %64, %63, %cst_59 {dimension_numbers = #tpu.dot_dimension_numbers<[1], [0], [0], [1], [0, 0, 1, 1], [], []>} : vector<64x16xbf16>, vector<16x16xbf16>, vector<64x16xf32> -> vector<64x16xf32>
    %66 = arith.addf %59, %65 : vector<64x16xf32>
    %c2_60 = arith.constant 2 : index
    %c1_61 = arith.constant 1 : index
    %c0_62 = arith.constant 0 : index
    %67 = vector.load %arg13[%c2_60, %c1_61, %c0_62] : memref<10x10x16xf32, #tpu.memory_space<vmem>>, vector<8x8x16xf32>
    %68 = vector.shape_cast %67 : vector<8x8x16xf32> to vector<64x16xf32>
    %c7 = arith.constant 7 : index
    %c0_63 = arith.constant 0 : index
    %c0_64 = arith.constant 0 : index
    %69 = vector.load %arg4[%c7, %c0_63, %c0_64] : memref<9x16x16xbf16, #tpu.memory_space<vmem>>, vector<1x16x16xbf16>
    %70 = vector.shape_cast %69 : vector<1x16x16xbf16> to vector<16x16xbf16>
    %71 = arith.truncf %68 : vector<64x16xf32> to vector<64x16xbf16>
    %cst_65 = arith.constant dense<0.000000e+00> : vector<64x16xf32>
    %72 = tpu.matmul %71, %70, %cst_65 {dimension_numbers = #tpu.dot_dimension_numbers<[1], [0], [0], [1], [0, 0, 1, 1], [], []>} : vector<64x16xbf16>, vector<16x16xbf16>, vector<64x16xf32> -> vector<64x16xf32>
    %73 = arith.addf %66, %72 : vector<64x16xf32>
    %c2_66 = arith.constant 2 : index
    %c2_67 = arith.constant 2 : index
    %c0_68 = arith.constant 0 : index
    %74 = vector.load %arg13[%c2_66, %c2_67, %c0_68] : memref<10x10x16xf32, #tpu.memory_space<vmem>>, vector<8x8x16xf32>
    %75 = vector.shape_cast %74 : vector<8x8x16xf32> to vector<64x16xf32>
    %c8 = arith.constant 8 : index
    %c0_69 = arith.constant 0 : index
    %c0_70 = arith.constant 0 : index
    %76 = vector.load %arg4[%c8, %c0_69, %c0_70] : memref<9x16x16xbf16, #tpu.memory_space<vmem>>, vector<1x16x16xbf16>
    %77 = vector.shape_cast %76 : vector<1x16x16xbf16> to vector<16x16xbf16>
    %78 = arith.truncf %75 : vector<64x16xf32> to vector<64x16xbf16>
    %cst_71 = arith.constant dense<0.000000e+00> : vector<64x16xf32>
    %79 = tpu.matmul %78, %77, %cst_71 {dimension_numbers = #tpu.dot_dimension_numbers<[1], [0], [0], [1], [0, 0, 1, 1], [], []>} : vector<64x16xbf16>, vector<16x16xbf16>, vector<64x16xf32> -> vector<64x16xf32>
    %80 = arith.addf %73, %79 : vector<64x16xf32>
    %cst_72 = arith.constant 0.000000e+00 : f32
    %81 = vector.broadcast %cst_72 : f32 to vector<64x16xf32>
    %82 = arith.maximumf %80, %81 : vector<64x16xf32>
    %cst_73 = arith.constant 0.000000e+00 : f32
    %83 = vector.broadcast %cst_73 : f32 to vector<10x10x16xf32>
    %c0_74 = arith.constant 0 : index
    %c0_75 = arith.constant 0 : index
    %c0_76 = arith.constant 0 : index
    %84 = vector.load %arg13[%c0_74, %c0_75, %c0_76] : memref<10x10x16xf32, #tpu.memory_space<vmem>>, vector<10x10x16xf32>
    tpu.vector_store %arg13[%c0_74, %c0_75, %c0_76], %83 {strides = array<i32>} : memref<10x10x16xf32, #tpu.memory_space<vmem>>, vector<10x10x16xf32>,
    %85 = vector.shape_cast %82 : vector<64x16xf32> to vector<8x8x16xf32>
    %c1_77 = arith.constant 1 : index
    %c1_78 = arith.constant 1 : index
    %c0_79 = arith.constant 0 : index
    %86 = vector.load %arg13[%c1_77, %c1_78, %c0_79] : memref<10x10x16xf32, #tpu.memory_space<vmem>>, vector<8x8x16xf32>
    tpu.vector_store %arg13[%c1_77, %c1_78, %c0_79], %85 {strides = array<i32>} : memref<10x10x16xf32, #tpu.memory_space<vmem>>, vector<8x8x16xf32>,
    %cst_80 = arith.constant 0.000000e+00 : f32
    %87 = vector.broadcast %cst_80 : f32 to vector<64x16xf32>
    %c0_81 = arith.constant 0 : index
    %c0_82 = arith.constant 0 : index
    %88 = vector.load %arg7[%c0_81, %c0_82] : memref<1x16xf32, #tpu.memory_space<vmem>>, vector<1x16xf32>
    %89 = vector.broadcast %88 : vector<1x16xf32> to vector<64x16xf32>
    %90 = arith.addf %87, %89 : vector<64x16xf32>
    %c0_83 = arith.constant 0 : index
    %c0_84 = arith.constant 0 : index
    %c0_85 = arith.constant 0 : index
    %91 = vector.load %arg13[%c0_83, %c0_84, %c0_85] : memref<10x10x16xf32, #tpu.memory_space<vmem>>, vector<8x8x16xf32>
    %92 = vector.shape_cast %91 : vector<8x8x16xf32> to vector<64x16xf32>
    %c0_86 = arith.constant 0 : index
    %c0_87 = arith.constant 0 : index
    %c0_88 = arith.constant 0 : index
    %93 = vector.load %arg6[%c0_86, %c0_87, %c0_88] : memref<9x16x16xbf16, #tpu.memory_space<vmem>>, vector<1x16x16xbf16>
    %94 = vector.shape_cast %93 : vector<1x16x16xbf16> to vector<16x16xbf16>
    %95 = arith.truncf %92 : vector<64x16xf32> to vector<64x16xbf16>
    %cst_89 = arith.constant dense<0.000000e+00> : vector<64x16xf32>
    %96 = tpu.matmul %95, %94, %cst_89 {dimension_numbers = #tpu.dot_dimension_numbers<[1], [0], [0], [1], [0, 0, 1, 1], [], []>} : vector<64x16xbf16>, vector<16x16xbf16>, vector<64x16xf32> -> vector<64x16xf32>
    %97 = arith.addf %90, %96 : vector<64x16xf32>
    %c0_90 = arith.constant 0 : index
    %c1_91 = arith.constant 1 : index
    %c0_92 = arith.constant 0 : index
    %98 = vector.load %arg13[%c0_90, %c1_91, %c0_92] : memref<10x10x16xf32, #tpu.memory_space<vmem>>, vector<8x8x16xf32>
    %99 = vector.shape_cast %98 : vector<8x8x16xf32> to vector<64x16xf32>
    %c1_93 = arith.constant 1 : index
    %c0_94 = arith.constant 0 : index
    %c0_95 = arith.constant 0 : index
    %100 = vector.load %arg6[%c1_93, %c0_94, %c0_95] : memref<9x16x16xbf16, #tpu.memory_space<vmem>>, vector<1x16x16xbf16>
    %101 = vector.shape_cast %100 : vector<1x16x16xbf16> to vector<16x16xbf16>
    %102 = arith.truncf %99 : vector<64x16xf32> to vector<64x16xbf16>
    %cst_96 = arith.constant dense<0.000000e+00> : vector<64x16xf32>
    %103 = tpu.matmul %102, %101, %cst_96 {dimension_numbers = #tpu.dot_dimension_numbers<[1], [0], [0], [1], [0, 0, 1, 1], [], []>} : vector<64x16xbf16>, vector<16x16xbf16>, vector<64x16xf32> -> vector<64x16xf32>
    %104 = arith.addf %97, %103 : vector<64x16xf32>
    %c0_97 = arith.constant 0 : index
    %c2_98 = arith.constant 2 : index
    %c0_99 = arith.constant 0 : index
    %105 = vector.load %arg13[%c0_97, %c2_98, %c0_99] : memref<10x10x16xf32, #tpu.memory_space<vmem>>, vector<8x8x16xf32>
    %106 = vector.shape_cast %105 : vector<8x8x16xf32> to vector<64x16xf32>
    %c2_100 = arith.constant 2 : index
    %c0_101 = arith.constant 0 : index
    %c0_102 = arith.constant 0 : index
    %107 = vector.load %arg6[%c2_100, %c0_101, %c0_102] : memref<9x16x16xbf16, #tpu.memory_space<vmem>>, vector<1x16x16xbf16>
    %108 = vector.shape_cast %107 : vector<1x16x16xbf16> to vector<16x16xbf16>
    %109 = arith.truncf %106 : vector<64x16xf32> to vector<64x16xbf16>
    %cst_103 = arith.constant dense<0.000000e+00> : vector<64x16xf32>
    %110 = tpu.matmul %109, %108, %cst_103 {dimension_numbers = #tpu.dot_dimension_numbers<[1], [0], [0], [1], [0, 0, 1, 1], [], []>} : vector<64x16xbf16>, vector<16x16xbf16>, vector<64x16xf32> -> vector<64x16xf32>
    %111 = arith.addf %104, %110 : vector<64x16xf32>
    %c1_104 = arith.constant 1 : index
    %c0_105 = arith.constant 0 : index
    %c0_106 = arith.constant 0 : index
    %112 = vector.load %arg13[%c1_104, %c0_105, %c0_106] : memref<10x10x16xf32, #tpu.memory_space<vmem>>, vector<8x8x16xf32>
    %113 = vector.shape_cast %112 : vector<8x8x16xf32> to vector<64x16xf32>
    %c3_107 = arith.constant 3 : index
    %c0_108 = arith.constant 0 : index
    %c0_109 = arith.constant 0 : index
    %114 = vector.load %arg6[%c3_107, %c0_108, %c0_109] : memref<9x16x16xbf16, #tpu.memory_space<vmem>>, vector<1x16x16xbf16>
    %115 = vector.shape_cast %114 : vector<1x16x16xbf16> to vector<16x16xbf16>
    %116 = arith.truncf %113 : vector<64x16xf32> to vector<64x16xbf16>
    %cst_110 = arith.constant dense<0.000000e+00> : vector<64x16xf32>
    %117 = tpu.matmul %116, %115, %cst_110 {dimension_numbers = #tpu.dot_dimension_numbers<[1], [0], [0], [1], [0, 0, 1, 1], [], []>} : vector<64x16xbf16>, vector<16x16xbf16>, vector<64x16xf32> -> vector<64x16xf32>
    %118 = arith.addf %111, %117 : vector<64x16xf32>
    %c1_111 = arith.constant 1 : index
    %c1_112 = arith.constant 1 : index
    %c0_113 = arith.constant 0 : index
    %119 = vector.load %arg13[%c1_111, %c1_112, %c0_113] : memref<10x10x16xf32, #tpu.memory_space<vmem>>, vector<8x8x16xf32>
    %120 = vector.shape_cast %119 : vector<8x8x16xf32> to vector<64x16xf32>
    %c4_114 = arith.constant 4 : index
    %c0_115 = arith.constant 0 : index
    %c0_116 = arith.constant 0 : index
    %121 = vector.load %arg6[%c4_114, %c0_115, %c0_116] : memref<9x16x16xbf16, #tpu.memory_space<vmem>>, vector<1x16x16xbf16>
    %122 = vector.shape_cast %121 : vector<1x16x16xbf16> to vector<16x16xbf16>
    %123 = arith.truncf %120 : vector<64x16xf32> to vector<64x16xbf16>
    %cst_117 = arith.constant dense<0.000000e+00> : vector<64x16xf32>
    %124 = tpu.matmul %123, %122, %cst_117 {dimension_numbers = #tpu.dot_dimension_numbers<[1], [0], [0], [1], [0, 0, 1, 1], [], []>} : vector<64x16xbf16>, vector<16x16xbf16>, vector<64x16xf32> -> vector<64x16xf32>
    %125 = arith.addf %118, %124 : vector<64x16xf32>
    %c1_118 = arith.constant 1 : index
    %c2_119 = arith.constant 2 : index
    %c0_120 = arith.constant 0 : index
    %126 = vector.load %arg13[%c1_118, %c2_119, %c0_120] : memref<10x10x16xf32, #tpu.memory_space<vmem>>, vector<8x8x16xf32>
    %127 = vector.shape_cast %126 : vector<8x8x16xf32> to vector<64x16xf32>
    %c5_121 = arith.constant 5 : index
    %c0_122 = arith.constant 0 : index
    %c0_123 = arith.constant 0 : index
    %128 = vector.load %arg6[%c5_121, %c0_122, %c0_123] : memref<9x16x16xbf16, #tpu.memory_space<vmem>>, vector<1x16x16xbf16>
    %129 = vector.shape_cast %128 : vector<1x16x16xbf16> to vector<16x16xbf16>
    %130 = arith.truncf %127 : vector<64x16xf32> to vector<64x16xbf16>
    %cst_124 = arith.constant dense<0.000000e+00> : vector<64x16xf32>
    %131 = tpu.matmul %130, %129, %cst_124 {dimension_numbers = #tpu.dot_dimension_numbers<[1], [0], [0], [1], [0, 0, 1, 1], [], []>} : vector<64x16xbf16>, vector<16x16xbf16>, vector<64x16xf32> -> vector<64x16xf32>
    %132 = arith.addf %125, %131 : vector<64x16xf32>
    %c2_125 = arith.constant 2 : index
    %c0_126 = arith.constant 0 : index
    %c0_127 = arith.constant 0 : index
    %133 = vector.load %arg13[%c2_125, %c0_126, %c0_127] : memref<10x10x16xf32, #tpu.memory_space<vmem>>, vector<8x8x16xf32>
    %134 = vector.shape_cast %133 : vector<8x8x16xf32> to vector<64x16xf32>
    %c6_128 = arith.constant 6 : index
    %c0_129 = arith.constant 0 : index
    %c0_130 = arith.constant 0 : index
    %135 = vector.load %arg6[%c6_128, %c0_129, %c0_130] : memref<9x16x16xbf16, #tpu.memory_space<vmem>>, vector<1x16x16xbf16>
    %136 = vector.shape_cast %135 : vector<1x16x16xbf16> to vector<16x16xbf16>
    %137 = arith.truncf %134 : vector<64x16xf32> to vector<64x16xbf16>
    %cst_131 = arith.constant dense<0.000000e+00> : vector<64x16xf32>
    %138 = tpu.matmul %137, %136, %cst_131 {dimension_numbers = #tpu.dot_dimension_numbers<[1], [0], [0], [1], [0, 0, 1, 1], [], []>} : vector<64x16xbf16>, vector<16x16xbf16>, vector<64x16xf32> -> vector<64x16xf32>
    %139 = arith.addf %132, %138 : vector<64x16xf32>
    %c2_132 = arith.constant 2 : index
    %c1_133 = arith.constant 1 : index
    %c0_134 = arith.constant 0 : index
    %140 = vector.load %arg13[%c2_132, %c1_133, %c0_134] : memref<10x10x16xf32, #tpu.memory_space<vmem>>, vector<8x8x16xf32>
    %141 = vector.shape_cast %140 : vector<8x8x16xf32> to vector<64x16xf32>
    %c7_135 = arith.constant 7 : index
    %c0_136 = arith.constant 0 : index
    %c0_137 = arith.constant 0 : index
    %142 = vector.load %arg6[%c7_135, %c0_136, %c0_137] : memref<9x16x16xbf16, #tpu.memory_space<vmem>>, vector<1x16x16xbf16>
    %143 = vector.shape_cast %142 : vector<1x16x16xbf16> to vector<16x16xbf16>
    %144 = arith.truncf %141 : vector<64x16xf32> to vector<64x16xbf16>
    %cst_138 = arith.constant dense<0.000000e+00> : vector<64x16xf32>
    %145 = tpu.matmul %144, %143, %cst_138 {dimension_numbers = #tpu.dot_dimension_numbers<[1], [0], [0], [1], [0, 0, 1, 1], [], []>} : vector<64x16xbf16>, vector<16x16xbf16>, vector<64x16xf32> -> vector<64x16xf32>
    %146 = arith.addf %139, %145 : vector<64x16xf32>
    %c2_139 = arith.constant 2 : index
    %c2_140 = arith.constant 2 : index
    %c0_141 = arith.constant 0 : index
    %147 = vector.load %arg13[%c2_139, %c2_140, %c0_141] : memref<10x10x16xf32, #tpu.memory_space<vmem>>, vector<8x8x16xf32>
    %148 = vector.shape_cast %147 : vector<8x8x16xf32> to vector<64x16xf32>
    %c8_142 = arith.constant 8 : index
    %c0_143 = arith.constant 0 : index
    %c0_144 = arith.constant 0 : index
    %149 = vector.load %arg6[%c8_142, %c0_143, %c0_144] : memref<9x16x16xbf16, #tpu.memory_space<vmem>>, vector<1x16x16xbf16>
    %150 = vector.shape_cast %149 : vector<1x16x16xbf16> to vector<16x16xbf16>
    %151 = arith.truncf %148 : vector<64x16xf32> to vector<64x16xbf16>
    %cst_145 = arith.constant dense<0.000000e+00> : vector<64x16xf32>
    %152 = tpu.matmul %151, %150, %cst_145 {dimension_numbers = #tpu.dot_dimension_numbers<[1], [0], [0], [1], [0, 0, 1, 1], [], []>} : vector<64x16xbf16>, vector<16x16xbf16>, vector<64x16xf32> -> vector<64x16xf32>
    %153 = arith.addf %146, %152 : vector<64x16xf32>
    %154 = arith.addf %153, %9 : vector<64x16xf32>
    %cst_146 = arith.constant 0.000000e+00 : f32
    %155 = vector.broadcast %cst_146 : f32 to vector<64x16xf32>
    %156 = arith.maximumf %154, %155 : vector<64x16xf32>
    %cst_147 = arith.constant dense<0.000000e+00> : vector<16xf32>
    %157 = vector.multi_reduction <add>, %156, %cst_147 [0] : vector<64x16xf32> to vector<16xf32>
    %158 = vector.shape_cast %157 : vector<16xf32> to vector<1x16xf32>
    %cst_148 = arith.constant 6.400000e+01 : f32
    %159 = vector.broadcast %cst_148 : f32 to vector<1x16xf32>
    %160 = arith.divf %158, %159 : vector<1x16xf32>
    %c0_149 = arith.constant 0 : index
    %c0_150 = arith.constant 0 : index
    %161 = vector.load %arg8[%c0_149, %c0_150] : memref<16x32xbf16, #tpu.memory_space<vmem>>, vector<16x32xbf16>
    %162 = arith.truncf %160 : vector<1x16xf32> to vector<1x16xbf16>
    %cst_151 = arith.constant dense<0.000000e+00> : vector<1x32xf32>
    %163 = tpu.matmul %162, %161, %cst_151 {dimension_numbers = #tpu.dot_dimension_numbers<[1], [0], [0], [1], [0, 0, 1, 1], [], []>} : vector<1x16xbf16>, vector<16x32xbf16>, vector<1x32xf32> -> vector<1x32xf32>
    %c0_152 = arith.constant 0 : index
    %c0_153 = arith.constant 0 : index
    %164 = vector.load %arg9[%c0_152, %c0_153] : memref<1x32xf32, #tpu.memory_space<vmem>>, vector<1x32xf32>
    %165 = arith.addf %163, %164 : vector<1x32xf32>
    %c0_154 = arith.constant 0 : index
    %c0_155 = arith.constant 0 : index
    %166 = vector.load %arg10[%c0_154, %c0_155] : memref<32x32xbf16, #tpu.memory_space<vmem>>, vector<32x32xbf16>
    %167 = arith.truncf %165 : vector<1x32xf32> to vector<1x32xbf16>
    %cst_156 = arith.constant dense<0.000000e+00> : vector<1x32xf32>
    %168 = tpu.matmul %167, %166, %cst_156 {dimension_numbers = #tpu.dot_dimension_numbers<[1], [0], [0], [1], [0, 0, 1, 1], [], []>} : vector<1x32xbf16>, vector<32x32xbf16>, vector<1x32xf32> -> vector<1x32xf32>
    %c0_157 = arith.constant 0 : index
    %c0_158 = arith.constant 0 : index
    %169 = vector.load %arg11[%c0_157, %c0_158] : memref<1x32xf32, #tpu.memory_space<vmem>>, vector<1x32xf32>
    %170 = arith.addf %168, %169 : vector<1x32xf32>
    %c0_159 = arith.constant 0 : index
    %c0_160 = arith.constant 0 : index
    %c0_161 = arith.constant 0 : index
    %171 = vector.load %arg12[%c0_159, %c0_160, %c0_161] : memref<1x1x32xf32, #tpu.memory_space<vmem>>, vector<1x1x32xf32>
    %172 = vector.shape_cast %171 : vector<1x1x32xf32> to vector<1x32xf32>
    %173 = vector.shape_cast %170 : vector<1x32xf32> to vector<1x1x32xf32>
    tpu.vector_store %arg12[%c0_159, %c0_160, %c0_161], %173 {strides = array<i32>} : memref<1x1x32xf32, #tpu.memory_space<vmem>>, vector<1x1x32xf32>,
    return
  }
  func.func @transform_0(%arg0: i32) -> (i32, i32, i32) {
    %c0_i32 = arith.constant 0 : i32
    %c0_i32_0 = arith.constant 0 : i32
    %c0_i32_1 = arith.constant 0 : i32
    return %arg0, %c0_i32, %c0_i32_0 : i32, i32, i32
  }
  func.func @transform_1(%arg0: i32) -> (i32, i32) {
    %c0_i32 = arith.constant 0 : i32
    %c0_i32_0 = arith.constant 0 : i32
    %c0_i32_1 = arith.constant 0 : i32
    return %c0_i32, %c0_i32_0 : i32, i32
  }
  func.func @transform_2(%arg0: i32) -> (i32, i32) {
    %c0_i32 = arith.constant 0 : i32
    %c0_i32_0 = arith.constant 0 : i32
    %c0_i32_1 = arith.constant 0 : i32
    return %c0_i32, %c0_i32_0 : i32, i32
  }
  func.func @transform_3(%arg0: i32) -> (i32, i32, i32) {
    %c0_i32 = arith.constant 0 : i32
    %c0_i32_0 = arith.constant 0 : i32
    %c0_i32_1 = arith.constant 0 : i32
    %c0_i32_2 = arith.constant 0 : i32
    return %c0_i32, %c0_i32_0, %c0_i32_1 : i32, i32, i32
  }
  func.func @transform_4(%arg0: i32) -> (i32, i32) {
    %c0_i32 = arith.constant 0 : i32
    %c0_i32_0 = arith.constant 0 : i32
    %c0_i32_1 = arith.constant 0 : i32
    return %c0_i32, %c0_i32_0 : i32, i32
  }
  func.func @transform_5(%arg0: i32) -> (i32, i32, i32) {
    %c0_i32 = arith.constant 0 : i32
    %c0_i32_0 = arith.constant 0 : i32
    %c0_i32_1 = arith.constant 0 : i32
    %c0_i32_2 = arith.constant 0 : i32
    return %c0_i32, %c0_i32_0, %c0_i32_1 : i32, i32, i32
  }
  func.func @transform_6(%arg0: i32) -> (i32, i32) {
    %c0_i32 = arith.constant 0 : i32
    %c0_i32_0 = arith.constant 0 : i32
    %c0_i32_1 = arith.constant 0 : i32
    return %c0_i32, %c0_i32_0 : i32, i32
  }
  func.func @transform_7(%arg0: i32) -> (i32, i32) {
    %c0_i32 = arith.constant 0 : i32
    %c0_i32_0 = arith.constant 0 : i32
    %c0_i32_1 = arith.constant 0 : i32
    return %c0_i32, %c0_i32_0 : i32, i32
  }
  func.func @transform_8(%arg0: i32) -> (i32, i32) {
    %c0_i32 = arith.constant 0 : i32
    %c0_i32_0 = arith.constant 0 : i32
    %c0_i32_1 = arith.constant 0 : i32
    return %c0_i32, %c0_i32_0 : i32, i32
  }
  func.func @transform_9(%arg0: i32) -> (i32, i32) {
    %c0_i32 = arith.constant 0 : i32
    %c0_i32_0 = arith.constant 0 : i32
    %c0_i32_1 = arith.constant 0 : i32
    return %c0_i32, %c0_i32_0 : i32, i32
  }
  func.func @transform_10(%arg0: i32) -> (i32, i32) {
    %c0_i32 = arith.constant 0 : i32
    %c0_i32_0 = arith.constant 0 : i32
    %c0_i32_1 = arith.constant 0 : i32
    return %c0_i32, %c0_i32_0 : i32, i32
  }
  func.func @transform_11(%arg0: i32) -> (i32, i32, i32) {
    %c0_i32 = arith.constant 0 : i32
    %c0_i32_0 = arith.constant 0 : i32
    %c0_i32_1 = arith.constant 0 : i32
    return %arg0, %c0_i32, %c0_i32_0 : i32, i32, i32
  }
}

module attributes {stable_mosaic.version = 11 : i64} {
  func.func @_decoder_kernel(%arg0: i32, %arg1: memref<1x8x32xf32, #tpu.memory_space<vmem>>, %arg2: memref<1x8x8xf32, #tpu.memory_space<vmem>>, %arg3: memref<2x1x32xf32, #tpu.memory_space<vmem>>, %arg4: memref<2x1x32xf32, #tpu.memory_space<vmem>>, %arg5: memref<2x32x96xbf16, #tpu.memory_space<vmem>>, %arg6: memref<2x1x96xf32, #tpu.memory_space<vmem>>, %arg7: memref<2x32x32xbf16, #tpu.memory_space<vmem>>, %arg8: memref<2x1x32xf32, #tpu.memory_space<vmem>>, %arg9: memref<2x1x32xf32, #tpu.memory_space<vmem>>, %arg10: memref<2x1x32xf32, #tpu.memory_space<vmem>>, %arg11: memref<2x32x128xbf16, #tpu.memory_space<vmem>>, %arg12: memref<2x1x128xf32, #tpu.memory_space<vmem>>, %arg13: memref<2x128x32xbf16, #tpu.memory_space<vmem>>, %arg14: memref<2x1x32xf32, #tpu.memory_space<vmem>>, %arg15: memref<1x32xf32, #tpu.memory_space<vmem>>, %arg16: memref<1x32xf32, #tpu.memory_space<vmem>>, %arg17: memref<32x128xbf16, #tpu.memory_space<vmem>>, %arg18: memref<1x8x1xi32, #tpu.memory_space<vmem>>, %arg19: memref<1x8x128xf32, #tpu.memory_space<vmem>>, %arg20: memref<1x1x1xf32, #tpu.memory_space<vmem>>) attributes {dimension_semantics = [#tpu.dimension_semantics<parallel>], iteration_bounds = array<i64: 2>, scalar_prefetch = 0 : i64, scratch_operands = 0 : i64, tpu.core_type = #tpu.core_type<tc>, window_params = [{transform_indices = @transform_0, window_bounds = array<i64: 1, 8, 32>}, {transform_indices = @transform_1, window_bounds = array<i64: 1, 8, 8>}, {pipeline_mode = #tpu.pipeline_mode<synchronous>, transform_indices = @transform_2, window_bounds = array<i64: 2, 1, 32>}, {pipeline_mode = #tpu.pipeline_mode<synchronous>, transform_indices = @transform_3, window_bounds = array<i64: 2, 1, 32>}, {pipeline_mode = #tpu.pipeline_mode<synchronous>, transform_indices = @transform_4, window_bounds = array<i64: 2, 32, 96>}, {pipeline_mode = #tpu.pipeline_mode<synchronous>, transform_indices = @transform_5, window_bounds = array<i64: 2, 1, 96>}, {pipeline_mode = #tpu.pipeline_mode<synchronous>, transform_indices = @transform_6, window_bounds = array<i64: 2, 32, 32>}, {pipeline_mode = #tpu.pipeline_mode<synchronous>, transform_indices = @transform_7, window_bounds = array<i64: 2, 1, 32>}, {pipeline_mode = #tpu.pipeline_mode<synchronous>, transform_indices = @transform_8, window_bounds = array<i64: 2, 1, 32>}, {pipeline_mode = #tpu.pipeline_mode<synchronous>, transform_indices = @transform_9, window_bounds = array<i64: 2, 1, 32>}, {pipeline_mode = #tpu.pipeline_mode<synchronous>, transform_indices = @transform_10, window_bounds = array<i64: 2, 32, 128>}, {pipeline_mode = #tpu.pipeline_mode<synchronous>, transform_indices = @transform_11, window_bounds = array<i64: 2, 1, 128>}, {pipeline_mode = #tpu.pipeline_mode<synchronous>, transform_indices = @transform_12, window_bounds = array<i64: 2, 128, 32>}, {pipeline_mode = #tpu.pipeline_mode<synchronous>, transform_indices = @transform_13, window_bounds = array<i64: 2, 1, 32>}, {pipeline_mode = #tpu.pipeline_mode<synchronous>, transform_indices = @transform_14, window_bounds = array<i64: 1, 32>}, {pipeline_mode = #tpu.pipeline_mode<synchronous>, transform_indices = @transform_15, window_bounds = array<i64: 1, 32>}, {pipeline_mode = #tpu.pipeline_mode<synchronous>, transform_indices = @transform_16, window_bounds = array<i64: 32, 128>}, {transform_indices = @transform_17, window_bounds = array<i64: 1, 8, 1>}, {transform_indices = @transform_18, window_bounds = array<i64: 1, 8, 128>}, {transform_indices = @transform_19, window_bounds = array<i64: 1, 1, 1>}]} {
    %c0 = arith.constant 0 : index
    %c0_0 = arith.constant 0 : index
    %c0_1 = arith.constant 0 : index
    %0 = vector.load %arg1[%c0, %c0_0, %c0_1] : memref<1x8x32xf32, #tpu.memory_space<vmem>>, vector<1x8x32xf32>
    %1 = vector.shape_cast %0 : vector<1x8x32xf32> to vector<8x32xf32>
    %c0_2 = arith.constant 0 : index
    %c0_3 = arith.constant 0 : index
    %c0_4 = arith.constant 0 : index
    %2 = vector.load %arg2[%c0_2, %c0_3, %c0_4] : memref<1x8x8xf32, #tpu.memory_space<vmem>>, vector<1x8x8xf32>
    %3 = vector.shape_cast %2 : vector<1x8x8xf32> to vector<8x8xf32>
    %c0_5 = arith.constant 0 : index
    %c0_6 = arith.constant 0 : index
    %c0_7 = arith.constant 0 : index
    %4 = vector.load %arg3[%c0_5, %c0_6, %c0_7] : memref<2x1x32xf32, #tpu.memory_space<vmem>>, vector<1x1x32xf32>
    %5 = vector.shape_cast %4 : vector<1x1x32xf32> to vector<1x32xf32>
    %c0_8 = arith.constant 0 : index
    %c0_9 = arith.constant 0 : index
    %c0_10 = arith.constant 0 : index
    %6 = vector.load %arg4[%c0_8, %c0_9, %c0_10] : memref<2x1x32xf32, #tpu.memory_space<vmem>>, vector<1x1x32xf32>
    %7 = vector.shape_cast %6 : vector<1x1x32xf32> to vector<1x32xf32>
    %cst = arith.constant dense<0.000000e+00> : vector<8xf32>
    %8 = vector.multi_reduction <add>, %1, %cst [1] : vector<8x32xf32> to vector<8xf32>
    %9 = vector.shape_cast %8 : vector<8xf32> to vector<8x1xf32>
    %cst_11 = arith.constant 3.200000e+01 : f32
    %10 = vector.broadcast %cst_11 : f32 to vector<8x1xf32>
    %11 = arith.divf %9, %10 : vector<8x1xf32>
    %12 = vector.broadcast %11 : vector<8x1xf32> to vector<8x32xf32>
    %13 = arith.subf %1, %12 : vector<8x32xf32>
    %14 = arith.mulf %13, %13 : vector<8x32xf32>
    %cst_12 = arith.constant dense<0.000000e+00> : vector<8xf32>
    %15 = vector.multi_reduction <add>, %14, %cst_12 [1] : vector<8x32xf32> to vector<8xf32>
    %16 = vector.shape_cast %15 : vector<8xf32> to vector<8x1xf32>
    %cst_13 = arith.constant 3.200000e+01 : f32
    %17 = vector.broadcast %cst_13 : f32 to vector<8x1xf32>
    %18 = arith.divf %16, %17 : vector<8x1xf32>
    %19 = vector.broadcast %11 : vector<8x1xf32> to vector<8x32xf32>
    %20 = arith.subf %1, %19 : vector<8x32xf32>
    %cst_14 = arith.constant 9.99999974E-6 : f32
    %21 = vector.broadcast %cst_14 : f32 to vector<8x1xf32>
    %22 = arith.addf %18, %21 : vector<8x1xf32>
    %23 = math.rsqrt %22 : vector<8x1xf32>
    %24 = vector.broadcast %23 : vector<8x1xf32> to vector<8x32xf32>
    %25 = arith.mulf %20, %24 : vector<8x32xf32>
    %26 = vector.broadcast %5 : vector<1x32xf32> to vector<8x32xf32>
    %27 = arith.mulf %25, %26 : vector<8x32xf32>
    %28 = vector.broadcast %7 : vector<1x32xf32> to vector<8x32xf32>
    %29 = arith.addf %27, %28 : vector<8x32xf32>
    %c0_15 = arith.constant 0 : index
    %c0_16 = arith.constant 0 : index
    %c0_17 = arith.constant 0 : index
    %30 = vector.load %arg5[%c0_15, %c0_16, %c0_17] : memref<2x32x96xbf16, #tpu.memory_space<vmem>>, vector<1x32x96xbf16>
    %31 = vector.shape_cast %30 : vector<1x32x96xbf16> to vector<32x96xbf16>
    %32 = arith.truncf %29 : vector<8x32xf32> to vector<8x32xbf16>
    %cst_18 = arith.constant dense<0.000000e+00> : vector<8x96xf32>
    %33 = tpu.matmul %32, %31, %cst_18 {dimension_numbers = #tpu.dot_dimension_numbers<[1], [0], [0], [1], [0, 0, 1, 1], [], []>} : vector<8x32xbf16>, vector<32x96xbf16>, vector<8x96xf32> -> vector<8x96xf32>
    %c0_19 = arith.constant 0 : index
    %c0_20 = arith.constant 0 : index
    %c0_21 = arith.constant 0 : index
    %34 = vector.load %arg6[%c0_19, %c0_20, %c0_21] : memref<2x1x96xf32, #tpu.memory_space<vmem>>, vector<1x1x96xf32>
    %35 = vector.shape_cast %34 : vector<1x1x96xf32> to vector<1x96xf32>
    %36 = vector.broadcast %35 : vector<1x96xf32> to vector<8x96xf32>
    %37 = arith.addf %33, %36 : vector<8x96xf32>
    %38 = vector.extract_strided_slice %37 {offsets = [0, 0], sizes = [8, 8], strides = [1, 1]} : vector<8x96xf32> to vector<8x8xf32>
    %39 = vector.extract_strided_slice %37 {offsets = [0, 32], sizes = [8, 8], strides = [1, 1]} : vector<8x96xf32> to vector<8x8xf32>
    %40 = vector.extract_strided_slice %37 {offsets = [0, 64], sizes = [8, 8], strides = [1, 1]} : vector<8x96xf32> to vector<8x8xf32>
    %41 = arith.truncf %38 : vector<8x8xf32> to vector<8x8xbf16>
    %42 = arith.truncf %39 : vector<8x8xf32> to vector<8x8xbf16>
    "tpu.trace_start"() <{level = 10 : i32, message = "qd,kd->qk"}> : () -> ()
    %cst_22 = arith.constant dense<0.000000e+00> : vector<8x8xf32>
    %43 = tpu.matmul %41, %42, %cst_22 {dimension_numbers = #tpu.dot_dimension_numbers<[1], [1], [0], [0], [0, 0, 1, 0], [], []>} : vector<8x8xbf16>, vector<8x8xbf16>, vector<8x8xf32> -> vector<8x8xf32>
    "tpu.trace_stop"() : () -> ()
    %cst_23 = arith.constant 0.353553385 : f32
    %44 = vector.broadcast %cst_23 : f32 to vector<8x8xf32>
    %45 = arith.mulf %43, %44 : vector<8x8xf32>
    %46 = arith.addf %45, %3 : vector<8x8xf32>
    %cst_24 = arith.constant dense<0xFF800000> : vector<8xf32>
    %47 = vector.multi_reduction <maximumf>, %46, %cst_24 [1] : vector<8x8xf32> to vector<8xf32>
    %48 = vector.shape_cast %47 : vector<8xf32> to vector<8x1xf32>
    %49 = vector.broadcast %48 : vector<8x1xf32> to vector<8x8xf32>
    %50 = arith.subf %46, %49 : vector<8x8xf32>
    %51 = math.exp %50 : vector<8x8xf32>
    %cst_25 = arith.constant dense<0.000000e+00> : vector<8xf32>
    %52 = vector.multi_reduction <add>, %51, %cst_25 [1] : vector<8x8xf32> to vector<8xf32>
    %53 = vector.shape_cast %52 : vector<8xf32> to vector<8x1xf32>
    %54 = tpu.reciprocal %53 {approx = true} : vector<8x1xf32> -> vector<8x1xf32>
    %55 = vector.broadcast %54 : vector<8x1xf32> to vector<8x8xf32>
    %56 = arith.mulf %51, %55 : vector<8x8xf32>
    %57 = arith.truncf %56 : vector<8x8xf32> to vector<8x8xbf16>
    %58 = arith.truncf %40 : vector<8x8xf32> to vector<8x8xbf16>
    %cst_26 = arith.constant dense<0.000000e+00> : vector<8x8xf32>
    %59 = tpu.matmul %57, %58, %cst_26 {dimension_numbers = #tpu.dot_dimension_numbers<[1], [0], [0], [1], [0, 0, 1, 1], [], []>} : vector<8x8xbf16>, vector<8x8xbf16>, vector<8x8xf32> -> vector<8x8xf32>
    %60 = vector.extract_strided_slice %37 {offsets = [0, 8], sizes = [8, 8], strides = [1, 1]} : vector<8x96xf32> to vector<8x8xf32>
    %61 = vector.extract_strided_slice %37 {offsets = [0, 40], sizes = [8, 8], strides = [1, 1]} : vector<8x96xf32> to vector<8x8xf32>
    %62 = vector.extract_strided_slice %37 {offsets = [0, 72], sizes = [8, 8], strides = [1, 1]} : vector<8x96xf32> to vector<8x8xf32>
    %63 = arith.truncf %60 : vector<8x8xf32> to vector<8x8xbf16>
    %64 = arith.truncf %61 : vector<8x8xf32> to vector<8x8xbf16>
    "tpu.trace_start"() <{level = 10 : i32, message = "qd,kd->qk"}> : () -> ()
    %cst_27 = arith.constant dense<0.000000e+00> : vector<8x8xf32>
    %65 = tpu.matmul %63, %64, %cst_27 {dimension_numbers = #tpu.dot_dimension_numbers<[1], [1], [0], [0], [0, 0, 1, 0], [], []>} : vector<8x8xbf16>, vector<8x8xbf16>, vector<8x8xf32> -> vector<8x8xf32>
    "tpu.trace_stop"() : () -> ()
    %cst_28 = arith.constant 0.353553385 : f32
    %66 = vector.broadcast %cst_28 : f32 to vector<8x8xf32>
    %67 = arith.mulf %65, %66 : vector<8x8xf32>
    %68 = arith.addf %67, %3 : vector<8x8xf32>
    %cst_29 = arith.constant dense<0xFF800000> : vector<8xf32>
    %69 = vector.multi_reduction <maximumf>, %68, %cst_29 [1] : vector<8x8xf32> to vector<8xf32>
    %70 = vector.shape_cast %69 : vector<8xf32> to vector<8x1xf32>
    %71 = vector.broadcast %70 : vector<8x1xf32> to vector<8x8xf32>
    %72 = arith.subf %68, %71 : vector<8x8xf32>
    %73 = math.exp %72 : vector<8x8xf32>
    %cst_30 = arith.constant dense<0.000000e+00> : vector<8xf32>
    %74 = vector.multi_reduction <add>, %73, %cst_30 [1] : vector<8x8xf32> to vector<8xf32>
    %75 = vector.shape_cast %74 : vector<8xf32> to vector<8x1xf32>
    %76 = tpu.reciprocal %75 {approx = true} : vector<8x1xf32> -> vector<8x1xf32>
    %77 = vector.broadcast %76 : vector<8x1xf32> to vector<8x8xf32>
    %78 = arith.mulf %73, %77 : vector<8x8xf32>
    %79 = arith.truncf %78 : vector<8x8xf32> to vector<8x8xbf16>
    %80 = arith.truncf %62 : vector<8x8xf32> to vector<8x8xbf16>
    %cst_31 = arith.constant dense<0.000000e+00> : vector<8x8xf32>
    %81 = tpu.matmul %79, %80, %cst_31 {dimension_numbers = #tpu.dot_dimension_numbers<[1], [0], [0], [1], [0, 0, 1, 1], [], []>} : vector<8x8xbf16>, vector<8x8xbf16>, vector<8x8xf32> -> vector<8x8xf32>
    %82 = vector.extract_strided_slice %37 {offsets = [0, 16], sizes = [8, 8], strides = [1, 1]} : vector<8x96xf32> to vector<8x8xf32>
    %83 = vector.extract_strided_slice %37 {offsets = [0, 48], sizes = [8, 8], strides = [1, 1]} : vector<8x96xf32> to vector<8x8xf32>
    %84 = vector.extract_strided_slice %37 {offsets = [0, 80], sizes = [8, 8], strides = [1, 1]} : vector<8x96xf32> to vector<8x8xf32>
    %85 = arith.truncf %82 : vector<8x8xf32> to vector<8x8xbf16>
    %86 = arith.truncf %83 : vector<8x8xf32> to vector<8x8xbf16>
    "tpu.trace_start"() <{level = 10 : i32, message = "qd,kd->qk"}> : () -> ()
    %cst_32 = arith.constant dense<0.000000e+00> : vector<8x8xf32>
    %87 = tpu.matmul %85, %86, %cst_32 {dimension_numbers = #tpu.dot_dimension_numbers<[1], [1], [0], [0], [0, 0, 1, 0], [], []>} : vector<8x8xbf16>, vector<8x8xbf16>, vector<8x8xf32> -> vector<8x8xf32>
    "tpu.trace_stop"() : () -> ()
    %cst_33 = arith.constant 0.353553385 : f32
    %88 = vector.broadcast %cst_33 : f32 to vector<8x8xf32>
    %89 = arith.mulf %87, %88 : vector<8x8xf32>
    %90 = arith.addf %89, %3 : vector<8x8xf32>
    %cst_34 = arith.constant dense<0xFF800000> : vector<8xf32>
    %91 = vector.multi_reduction <maximumf>, %90, %cst_34 [1] : vector<8x8xf32> to vector<8xf32>
    %92 = vector.shape_cast %91 : vector<8xf32> to vector<8x1xf32>
    %93 = vector.broadcast %92 : vector<8x1xf32> to vector<8x8xf32>
    %94 = arith.subf %90, %93 : vector<8x8xf32>
    %95 = math.exp %94 : vector<8x8xf32>
    %cst_35 = arith.constant dense<0.000000e+00> : vector<8xf32>
    %96 = vector.multi_reduction <add>, %95, %cst_35 [1] : vector<8x8xf32> to vector<8xf32>
    %97 = vector.shape_cast %96 : vector<8xf32> to vector<8x1xf32>
    %98 = tpu.reciprocal %97 {approx = true} : vector<8x1xf32> -> vector<8x1xf32>
    %99 = vector.broadcast %98 : vector<8x1xf32> to vector<8x8xf32>
    %100 = arith.mulf %95, %99 : vector<8x8xf32>
    %101 = arith.truncf %100 : vector<8x8xf32> to vector<8x8xbf16>
    %102 = arith.truncf %84 : vector<8x8xf32> to vector<8x8xbf16>
    %cst_36 = arith.constant dense<0.000000e+00> : vector<8x8xf32>
    %103 = tpu.matmul %101, %102, %cst_36 {dimension_numbers = #tpu.dot_dimension_numbers<[1], [0], [0], [1], [0, 0, 1, 1], [], []>} : vector<8x8xbf16>, vector<8x8xbf16>, vector<8x8xf32> -> vector<8x8xf32>
    %104 = vector.extract_strided_slice %37 {offsets = [0, 24], sizes = [8, 8], strides = [1, 1]} : vector<8x96xf32> to vector<8x8xf32>
    %105 = vector.extract_strided_slice %37 {offsets = [0, 56], sizes = [8, 8], strides = [1, 1]} : vector<8x96xf32> to vector<8x8xf32>
    %106 = vector.extract_strided_slice %37 {offsets = [0, 88], sizes = [8, 8], strides = [1, 1]} : vector<8x96xf32> to vector<8x8xf32>
    %107 = arith.truncf %104 : vector<8x8xf32> to vector<8x8xbf16>
    %108 = arith.truncf %105 : vector<8x8xf32> to vector<8x8xbf16>
    "tpu.trace_start"() <{level = 10 : i32, message = "qd,kd->qk"}> : () -> ()
    %cst_37 = arith.constant dense<0.000000e+00> : vector<8x8xf32>
    %109 = tpu.matmul %107, %108, %cst_37 {dimension_numbers = #tpu.dot_dimension_numbers<[1], [1], [0], [0], [0, 0, 1, 0], [], []>} : vector<8x8xbf16>, vector<8x8xbf16>, vector<8x8xf32> -> vector<8x8xf32>
    "tpu.trace_stop"() : () -> ()
    %cst_38 = arith.constant 0.353553385 : f32
    %110 = vector.broadcast %cst_38 : f32 to vector<8x8xf32>
    %111 = arith.mulf %109, %110 : vector<8x8xf32>
    %112 = arith.addf %111, %3 : vector<8x8xf32>
    %cst_39 = arith.constant dense<0xFF800000> : vector<8xf32>
    %113 = vector.multi_reduction <maximumf>, %112, %cst_39 [1] : vector<8x8xf32> to vector<8xf32>
    %114 = vector.shape_cast %113 : vector<8xf32> to vector<8x1xf32>
    %115 = vector.broadcast %114 : vector<8x1xf32> to vector<8x8xf32>
    %116 = arith.subf %112, %115 : vector<8x8xf32>
    %117 = math.exp %116 : vector<8x8xf32>
    %cst_40 = arith.constant dense<0.000000e+00> : vector<8xf32>
    %118 = vector.multi_reduction <add>, %117, %cst_40 [1] : vector<8x8xf32> to vector<8xf32>
    %119 = vector.shape_cast %118 : vector<8xf32> to vector<8x1xf32>
    %120 = tpu.reciprocal %119 {approx = true} : vector<8x1xf32> -> vector<8x1xf32>
    %121 = vector.broadcast %120 : vector<8x1xf32> to vector<8x8xf32>
    %122 = arith.mulf %117, %121 : vector<8x8xf32>
    %123 = arith.truncf %122 : vector<8x8xf32> to vector<8x8xbf16>
    %124 = arith.truncf %106 : vector<8x8xf32> to vector<8x8xbf16>
    %cst_41 = arith.constant dense<0.000000e+00> : vector<8x8xf32>
    %125 = tpu.matmul %123, %124, %cst_41 {dimension_numbers = #tpu.dot_dimension_numbers<[1], [0], [0], [1], [0, 0, 1, 1], [], []>} : vector<8x8xbf16>, vector<8x8xbf16>, vector<8x8xf32> -> vector<8x8xf32>
    %126 = tpu.concatenate %59, %81, %103, %125 in 1 : vector<8x8xf32>, vector<8x8xf32>, vector<8x8xf32>, vector<8x8xf32> -> vector<8x32xf32>
    %c0_42 = arith.constant 0 : index
    %c0_43 = arith.constant 0 : index
    %c0_44 = arith.constant 0 : index
    %127 = vector.load %arg7[%c0_42, %c0_43, %c0_44] : memref<2x32x32xbf16, #tpu.memory_space<vmem>>, vector<1x32x32xbf16>
    %128 = vector.shape_cast %127 : vector<1x32x32xbf16> to vector<32x32xbf16>
    %129 = arith.truncf %126 : vector<8x32xf32> to vector<8x32xbf16>
    %cst_45 = arith.constant dense<0.000000e+00> : vector<8x32xf32>
    %130 = tpu.matmul %129, %128, %cst_45 {dimension_numbers = #tpu.dot_dimension_numbers<[1], [0], [0], [1], [0, 0, 1, 1], [], []>} : vector<8x32xbf16>, vector<32x32xbf16>, vector<8x32xf32> -> vector<8x32xf32>
    %131 = arith.addf %1, %130 : vector<8x32xf32>
    %c0_46 = arith.constant 0 : index
    %c0_47 = arith.constant 0 : index
    %c0_48 = arith.constant 0 : index
    %132 = vector.load %arg8[%c0_46, %c0_47, %c0_48] : memref<2x1x32xf32, #tpu.memory_space<vmem>>, vector<1x1x32xf32>
    %133 = vector.shape_cast %132 : vector<1x1x32xf32> to vector<1x32xf32>
    %134 = vector.broadcast %133 : vector<1x32xf32> to vector<8x32xf32>
    %135 = arith.addf %131, %134 : vector<8x32xf32>
    %c0_49 = arith.constant 0 : index
    %c0_50 = arith.constant 0 : index
    %c0_51 = arith.constant 0 : index
    %136 = vector.load %arg9[%c0_49, %c0_50, %c0_51] : memref<2x1x32xf32, #tpu.memory_space<vmem>>, vector<1x1x32xf32>
    %137 = vector.shape_cast %136 : vector<1x1x32xf32> to vector<1x32xf32>
    %c0_52 = arith.constant 0 : index
    %c0_53 = arith.constant 0 : index
    %c0_54 = arith.constant 0 : index
    %138 = vector.load %arg10[%c0_52, %c0_53, %c0_54] : memref<2x1x32xf32, #tpu.memory_space<vmem>>, vector<1x1x32xf32>
    %139 = vector.shape_cast %138 : vector<1x1x32xf32> to vector<1x32xf32>
    %cst_55 = arith.constant dense<0.000000e+00> : vector<8xf32>
    %140 = vector.multi_reduction <add>, %135, %cst_55 [1] : vector<8x32xf32> to vector<8xf32>
    %141 = vector.shape_cast %140 : vector<8xf32> to vector<8x1xf32>
    %cst_56 = arith.constant 3.200000e+01 : f32
    %142 = vector.broadcast %cst_56 : f32 to vector<8x1xf32>
    %143 = arith.divf %141, %142 : vector<8x1xf32>
    %144 = vector.broadcast %143 : vector<8x1xf32> to vector<8x32xf32>
    %145 = arith.subf %135, %144 : vector<8x32xf32>
    %146 = arith.mulf %145, %145 : vector<8x32xf32>
    %cst_57 = arith.constant dense<0.000000e+00> : vector<8xf32>
    %147 = vector.multi_reduction <add>, %146, %cst_57 [1] : vector<8x32xf32> to vector<8xf32>
    %148 = vector.shape_cast %147 : vector<8xf32> to vector<8x1xf32>
    %cst_58 = arith.constant 3.200000e+01 : f32
    %149 = vector.broadcast %cst_58 : f32 to vector<8x1xf32>
    %150 = arith.divf %148, %149 : vector<8x1xf32>
    %151 = vector.broadcast %143 : vector<8x1xf32> to vector<8x32xf32>
    %152 = arith.subf %135, %151 : vector<8x32xf32>
    %cst_59 = arith.constant 9.99999974E-6 : f32
    %153 = vector.broadcast %cst_59 : f32 to vector<8x1xf32>
    %154 = arith.addf %150, %153 : vector<8x1xf32>
    %155 = math.rsqrt %154 : vector<8x1xf32>
    %156 = vector.broadcast %155 : vector<8x1xf32> to vector<8x32xf32>
    %157 = arith.mulf %152, %156 : vector<8x32xf32>
    %158 = vector.broadcast %137 : vector<1x32xf32> to vector<8x32xf32>
    %159 = arith.mulf %157, %158 : vector<8x32xf32>
    %160 = vector.broadcast %139 : vector<1x32xf32> to vector<8x32xf32>
    %161 = arith.addf %159, %160 : vector<8x32xf32>
    %c0_60 = arith.constant 0 : index
    %c0_61 = arith.constant 0 : index
    %c0_62 = arith.constant 0 : index
    %162 = vector.load %arg11[%c0_60, %c0_61, %c0_62] : memref<2x32x128xbf16, #tpu.memory_space<vmem>>, vector<1x32x128xbf16>
    %163 = vector.shape_cast %162 : vector<1x32x128xbf16> to vector<32x128xbf16>
    %164 = arith.truncf %161 : vector<8x32xf32> to vector<8x32xbf16>
    %cst_63 = arith.constant dense<0.000000e+00> : vector<8x128xf32>
    %165 = tpu.matmul %164, %163, %cst_63 {dimension_numbers = #tpu.dot_dimension_numbers<[1], [0], [0], [1], [0, 0, 1, 1], [], []>} : vector<8x32xbf16>, vector<32x128xbf16>, vector<8x128xf32> -> vector<8x128xf32>
    %c0_64 = arith.constant 0 : index
    %c0_65 = arith.constant 0 : index
    %c0_66 = arith.constant 0 : index
    %166 = vector.load %arg12[%c0_64, %c0_65, %c0_66] : memref<2x1x128xf32, #tpu.memory_space<vmem>>, vector<1x1x128xf32>
    %167 = vector.shape_cast %166 : vector<1x1x128xf32> to vector<1x128xf32>
    %168 = vector.broadcast %167 : vector<1x128xf32> to vector<8x128xf32>
    %169 = arith.addf %165, %168 : vector<8x128xf32>
    %cst_67 = arith.constant 5.000000e-01 : f32
    %170 = vector.broadcast %cst_67 : f32 to vector<8x128xf32>
    %171 = arith.mulf %170, %169 : vector<8x128xf32>
    %cst_68 = arith.constant 4.471500e-02 : f32
    %172 = vector.broadcast %cst_68 : f32 to vector<8x128xf32>
    %173 = arith.mulf %172, %169 : vector<8x128xf32>
    %174 = arith.mulf %173, %169 : vector<8x128xf32>
    %175 = arith.mulf %174, %169 : vector<8x128xf32>
    %176 = arith.addf %169, %175 : vector<8x128xf32>
    %cst_69 = arith.constant 0.797884583 : f32
    %177 = vector.broadcast %cst_69 : f32 to vector<8x128xf32>
    %178 = arith.mulf %177, %176 : vector<8x128xf32>
    %179 = math.tanh %178 : vector<8x128xf32>
    %cst_70 = arith.constant 1.000000e+00 : f32
    %180 = vector.broadcast %cst_70 : f32 to vector<8x128xf32>
    %181 = arith.addf %180, %179 : vector<8x128xf32>
    %182 = arith.mulf %171, %181 : vector<8x128xf32>
    %c0_71 = arith.constant 0 : index
    %c0_72 = arith.constant 0 : index
    %c0_73 = arith.constant 0 : index
    %183 = vector.load %arg13[%c0_71, %c0_72, %c0_73] : memref<2x128x32xbf16, #tpu.memory_space<vmem>>, vector<1x128x32xbf16>
    %184 = vector.shape_cast %183 : vector<1x128x32xbf16> to vector<128x32xbf16>
    %185 = arith.truncf %182 : vector<8x128xf32> to vector<8x128xbf16>
    %cst_74 = arith.constant dense<0.000000e+00> : vector<8x32xf32>
    %186 = tpu.matmul %185, %184, %cst_74 {dimension_numbers = #tpu.dot_dimension_numbers<[1], [0], [0], [1], [0, 0, 1, 1], [], []>} : vector<8x128xbf16>, vector<128x32xbf16>, vector<8x32xf32> -> vector<8x32xf32>
    %187 = arith.addf %135, %186 : vector<8x32xf32>
    %c0_75 = arith.constant 0 : index
    %c0_76 = arith.constant 0 : index
    %c0_77 = arith.constant 0 : index
    %188 = vector.load %arg14[%c0_75, %c0_76, %c0_77] : memref<2x1x32xf32, #tpu.memory_space<vmem>>, vector<1x1x32xf32>
    %189 = vector.shape_cast %188 : vector<1x1x32xf32> to vector<1x32xf32>
    %190 = vector.broadcast %189 : vector<1x32xf32> to vector<8x32xf32>
    %191 = arith.addf %187, %190 : vector<8x32xf32>
    %c1 = arith.constant 1 : index
    %c0_78 = arith.constant 0 : index
    %c0_79 = arith.constant 0 : index
    %192 = vector.load %arg3[%c1, %c0_78, %c0_79] : memref<2x1x32xf32, #tpu.memory_space<vmem>>, vector<1x1x32xf32>
    %193 = vector.shape_cast %192 : vector<1x1x32xf32> to vector<1x32xf32>
    %c1_80 = arith.constant 1 : index
    %c0_81 = arith.constant 0 : index
    %c0_82 = arith.constant 0 : index
    %194 = vector.load %arg4[%c1_80, %c0_81, %c0_82] : memref<2x1x32xf32, #tpu.memory_space<vmem>>, vector<1x1x32xf32>
    %195 = vector.shape_cast %194 : vector<1x1x32xf32> to vector<1x32xf32>
    %cst_83 = arith.constant dense<0.000000e+00> : vector<8xf32>
    %196 = vector.multi_reduction <add>, %191, %cst_83 [1] : vector<8x32xf32> to vector<8xf32>
    %197 = vector.shape_cast %196 : vector<8xf32> to vector<8x1xf32>
    %cst_84 = arith.constant 3.200000e+01 : f32
    %198 = vector.broadcast %cst_84 : f32 to vector<8x1xf32>
    %199 = arith.divf %197, %198 : vector<8x1xf32>
    %200 = vector.broadcast %199 : vector<8x1xf32> to vector<8x32xf32>
    %201 = arith.subf %191, %200 : vector<8x32xf32>
    %202 = arith.mulf %201, %201 : vector<8x32xf32>
    %cst_85 = arith.constant dense<0.000000e+00> : vector<8xf32>
    %203 = vector.multi_reduction <add>, %202, %cst_85 [1] : vector<8x32xf32> to vector<8xf32>
    %204 = vector.shape_cast %203 : vector<8xf32> to vector<8x1xf32>
    %cst_86 = arith.constant 3.200000e+01 : f32
    %205 = vector.broadcast %cst_86 : f32 to vector<8x1xf32>
    %206 = arith.divf %204, %205 : vector<8x1xf32>
    %207 = vector.broadcast %199 : vector<8x1xf32> to vector<8x32xf32>
    %208 = arith.subf %191, %207 : vector<8x32xf32>
    %cst_87 = arith.constant 9.99999974E-6 : f32
    %209 = vector.broadcast %cst_87 : f32 to vector<8x1xf32>
    %210 = arith.addf %206, %209 : vector<8x1xf32>
    %211 = math.rsqrt %210 : vector<8x1xf32>
    %212 = vector.broadcast %211 : vector<8x1xf32> to vector<8x32xf32>
    %213 = arith.mulf %208, %212 : vector<8x32xf32>
    %214 = vector.broadcast %193 : vector<1x32xf32> to vector<8x32xf32>
    %215 = arith.mulf %213, %214 : vector<8x32xf32>
    %216 = vector.broadcast %195 : vector<1x32xf32> to vector<8x32xf32>
    %217 = arith.addf %215, %216 : vector<8x32xf32>
    %c1_88 = arith.constant 1 : index
    %c0_89 = arith.constant 0 : index
    %c0_90 = arith.constant 0 : index
    %218 = vector.load %arg5[%c1_88, %c0_89, %c0_90] : memref<2x32x96xbf16, #tpu.memory_space<vmem>>, vector<1x32x96xbf16>
    %219 = vector.shape_cast %218 : vector<1x32x96xbf16> to vector<32x96xbf16>
    %220 = arith.truncf %217 : vector<8x32xf32> to vector<8x32xbf16>
    %cst_91 = arith.constant dense<0.000000e+00> : vector<8x96xf32>
    %221 = tpu.matmul %220, %219, %cst_91 {dimension_numbers = #tpu.dot_dimension_numbers<[1], [0], [0], [1], [0, 0, 1, 1], [], []>} : vector<8x32xbf16>, vector<32x96xbf16>, vector<8x96xf32> -> vector<8x96xf32>
    %c1_92 = arith.constant 1 : index
    %c0_93 = arith.constant 0 : index
    %c0_94 = arith.constant 0 : index
    %222 = vector.load %arg6[%c1_92, %c0_93, %c0_94] : memref<2x1x96xf32, #tpu.memory_space<vmem>>, vector<1x1x96xf32>
    %223 = vector.shape_cast %222 : vector<1x1x96xf32> to vector<1x96xf32>
    %224 = vector.broadcast %223 : vector<1x96xf32> to vector<8x96xf32>
    %225 = arith.addf %221, %224 : vector<8x96xf32>
    %226 = vector.extract_strided_slice %225 {offsets = [0, 0], sizes = [8, 8], strides = [1, 1]} : vector<8x96xf32> to vector<8x8xf32>
    %227 = vector.extract_strided_slice %225 {offsets = [0, 32], sizes = [8, 8], strides = [1, 1]} : vector<8x96xf32> to vector<8x8xf32>
    %228 = vector.extract_strided_slice %225 {offsets = [0, 64], sizes = [8, 8], strides = [1, 1]} : vector<8x96xf32> to vector<8x8xf32>
    %229 = arith.truncf %226 : vector<8x8xf32> to vector<8x8xbf16>
    %230 = arith.truncf %227 : vector<8x8xf32> to vector<8x8xbf16>
    "tpu.trace_start"() <{level = 10 : i32, message = "qd,kd->qk"}> : () -> ()
    %cst_95 = arith.constant dense<0.000000e+00> : vector<8x8xf32>
    %231 = tpu.matmul %229, %230, %cst_95 {dimension_numbers = #tpu.dot_dimension_numbers<[1], [1], [0], [0], [0, 0, 1, 0], [], []>} : vector<8x8xbf16>, vector<8x8xbf16>, vector<8x8xf32> -> vector<8x8xf32>
    "tpu.trace_stop"() : () -> ()
    %cst_96 = arith.constant 0.353553385 : f32
    %232 = vector.broadcast %cst_96 : f32 to vector<8x8xf32>
    %233 = arith.mulf %231, %232 : vector<8x8xf32>
    %234 = arith.addf %233, %3 : vector<8x8xf32>
    %cst_97 = arith.constant dense<0xFF800000> : vector<8xf32>
    %235 = vector.multi_reduction <maximumf>, %234, %cst_97 [1] : vector<8x8xf32> to vector<8xf32>
    %236 = vector.shape_cast %235 : vector<8xf32> to vector<8x1xf32>
    %237 = vector.broadcast %236 : vector<8x1xf32> to vector<8x8xf32>
    %238 = arith.subf %234, %237 : vector<8x8xf32>
    %239 = math.exp %238 : vector<8x8xf32>
    %cst_98 = arith.constant dense<0.000000e+00> : vector<8xf32>
    %240 = vector.multi_reduction <add>, %239, %cst_98 [1] : vector<8x8xf32> to vector<8xf32>
    %241 = vector.shape_cast %240 : vector<8xf32> to vector<8x1xf32>
    %242 = tpu.reciprocal %241 {approx = true} : vector<8x1xf32> -> vector<8x1xf32>
    %243 = vector.broadcast %242 : vector<8x1xf32> to vector<8x8xf32>
    %244 = arith.mulf %239, %243 : vector<8x8xf32>
    %245 = arith.truncf %244 : vector<8x8xf32> to vector<8x8xbf16>
    %246 = arith.truncf %228 : vector<8x8xf32> to vector<8x8xbf16>
    %cst_99 = arith.constant dense<0.000000e+00> : vector<8x8xf32>
    %247 = tpu.matmul %245, %246, %cst_99 {dimension_numbers = #tpu.dot_dimension_numbers<[1], [0], [0], [1], [0, 0, 1, 1], [], []>} : vector<8x8xbf16>, vector<8x8xbf16>, vector<8x8xf32> -> vector<8x8xf32>
    %248 = vector.extract_strided_slice %225 {offsets = [0, 8], sizes = [8, 8], strides = [1, 1]} : vector<8x96xf32> to vector<8x8xf32>
    %249 = vector.extract_strided_slice %225 {offsets = [0, 40], sizes = [8, 8], strides = [1, 1]} : vector<8x96xf32> to vector<8x8xf32>
    %250 = vector.extract_strided_slice %225 {offsets = [0, 72], sizes = [8, 8], strides = [1, 1]} : vector<8x96xf32> to vector<8x8xf32>
    %251 = arith.truncf %248 : vector<8x8xf32> to vector<8x8xbf16>
    %252 = arith.truncf %249 : vector<8x8xf32> to vector<8x8xbf16>
    "tpu.trace_start"() <{level = 10 : i32, message = "qd,kd->qk"}> : () -> ()
    %cst_100 = arith.constant dense<0.000000e+00> : vector<8x8xf32>
    %253 = tpu.matmul %251, %252, %cst_100 {dimension_numbers = #tpu.dot_dimension_numbers<[1], [1], [0], [0], [0, 0, 1, 0], [], []>} : vector<8x8xbf16>, vector<8x8xbf16>, vector<8x8xf32> -> vector<8x8xf32>
    "tpu.trace_stop"() : () -> ()
    %cst_101 = arith.constant 0.353553385 : f32
    %254 = vector.broadcast %cst_101 : f32 to vector<8x8xf32>
    %255 = arith.mulf %253, %254 : vector<8x8xf32>
    %256 = arith.addf %255, %3 : vector<8x8xf32>
    %cst_102 = arith.constant dense<0xFF800000> : vector<8xf32>
    %257 = vector.multi_reduction <maximumf>, %256, %cst_102 [1] : vector<8x8xf32> to vector<8xf32>
    %258 = vector.shape_cast %257 : vector<8xf32> to vector<8x1xf32>
    %259 = vector.broadcast %258 : vector<8x1xf32> to vector<8x8xf32>
    %260 = arith.subf %256, %259 : vector<8x8xf32>
    %261 = math.exp %260 : vector<8x8xf32>
    %cst_103 = arith.constant dense<0.000000e+00> : vector<8xf32>
    %262 = vector.multi_reduction <add>, %261, %cst_103 [1] : vector<8x8xf32> to vector<8xf32>
    %263 = vector.shape_cast %262 : vector<8xf32> to vector<8x1xf32>
    %264 = tpu.reciprocal %263 {approx = true} : vector<8x1xf32> -> vector<8x1xf32>
    %265 = vector.broadcast %264 : vector<8x1xf32> to vector<8x8xf32>
    %266 = arith.mulf %261, %265 : vector<8x8xf32>
    %267 = arith.truncf %266 : vector<8x8xf32> to vector<8x8xbf16>
    %268 = arith.truncf %250 : vector<8x8xf32> to vector<8x8xbf16>
    %cst_104 = arith.constant dense<0.000000e+00> : vector<8x8xf32>
    %269 = tpu.matmul %267, %268, %cst_104 {dimension_numbers = #tpu.dot_dimension_numbers<[1], [0], [0], [1], [0, 0, 1, 1], [], []>} : vector<8x8xbf16>, vector<8x8xbf16>, vector<8x8xf32> -> vector<8x8xf32>
    %270 = vector.extract_strided_slice %225 {offsets = [0, 16], sizes = [8, 8], strides = [1, 1]} : vector<8x96xf32> to vector<8x8xf32>
    %271 = vector.extract_strided_slice %225 {offsets = [0, 48], sizes = [8, 8], strides = [1, 1]} : vector<8x96xf32> to vector<8x8xf32>
    %272 = vector.extract_strided_slice %225 {offsets = [0, 80], sizes = [8, 8], strides = [1, 1]} : vector<8x96xf32> to vector<8x8xf32>
    %273 = arith.truncf %270 : vector<8x8xf32> to vector<8x8xbf16>
    %274 = arith.truncf %271 : vector<8x8xf32> to vector<8x8xbf16>
    "tpu.trace_start"() <{level = 10 : i32, message = "qd,kd->qk"}> : () -> ()
    %cst_105 = arith.constant dense<0.000000e+00> : vector<8x8xf32>
    %275 = tpu.matmul %273, %274, %cst_105 {dimension_numbers = #tpu.dot_dimension_numbers<[1], [1], [0], [0], [0, 0, 1, 0], [], []>} : vector<8x8xbf16>, vector<8x8xbf16>, vector<8x8xf32> -> vector<8x8xf32>
    "tpu.trace_stop"() : () -> ()
    %cst_106 = arith.constant 0.353553385 : f32
    %276 = vector.broadcast %cst_106 : f32 to vector<8x8xf32>
    %277 = arith.mulf %275, %276 : vector<8x8xf32>
    %278 = arith.addf %277, %3 : vector<8x8xf32>
    %cst_107 = arith.constant dense<0xFF800000> : vector<8xf32>
    %279 = vector.multi_reduction <maximumf>, %278, %cst_107 [1] : vector<8x8xf32> to vector<8xf32>
    %280 = vector.shape_cast %279 : vector<8xf32> to vector<8x1xf32>
    %281 = vector.broadcast %280 : vector<8x1xf32> to vector<8x8xf32>
    %282 = arith.subf %278, %281 : vector<8x8xf32>
    %283 = math.exp %282 : vector<8x8xf32>
    %cst_108 = arith.constant dense<0.000000e+00> : vector<8xf32>
    %284 = vector.multi_reduction <add>, %283, %cst_108 [1] : vector<8x8xf32> to vector<8xf32>
    %285 = vector.shape_cast %284 : vector<8xf32> to vector<8x1xf32>
    %286 = tpu.reciprocal %285 {approx = true} : vector<8x1xf32> -> vector<8x1xf32>
    %287 = vector.broadcast %286 : vector<8x1xf32> to vector<8x8xf32>
    %288 = arith.mulf %283, %287 : vector<8x8xf32>
    %289 = arith.truncf %288 : vector<8x8xf32> to vector<8x8xbf16>
    %290 = arith.truncf %272 : vector<8x8xf32> to vector<8x8xbf16>
    %cst_109 = arith.constant dense<0.000000e+00> : vector<8x8xf32>
    %291 = tpu.matmul %289, %290, %cst_109 {dimension_numbers = #tpu.dot_dimension_numbers<[1], [0], [0], [1], [0, 0, 1, 1], [], []>} : vector<8x8xbf16>, vector<8x8xbf16>, vector<8x8xf32> -> vector<8x8xf32>
    %292 = vector.extract_strided_slice %225 {offsets = [0, 24], sizes = [8, 8], strides = [1, 1]} : vector<8x96xf32> to vector<8x8xf32>
    %293 = vector.extract_strided_slice %225 {offsets = [0, 56], sizes = [8, 8], strides = [1, 1]} : vector<8x96xf32> to vector<8x8xf32>
    %294 = vector.extract_strided_slice %225 {offsets = [0, 88], sizes = [8, 8], strides = [1, 1]} : vector<8x96xf32> to vector<8x8xf32>
    %295 = arith.truncf %292 : vector<8x8xf32> to vector<8x8xbf16>
    %296 = arith.truncf %293 : vector<8x8xf32> to vector<8x8xbf16>
    "tpu.trace_start"() <{level = 10 : i32, message = "qd,kd->qk"}> : () -> ()
    %cst_110 = arith.constant dense<0.000000e+00> : vector<8x8xf32>
    %297 = tpu.matmul %295, %296, %cst_110 {dimension_numbers = #tpu.dot_dimension_numbers<[1], [1], [0], [0], [0, 0, 1, 0], [], []>} : vector<8x8xbf16>, vector<8x8xbf16>, vector<8x8xf32> -> vector<8x8xf32>
    "tpu.trace_stop"() : () -> ()
    %cst_111 = arith.constant 0.353553385 : f32
    %298 = vector.broadcast %cst_111 : f32 to vector<8x8xf32>
    %299 = arith.mulf %297, %298 : vector<8x8xf32>
    %300 = arith.addf %299, %3 : vector<8x8xf32>
    %cst_112 = arith.constant dense<0xFF800000> : vector<8xf32>
    %301 = vector.multi_reduction <maximumf>, %300, %cst_112 [1] : vector<8x8xf32> to vector<8xf32>
    %302 = vector.shape_cast %301 : vector<8xf32> to vector<8x1xf32>
    %303 = vector.broadcast %302 : vector<8x1xf32> to vector<8x8xf32>
    %304 = arith.subf %300, %303 : vector<8x8xf32>
    %305 = math.exp %304 : vector<8x8xf32>
    %cst_113 = arith.constant dense<0.000000e+00> : vector<8xf32>
    %306 = vector.multi_reduction <add>, %305, %cst_113 [1] : vector<8x8xf32> to vector<8xf32>
    %307 = vector.shape_cast %306 : vector<8xf32> to vector<8x1xf32>
    %308 = tpu.reciprocal %307 {approx = true} : vector<8x1xf32> -> vector<8x1xf32>
    %309 = vector.broadcast %308 : vector<8x1xf32> to vector<8x8xf32>
    %310 = arith.mulf %305, %309 : vector<8x8xf32>
    %311 = arith.truncf %310 : vector<8x8xf32> to vector<8x8xbf16>
    %312 = arith.truncf %294 : vector<8x8xf32> to vector<8x8xbf16>
    %cst_114 = arith.constant dense<0.000000e+00> : vector<8x8xf32>
    %313 = tpu.matmul %311, %312, %cst_114 {dimension_numbers = #tpu.dot_dimension_numbers<[1], [0], [0], [1], [0, 0, 1, 1], [], []>} : vector<8x8xbf16>, vector<8x8xbf16>, vector<8x8xf32> -> vector<8x8xf32>
    %314 = tpu.concatenate %247, %269, %291, %313 in 1 : vector<8x8xf32>, vector<8x8xf32>, vector<8x8xf32>, vector<8x8xf32> -> vector<8x32xf32>
    %c1_115 = arith.constant 1 : index
    %c0_116 = arith.constant 0 : index
    %c0_117 = arith.constant 0 : index
    %315 = vector.load %arg7[%c1_115, %c0_116, %c0_117] : memref<2x32x32xbf16, #tpu.memory_space<vmem>>, vector<1x32x32xbf16>
    %316 = vector.shape_cast %315 : vector<1x32x32xbf16> to vector<32x32xbf16>
    %317 = arith.truncf %314 : vector<8x32xf32> to vector<8x32xbf16>
    %cst_118 = arith.constant dense<0.000000e+00> : vector<8x32xf32>
    %318 = tpu.matmul %317, %316, %cst_118 {dimension_numbers = #tpu.dot_dimension_numbers<[1], [0], [0], [1], [0, 0, 1, 1], [], []>} : vector<8x32xbf16>, vector<32x32xbf16>, vector<8x32xf32> -> vector<8x32xf32>
    %319 = arith.addf %191, %318 : vector<8x32xf32>
    %c1_119 = arith.constant 1 : index
    %c0_120 = arith.constant 0 : index
    %c0_121 = arith.constant 0 : index
    %320 = vector.load %arg8[%c1_119, %c0_120, %c0_121] : memref<2x1x32xf32, #tpu.memory_space<vmem>>, vector<1x1x32xf32>
    %321 = vector.shape_cast %320 : vector<1x1x32xf32> to vector<1x32xf32>
    %322 = vector.broadcast %321 : vector<1x32xf32> to vector<8x32xf32>
    %323 = arith.addf %319, %322 : vector<8x32xf32>
    %c1_122 = arith.constant 1 : index
    %c0_123 = arith.constant 0 : index
    %c0_124 = arith.constant 0 : index
    %324 = vector.load %arg9[%c1_122, %c0_123, %c0_124] : memref<2x1x32xf32, #tpu.memory_space<vmem>>, vector<1x1x32xf32>
    %325 = vector.shape_cast %324 : vector<1x1x32xf32> to vector<1x32xf32>
    %c1_125 = arith.constant 1 : index
    %c0_126 = arith.constant 0 : index
    %c0_127 = arith.constant 0 : index
    %326 = vector.load %arg10[%c1_125, %c0_126, %c0_127] : memref<2x1x32xf32, #tpu.memory_space<vmem>>, vector<1x1x32xf32>
    %327 = vector.shape_cast %326 : vector<1x1x32xf32> to vector<1x32xf32>
    %cst_128 = arith.constant dense<0.000000e+00> : vector<8xf32>
    %328 = vector.multi_reduction <add>, %323, %cst_128 [1] : vector<8x32xf32> to vector<8xf32>
    %329 = vector.shape_cast %328 : vector<8xf32> to vector<8x1xf32>
    %cst_129 = arith.constant 3.200000e+01 : f32
    %330 = vector.broadcast %cst_129 : f32 to vector<8x1xf32>
    %331 = arith.divf %329, %330 : vector<8x1xf32>
    %332 = vector.broadcast %331 : vector<8x1xf32> to vector<8x32xf32>
    %333 = arith.subf %323, %332 : vector<8x32xf32>
    %334 = arith.mulf %333, %333 : vector<8x32xf32>
    %cst_130 = arith.constant dense<0.000000e+00> : vector<8xf32>
    %335 = vector.multi_reduction <add>, %334, %cst_130 [1] : vector<8x32xf32> to vector<8xf32>
    %336 = vector.shape_cast %335 : vector<8xf32> to vector<8x1xf32>
    %cst_131 = arith.constant 3.200000e+01 : f32
    %337 = vector.broadcast %cst_131 : f32 to vector<8x1xf32>
    %338 = arith.divf %336, %337 : vector<8x1xf32>
    %339 = vector.broadcast %331 : vector<8x1xf32> to vector<8x32xf32>
    %340 = arith.subf %323, %339 : vector<8x32xf32>
    %cst_132 = arith.constant 9.99999974E-6 : f32
    %341 = vector.broadcast %cst_132 : f32 to vector<8x1xf32>
    %342 = arith.addf %338, %341 : vector<8x1xf32>
    %343 = math.rsqrt %342 : vector<8x1xf32>
    %344 = vector.broadcast %343 : vector<8x1xf32> to vector<8x32xf32>
    %345 = arith.mulf %340, %344 : vector<8x32xf32>
    %346 = vector.broadcast %325 : vector<1x32xf32> to vector<8x32xf32>
    %347 = arith.mulf %345, %346 : vector<8x32xf32>
    %348 = vector.broadcast %327 : vector<1x32xf32> to vector<8x32xf32>
    %349 = arith.addf %347, %348 : vector<8x32xf32>
    %c1_133 = arith.constant 1 : index
    %c0_134 = arith.constant 0 : index
    %c0_135 = arith.constant 0 : index
    %350 = vector.load %arg11[%c1_133, %c0_134, %c0_135] : memref<2x32x128xbf16, #tpu.memory_space<vmem>>, vector<1x32x128xbf16>
    %351 = vector.shape_cast %350 : vector<1x32x128xbf16> to vector<32x128xbf16>
    %352 = arith.truncf %349 : vector<8x32xf32> to vector<8x32xbf16>
    %cst_136 = arith.constant dense<0.000000e+00> : vector<8x128xf32>
    %353 = tpu.matmul %352, %351, %cst_136 {dimension_numbers = #tpu.dot_dimension_numbers<[1], [0], [0], [1], [0, 0, 1, 1], [], []>} : vector<8x32xbf16>, vector<32x128xbf16>, vector<8x128xf32> -> vector<8x128xf32>
    %c1_137 = arith.constant 1 : index
    %c0_138 = arith.constant 0 : index
    %c0_139 = arith.constant 0 : index
    %354 = vector.load %arg12[%c1_137, %c0_138, %c0_139] : memref<2x1x128xf32, #tpu.memory_space<vmem>>, vector<1x1x128xf32>
    %355 = vector.shape_cast %354 : vector<1x1x128xf32> to vector<1x128xf32>
    %356 = vector.broadcast %355 : vector<1x128xf32> to vector<8x128xf32>
    %357 = arith.addf %353, %356 : vector<8x128xf32>
    %cst_140 = arith.constant 5.000000e-01 : f32
    %358 = vector.broadcast %cst_140 : f32 to vector<8x128xf32>
    %359 = arith.mulf %358, %357 : vector<8x128xf32>
    %cst_141 = arith.constant 4.471500e-02 : f32
    %360 = vector.broadcast %cst_141 : f32 to vector<8x128xf32>
    %361 = arith.mulf %360, %357 : vector<8x128xf32>
    %362 = arith.mulf %361, %357 : vector<8x128xf32>
    %363 = arith.mulf %362, %357 : vector<8x128xf32>
    %364 = arith.addf %357, %363 : vector<8x128xf32>
    %cst_142 = arith.constant 0.797884583 : f32
    %365 = vector.broadcast %cst_142 : f32 to vector<8x128xf32>
    %366 = arith.mulf %365, %364 : vector<8x128xf32>
    %367 = math.tanh %366 : vector<8x128xf32>
    %cst_143 = arith.constant 1.000000e+00 : f32
    %368 = vector.broadcast %cst_143 : f32 to vector<8x128xf32>
    %369 = arith.addf %368, %367 : vector<8x128xf32>
    %370 = arith.mulf %359, %369 : vector<8x128xf32>
    %c1_144 = arith.constant 1 : index
    %c0_145 = arith.constant 0 : index
    %c0_146 = arith.constant 0 : index
    %371 = vector.load %arg13[%c1_144, %c0_145, %c0_146] : memref<2x128x32xbf16, #tpu.memory_space<vmem>>, vector<1x128x32xbf16>
    %372 = vector.shape_cast %371 : vector<1x128x32xbf16> to vector<128x32xbf16>
    %373 = arith.truncf %370 : vector<8x128xf32> to vector<8x128xbf16>
    %cst_147 = arith.constant dense<0.000000e+00> : vector<8x32xf32>
    %374 = tpu.matmul %373, %372, %cst_147 {dimension_numbers = #tpu.dot_dimension_numbers<[1], [0], [0], [1], [0, 0, 1, 1], [], []>} : vector<8x128xbf16>, vector<128x32xbf16>, vector<8x32xf32> -> vector<8x32xf32>
    %375 = arith.addf %323, %374 : vector<8x32xf32>
    %c1_148 = arith.constant 1 : index
    %c0_149 = arith.constant 0 : index
    %c0_150 = arith.constant 0 : index
    %376 = vector.load %arg14[%c1_148, %c0_149, %c0_150] : memref<2x1x32xf32, #tpu.memory_space<vmem>>, vector<1x1x32xf32>
    %377 = vector.shape_cast %376 : vector<1x1x32xf32> to vector<1x32xf32>
    %378 = vector.broadcast %377 : vector<1x32xf32> to vector<8x32xf32>
    %379 = arith.addf %375, %378 : vector<8x32xf32>
    %c0_151 = arith.constant 0 : index
    %c0_152 = arith.constant 0 : index
    %380 = vector.load %arg15[%c0_151, %c0_152] : memref<1x32xf32, #tpu.memory_space<vmem>>, vector<1x32xf32>
    %c0_153 = arith.constant 0 : index
    %c0_154 = arith.constant 0 : index
    %381 = vector.load %arg16[%c0_153, %c0_154] : memref<1x32xf32, #tpu.memory_space<vmem>>, vector<1x32xf32>
    %cst_155 = arith.constant dense<0.000000e+00> : vector<8xf32>
    %382 = vector.multi_reduction <add>, %379, %cst_155 [1] : vector<8x32xf32> to vector<8xf32>
    %383 = vector.shape_cast %382 : vector<8xf32> to vector<8x1xf32>
    %cst_156 = arith.constant 3.200000e+01 : f32
    %384 = vector.broadcast %cst_156 : f32 to vector<8x1xf32>
    %385 = arith.divf %383, %384 : vector<8x1xf32>
    %386 = vector.broadcast %385 : vector<8x1xf32> to vector<8x32xf32>
    %387 = arith.subf %379, %386 : vector<8x32xf32>
    %388 = arith.mulf %387, %387 : vector<8x32xf32>
    %cst_157 = arith.constant dense<0.000000e+00> : vector<8xf32>
    %389 = vector.multi_reduction <add>, %388, %cst_157 [1] : vector<8x32xf32> to vector<8xf32>
    %390 = vector.shape_cast %389 : vector<8xf32> to vector<8x1xf32>
    %cst_158 = arith.constant 3.200000e+01 : f32
    %391 = vector.broadcast %cst_158 : f32 to vector<8x1xf32>
    %392 = arith.divf %390, %391 : vector<8x1xf32>
    %393 = vector.broadcast %385 : vector<8x1xf32> to vector<8x32xf32>
    %394 = arith.subf %379, %393 : vector<8x32xf32>
    %cst_159 = arith.constant 9.99999974E-6 : f32
    %395 = vector.broadcast %cst_159 : f32 to vector<8x1xf32>
    %396 = arith.addf %392, %395 : vector<8x1xf32>
    %397 = math.rsqrt %396 : vector<8x1xf32>
    %398 = vector.broadcast %397 : vector<8x1xf32> to vector<8x32xf32>
    %399 = arith.mulf %394, %398 : vector<8x32xf32>
    %400 = vector.broadcast %380 : vector<1x32xf32> to vector<8x32xf32>
    %401 = arith.mulf %399, %400 : vector<8x32xf32>
    %402 = vector.broadcast %381 : vector<1x32xf32> to vector<8x32xf32>
    %403 = arith.addf %401, %402 : vector<8x32xf32>
    %c0_160 = arith.constant 0 : index
    %c0_161 = arith.constant 0 : index
    %404 = vector.load %arg17[%c0_160, %c0_161] : memref<32x128xbf16, #tpu.memory_space<vmem>>, vector<32x128xbf16>
    %405 = arith.truncf %403 : vector<8x32xf32> to vector<8x32xbf16>
    %cst_162 = arith.constant dense<0.000000e+00> : vector<8x128xf32>
    %406 = tpu.matmul %405, %404, %cst_162 {dimension_numbers = #tpu.dot_dimension_numbers<[1], [0], [0], [1], [0, 0, 1, 1], [], []>} : vector<8x32xbf16>, vector<32x128xbf16>, vector<8x128xf32> -> vector<8x128xf32>
    %c0_163 = arith.constant 0 : index
    %c0_164 = arith.constant 0 : index
    %c0_165 = arith.constant 0 : index
    %407 = vector.load %arg19[%c0_163, %c0_164, %c0_165] : memref<1x8x128xf32, #tpu.memory_space<vmem>>, vector<1x8x128xf32>
    %408 = vector.shape_cast %407 : vector<1x8x128xf32> to vector<8x128xf32>
    %409 = vector.shape_cast %406 : vector<8x128xf32> to vector<1x8x128xf32>
    tpu.vector_store %arg19[%c0_163, %c0_164, %c0_165], %409 {strides = array<i32>} : memref<1x8x128xf32, #tpu.memory_space<vmem>>, vector<1x8x128xf32>,
    %c0_166 = arith.constant 0 : index
    %c0_167 = arith.constant 0 : index
    %c0_168 = arith.constant 0 : index
    %410 = vector.load %arg18[%c0_166, %c0_167, %c0_168] : memref<1x8x1xi32, #tpu.memory_space<vmem>>, vector<1x8x1xi32>
    %411 = vector.shape_cast %410 : vector<1x8x1xi32> to vector<8x1xi32>
    %412 = tpu.iota {dimensions = array<i32: 1>} : vector<8x128xi32>
    %c64_i32 = arith.constant 64 : i32
    %413 = vector.broadcast %c64_i32 : i32 to vector<8x128xi32>
    %414 = arith.cmpi slt, %412, %413 : vector<8x128xi32>
    %cst_169 = arith.constant -1.000000e+09 : f32
    %415 = vector.broadcast %cst_169 : f32 to vector<8x128xf32>
    %416 = arith.select %414, %406, %415 : vector<8x128xi1>, vector<8x128xf32>
    %cst_170 = arith.constant dense<0xFF800000> : vector<8xf32>
    %417 = vector.multi_reduction <maximumf>, %416, %cst_170 [1] : vector<8x128xf32> to vector<8xf32>
    %418 = vector.shape_cast %417 : vector<8xf32> to vector<8x1xf32>
    %419 = vector.broadcast %418 : vector<8x1xf32> to vector<8x128xf32>
    %420 = arith.subf %416, %419 : vector<8x128xf32>
    %421 = math.exp %420 : vector<8x128xf32>
    %cst_171 = arith.constant dense<0.000000e+00> : vector<8xf32>
    %422 = vector.multi_reduction <add>, %421, %cst_171 [1] : vector<8x128xf32> to vector<8xf32>
    %423 = vector.shape_cast %422 : vector<8xf32> to vector<8x1xf32>
    %424 = math.log %423 : vector<8x1xf32>
    %425 = arith.addf %424, %418 : vector<8x1xf32>
    %426 = vector.broadcast %411 : vector<8x1xi32> to vector<8x128xi32>
    %427 = arith.cmpi eq, %412, %426 : vector<8x128xi32>
    %cst_172 = arith.constant 0.000000e+00 : f32
    %428 = vector.broadcast %cst_172 : f32 to vector<8x128xf32>
    %429 = arith.select %427, %416, %428 : vector<8x128xi1>, vector<8x128xf32>
    %cst_173 = arith.constant dense<0.000000e+00> : vector<8xf32>
    %430 = vector.multi_reduction <add>, %429, %cst_173 [1] : vector<8x128xf32> to vector<8xf32>
    %431 = vector.shape_cast %430 : vector<8xf32> to vector<8x1xf32>
    %c0_i32 = arith.constant 0 : i32
    %432 = vector.broadcast %c0_i32 : i32 to vector<8x1xi32>
    %433 = arith.cmpi sge, %411, %432 : vector<8x1xi32>
    %434 = arith.extui %433 : vector<8x1xi1> to vector<8x1xi32>
    %435 = arith.sitofp %434 : vector<8x1xi32> to vector<8x1xf32>
    %436 = arith.subf %425, %431 : vector<8x1xf32>
    %437 = arith.mulf %436, %435 : vector<8x1xf32>
    %cst_174 = arith.constant dense<0.000000e+00> : vector<1xf32>
    %438 = vector.multi_reduction <add>, %437, %cst_174 [0] : vector<8x1xf32> to vector<1xf32>
    %439 = vector.shape_cast %438 : vector<1xf32> to vector<1x1xf32>
    %c0_175 = arith.constant 0 : index
    %c0_176 = arith.constant 0 : index
    %c0_177 = arith.constant 0 : index
    %440 = vector.load %arg20[%c0_175, %c0_176, %c0_177] : memref<1x1x1xf32, #tpu.memory_space<vmem>>, vector<1x1x1xf32>
    %441 = vector.shape_cast %440 : vector<1x1x1xf32> to vector<1x1xf32>
    %442 = vector.shape_cast %439 : vector<1x1xf32> to vector<1x1x1xf32>
    tpu.vector_store %arg20[%c0_175, %c0_176, %c0_177], %442 {strides = array<i32>} : memref<1x1x1xf32, #tpu.memory_space<vmem>>, vector<1x1x1xf32>,
    return
  }
  func.func @transform_0(%arg0: i32) -> (i32, i32, i32) {
    %c0_i32 = arith.constant 0 : i32
    %c0_i32_0 = arith.constant 0 : i32
    %c0_i32_1 = arith.constant 0 : i32
    return %arg0, %c0_i32, %c0_i32_0 : i32, i32, i32
  }
  func.func @transform_1(%arg0: i32) -> (i32, i32, i32) {
    %c0_i32 = arith.constant 0 : i32
    %c0_i32_0 = arith.constant 0 : i32
    %c0_i32_1 = arith.constant 0 : i32
    return %arg0, %c0_i32, %c0_i32_0 : i32, i32, i32
  }
  func.func @transform_2(%arg0: i32) -> (i32, i32, i32) {
    %c0_i32 = arith.constant 0 : i32
    %c0_i32_0 = arith.constant 0 : i32
    %c0_i32_1 = arith.constant 0 : i32
    %c0_i32_2 = arith.constant 0 : i32
    return %c0_i32, %c0_i32_0, %c0_i32_1 : i32, i32, i32
  }
  func.func @transform_3(%arg0: i32) -> (i32, i32, i32) {
    %c0_i32 = arith.constant 0 : i32
    %c0_i32_0 = arith.constant 0 : i32
    %c0_i32_1 = arith.constant 0 : i32
    %c0_i32_2 = arith.constant 0 : i32
    return %c0_i32, %c0_i32_0, %c0_i32_1 : i32, i32, i32
  }
  func.func @transform_4(%arg0: i32) -> (i32, i32, i32) {
    %c0_i32 = arith.constant 0 : i32
    %c0_i32_0 = arith.constant 0 : i32
    %c0_i32_1 = arith.constant 0 : i32
    %c0_i32_2 = arith.constant 0 : i32
    return %c0_i32, %c0_i32_0, %c0_i32_1 : i32, i32, i32
  }
  func.func @transform_5(%arg0: i32) -> (i32, i32, i32) {
    %c0_i32 = arith.constant 0 : i32
    %c0_i32_0 = arith.constant 0 : i32
    %c0_i32_1 = arith.constant 0 : i32
    %c0_i32_2 = arith.constant 0 : i32
    return %c0_i32, %c0_i32_0, %c0_i32_1 : i32, i32, i32
  }
  func.func @transform_6(%arg0: i32) -> (i32, i32, i32) {
    %c0_i32 = arith.constant 0 : i32
    %c0_i32_0 = arith.constant 0 : i32
    %c0_i32_1 = arith.constant 0 : i32
    %c0_i32_2 = arith.constant 0 : i32
    return %c0_i32, %c0_i32_0, %c0_i32_1 : i32, i32, i32
  }
  func.func @transform_7(%arg0: i32) -> (i32, i32, i32) {
    %c0_i32 = arith.constant 0 : i32
    %c0_i32_0 = arith.constant 0 : i32
    %c0_i32_1 = arith.constant 0 : i32
    %c0_i32_2 = arith.constant 0 : i32
    return %c0_i32, %c0_i32_0, %c0_i32_1 : i32, i32, i32
  }
  func.func @transform_8(%arg0: i32) -> (i32, i32, i32) {
    %c0_i32 = arith.constant 0 : i32
    %c0_i32_0 = arith.constant 0 : i32
    %c0_i32_1 = arith.constant 0 : i32
    %c0_i32_2 = arith.constant 0 : i32
    return %c0_i32, %c0_i32_0, %c0_i32_1 : i32, i32, i32
  }
  func.func @transform_9(%arg0: i32) -> (i32, i32, i32) {
    %c0_i32 = arith.constant 0 : i32
    %c0_i32_0 = arith.constant 0 : i32
    %c0_i32_1 = arith.constant 0 : i32
    %c0_i32_2 = arith.constant 0 : i32
    return %c0_i32, %c0_i32_0, %c0_i32_1 : i32, i32, i32
  }
  func.func @transform_10(%arg0: i32) -> (i32, i32, i32) {
    %c0_i32 = arith.constant 0 : i32
    %c0_i32_0 = arith.constant 0 : i32
    %c0_i32_1 = arith.constant 0 : i32
    %c0_i32_2 = arith.constant 0 : i32
    return %c0_i32, %c0_i32_0, %c0_i32_1 : i32, i32, i32
  }
  func.func @transform_11(%arg0: i32) -> (i32, i32, i32) {
    %c0_i32 = arith.constant 0 : i32
    %c0_i32_0 = arith.constant 0 : i32
    %c0_i32_1 = arith.constant 0 : i32
    %c0_i32_2 = arith.constant 0 : i32
    return %c0_i32, %c0_i32_0, %c0_i32_1 : i32, i32, i32
  }
  func.func @transform_12(%arg0: i32) -> (i32, i32, i32) {
    %c0_i32 = arith.constant 0 : i32
    %c0_i32_0 = arith.constant 0 : i32
    %c0_i32_1 = arith.constant 0 : i32
    %c0_i32_2 = arith.constant 0 : i32
    return %c0_i32, %c0_i32_0, %c0_i32_1 : i32, i32, i32
  }
  func.func @transform_13(%arg0: i32) -> (i32, i32, i32) {
    %c0_i32 = arith.constant 0 : i32
    %c0_i32_0 = arith.constant 0 : i32
    %c0_i32_1 = arith.constant 0 : i32
    %c0_i32_2 = arith.constant 0 : i32
    return %c0_i32, %c0_i32_0, %c0_i32_1 : i32, i32, i32
  }
  func.func @transform_14(%arg0: i32) -> (i32, i32) {
    %c0_i32 = arith.constant 0 : i32
    %c0_i32_0 = arith.constant 0 : i32
    %c0_i32_1 = arith.constant 0 : i32
    return %c0_i32, %c0_i32_0 : i32, i32
  }
  func.func @transform_15(%arg0: i32) -> (i32, i32) {
    %c0_i32 = arith.constant 0 : i32
    %c0_i32_0 = arith.constant 0 : i32
    %c0_i32_1 = arith.constant 0 : i32
    return %c0_i32, %c0_i32_0 : i32, i32
  }
  func.func @transform_16(%arg0: i32) -> (i32, i32) {
    %c0_i32 = arith.constant 0 : i32
    %c0_i32_0 = arith.constant 0 : i32
    %c0_i32_1 = arith.constant 0 : i32
    return %c0_i32, %c0_i32_0 : i32, i32
  }
  func.func @transform_17(%arg0: i32) -> (i32, i32, i32) {
    %c0_i32 = arith.constant 0 : i32
    %c0_i32_0 = arith.constant 0 : i32
    %c0_i32_1 = arith.constant 0 : i32
    return %arg0, %c0_i32, %c0_i32_0 : i32, i32, i32
  }
  func.func @transform_18(%arg0: i32) -> (i32, i32, i32) {
    %c0_i32 = arith.constant 0 : i32
    %c0_i32_0 = arith.constant 0 : i32
    %c0_i32_1 = arith.constant 0 : i32
    return %arg0, %c0_i32, %c0_i32_0 : i32, i32, i32
  }
  func.func @transform_19(%arg0: i32) -> (i32, i32, i32) {
    %c0_i32 = arith.constant 0 : i32
    %c0_i32_0 = arith.constant 0 : i32
    %c0_i32_1 = arith.constant 0 : i32
    return %arg0, %c0_i32, %c0_i32_0 : i32, i32, i32
  }
}

</mosaic_0001>

<bundles_post_ra>
// kernel: vision_language_model.2
= control target key start
LH: loop header
LB: loop body
LE: loop exit
PB: predicated region body
PF: predicated region fallthrough
CT: control target
= control target key end

     0   :  { %16 = vsyncpa [#allocation4], 0  ;;  %s4070_s0 = inlined_call_operand.vmem [shape: f32[2,64,27], index: 0, kind: input, shape index: {}]   ;;  %s4071_s1 = inlined_call_operand.vmem [shape: bf16[27,16], index: 1, kind: input, shape index: {}]   ;;  %s4072_s2 = inlined_call_operand.vmem [shape: f32[1,16], index: 2, kind: input, shape index: {}]   ;;  %s4073_s3 = inlined_call_operand.vmem [shape: bf16[9,16,16], index: 3, kind: input, shape index: {}]   ;;  %s4074_s4 = inlined_call_operand.vmem [shape: f32[1,16], index: 4, kind: input, shape index: {}]   ;;  %s4075_s5 = inlined_call_operand.vmem [shape: bf16[9,16,16], index: 5, kind: input, shape index: {}]   ;;  %s4076_s6 = inlined_call_operand.vmem [shape: f32[1,16], index: 6, kind: input, shape index: {}]   ;;  %s4077_s7 = inlined_call_operand.vmem [shape: bf16[16,32], index: 7, kind: input, shape index: {}]   ;;  %s4078_s8 = inlined_call_operand.vmem [shape: f32[1,32], index: 8, kind: input, shape index: {}]   ;;  %s4079_s9 = inlined_call_operand.vmem [shape: bf16[32,32], index: 9, kind: input, shape index: {}]   ;;  %s4080_s10 = inlined_call_operand.vmem [shape: f32[1,32], index: 10, kind: input, shape index: {}]   ;;  %s4081_s11 = inlined_call_operand.hbm [shape: f32[2,1,32], index: 11, kind: output, shape index: {}]  }
   0x1   :  { %18 = vsyncpa [#allocation4 + $0x1], 0  ;;  %s3516_s17 = smov 0   ;;  %s3518_s18 = smov 0  }
   0x2   :  { %s3520_s19 = smov 0   ;;  %s3522_s20 = smov 0  }
   0x3 LB: > { %s3537_s21 = sadd.s32 4294967295, %s3450_s20   ;;  %s2726_s22 = sadd.s32 4294967294, %s3450_s20   ;;  %s3450_s20 = sphi %s3522_s20, %s4087_s20   ;;  %s3446_s19 = sphi %s3520_s19, %s4086_s19   ;;  %s3442_s18 = sphi %s3518_s18, %s4085_s18   ;;  %s3438_s17 = sphi %s3516_s17, %s4084_s17  }
   0x4   : > { %s3541_s23 = sadd.s32 1, %s3450_s20   ;;  %s267_s24 = sadd.s32 1, %s3446_s19 }
   0x5   : > { %s264_s25 = ssub.s32 %s3450_s20, %s3541_s23  ;;  %p277_p0 = scmp.ne.s32.totalorder %s3446_s19, %s3442_s18 }
   0x6   : > { %p265_p1 = scmp.eq.s32.totalorder %s264_s25, 0  ;;  %p278_p2 = scmp.eq.s32.totalorder %s3537_s21, 1 }
   0x7   : > { %p283_p3 = scmp.ne.s32.totalorder %s3442_s18, %s3438_s17  ;;  %p284_p4 = scmp.eq.s32.totalorder %s2726_s22, 1 }
   0x8   : > { %s3552_s26 = scalar_select %p265_p1, %s3446_s19, %s267_s24  }
   0x9   : > { %p3554_p5 = por %p278_p2, %p277_p0  ;;  %p3558_p6 = por %p284_p4, %p283_p3 }
   0xa   : > { %p2729_p7 = scmp.ge.s32.totalorder %s3450_s20, 1  ;;  %p340_p8 = scmp.lt.s32.totalorder %s3450_s20, 3 }
   0xc   : > { %p341_p9 = pnand %p2729_p7, %p340_p8 }
   0xd   : > { %v3365_v0 = vld [vmem:[%s4071_s1] sm:$0xff] (!%p341_p9)   ;;  %vm432_vm0 = vcmask (!%p341_p9), 1044480   ;;  %v3366_v1 = vld [vmem:[%s4071_s1 + $0x8] sm:$0x3f] (!%p341_p9)   ;;  %vm433_vm1 = vcmask (!%p341_p9), 1045504   ;;  %p379_p10 = scmp.lt.s32.totalorder (!%p341_p9), %s3537_s21, 1 }
   0xe   : > { %344 = sbr.rel (%p341_p9) target bundleno = 1443 (0x5a3), region = 64  ;;  %2973 = vmatprep.subr.bf16.mxu0 (!%p341_p9), %v3365_v0  ;;  %v3452_v2 = vmov (!%p341_p9), 65535   ;;  %vm419_vm2 = vcmask (!%p341_p9), 220160   ;;  %vm512_vm3 = vcmask (!%p341_p9), 130048   ;;  %vm514_vm4 = vcmask (!%p341_p9), 123904   ;;  %v3367_v19 = vld [vmem:[%s4073_s3] sm:$0xff] (!%p341_p9)  }
   0xf   : > { %2974 = vmatpush3.bf16.msra.mxu0 (!%p341_p9), %v3365_v0  ;;  %v434_v3 = vsel (!%p341_p9), %vm432_vm0, 4294967295, %v3452_v2  ;;  %v3453_v18 = vmov (!%p341_p9), 0.0   ;;  %2985 = vmatprep.subr.bf16.mxu1 (!%p341_p9), %v3367_v19  ;;  %v3631_v23 = vld [vmem:[%s4073_s3 + $0x8] sm:$0xff] (!%p341_p9)   ;;  %v2732_v27 = vld [vmem:[%s4072_s2] ss:$0 sm:$0xff] (!%p341_p9)  ;;  %v3369_v2 = vld [vmem:[%s4073_s3 + $0x10] sm:$0xff] (!%p341_p9)  }
  0x10   : > { %v435_v4 = vsel (!%p341_p9), %vm433_vm1, %v434_v3, 0  ;;  %520 = vst.msk [vmem:[#allocation2 + $0x30] sm:$0xff] (!%p341_p9), %vm512_vm3, %v3453_v18  ;;  %513 = vst.msk [vmem:[#allocation2] sm:$0xff] (!%p341_p9), %vm512_vm3, %v3453_v18  ;;  %2986 = vmatpush3.bf16.msra.mxu1 (!%p341_p9), %v3367_v19  ;;  %vm3454_vm5 = vmmov (!%p341_p9), 0   ;;  %vm2612_vm6 = vcmask (!%p341_p9), 261120   ;;  %s377_s25 = sand.u32 (!%p341_p9), 1, %s3442_s18  }
  0x11   : > { %v437_v5 = vand.u32 (!%p341_p9), %v3366_v1, %v435_v4  ;;  %521 = vst.msk [vmem:[#allocation2 + $0x38] sm:$0x3] (!%p341_p9), %vm514_vm4, %v3453_v18  ;;  %515 = vst.msk [vmem:[#allocation2 + $0x8] sm:$0x3] (!%p341_p9), %vm514_vm4, %v3453_v18  ;;  %2995 = vmatprep.subr.bf16.mxu1 (!%p341_p9), %v3631_v23  ;;  %s2868_s12 = sshll.u32 (!%p341_p9), %s3537_s21, 4  ;;  %s378_s13 = scalar_lea.vmem (!%p341_p9), [#allocation3], %s377_s25 }
  0x12   : > { %516 = vst.msk [vmem:[#allocation2 + $0x10] sm:$0xff] (!%p341_p9), %vm512_vm3, %v3453_v18  ;;  %518 = vst.msk [vmem:[#allocation2 + $0x20] sm:$0xff] (!%p341_p9), %vm512_vm3, %v3453_v18  ;;  %vm2656_vm7 = vcmask (!%p341_p9), 253952   ;;  %s4028_s22 = scalar_lea.hbm (!%p341_p9), %s4081_s11, %s2868_s12  ;;  %s3455_s29 = smov (!%p341_p9), [#allocation3]  }
  0x13   : > { %2975 = vmatprep.subr.bf16.mxu0 (!%p341_p9), %v437_v5  ;;  %517 = vst.msk [vmem:[#allocation2 + $0x18] sm:$0x3] (!%p341_p9), %vm514_vm4, %v3453_v18  ;;  %519 = vst.msk [vmem:[#allocation2 + $0x28] sm:$0x3] (!%p341_p9), %vm514_vm4, %v3453_v18  ;;  %s3392_s30 = sshll.u32 (!%p341_p9), %s3455_s29, 4  ;;  %s3393_s30 = int_to_ptr.vmem [resolvable:$false] %s3392_s30 }
  0x14   : > { %2976 = vmatpush3.bf16.msra.mxu0 (!%p341_p9), %v437_v5  ;;  %522 = vst.msk [vmem:[#allocation2 + $0x40] sm:$0xff] (!%p341_p9), %vm512_vm3, %v3453_v18  ;;  %524 = vst.msk [vmem:[#allocation2 + $0x50] sm:$0xff] (!%p341_p9), %vm512_vm3, %v3453_v18 }
  0x15   : > { %s380_s14 = scalar_select %p379_p10, %s3537_s21, 1  ;;  %523 = vst.msk [vmem:[#allocation2 + $0x48] sm:$0x3] %vm514_vm4, %v3453_v18  ;;  %525 = vst.msk [vmem:[#allocation2 + $0x58] sm:$0x3] %vm514_vm4, %v3453_v18 }
  0x16   : > { %526 = vst.msk [vmem:[#allocation2 + $0x60] sm:$0xff] %vm512_vm3, %v3453_v18  ;;  %528 = vst.msk [vmem:[#allocation2 + $0x70] sm:$0xff] %vm512_vm3, %v3453_v18  ;;  %s2659_s21 = scalar_lea.sflag [#allocation4], %s377_s25 }
  0x17   : > { %s2871_s15 = sshll.u32 %s380_s14, 6  ;;  %527 = vst.msk [vmem:[#allocation2 + $0x68] sm:$0x3] %vm514_vm4, %v3453_v18  ;;  %529 = vst.msk [vmem:[#allocation2 + $0x78] sm:$0x3] %vm514_vm4, %v3453_v18  ;;  %v3618_v20 = vld [vmem:[#allocation2] sm:$0xff] }
  0x18   : > { %s383_s24 = scalar_lea.vmem %s4070_s0, %s2871_s15  ;;  %530 = vst.msk [vmem:[#allocation2 + $0x80] sm:$0xff] %vm512_vm3, %v3453_v18  ;;  %532 = vst.msk [vmem:[#allocation2 + $0x90] sm:$0xff] %vm512_vm3, %v3453_v18  ;;  %v3620_v21 = vld [vmem:[#allocation2 + $0x1] sm:$0xff]  ;;  %s2671_s14 = sshll.u32 %s378_s13, 4  ;;  %s4030_s14 = int_to_ptr.vmem [resolvable:$true] %s2671_s14 }
  0x19   : > { %v385_v6 = vld [vmem:[%s383_s24] sm:$0xff]  ;;  %v386_v7 = vld [vmem:[%s383_s24 + $0x8] sm:$0xff]  ;;  %v387_v8 = vld [vmem:[%s383_s24 + $0x10] sm:$0xff]  ;;  %531 = vst.msk [vmem:[#allocation2 + $0x88] sm:$0x3] %vm514_vm4, %v3453_v18  ;;  %s3394_s15 = scalar_lea.vmem %s3393_s30, 32  ;;  %p3395_p0 = scmp.lt.s32.totalorder %s4030_s14, %s3393_s30 }
  0x1a   : > { %v397_v9 = vpack.c.bf16 %v386_v7, %v385_v6  ;;  %v388_v10 = vld [vmem:[%s383_s24 + $0x18] sm:$0xff]  ;;  %v389_v11 = vld [vmem:[%s383_s24 + $0x20] sm:$0xff]  ;;  %v390_v12 = vld [vmem:[%s383_s24 + $0x28] sm:$0xff]  ;;  %533 = vst.msk [vmem:[#allocation2 + $0x98] sm:$0x3] %vm514_vm4, %v3453_v18 }
  0x1b   : > { %v398_v13 = vpack.c.bf16 %v388_v10, %v387_v8  ;;  %v399_v14 = vpack.c.bf16 %v390_v12, %v389_v11  ;;  %v391_v15 = vld [vmem:[%s383_s24 + $0x30] sm:$0xff]  ;;  %v392_v16 = vld [vmem:[%s383_s24 + $0x38] sm:$0xff]  ;;  %v3622_v22 = vld [vmem:[#allocation2 + $0x2] sm:$0xff]  ;;  %s3388_s24 = scalar_lea.vmem %s4030_s14, 16 }
  0x1c   : > { %2977 = vmatprep.mubr.msk.bf16.mxu0 %vm419_vm2, %v397_v9  ;;  %v400_v17 = vpack.c.bf16 %v392_v16, %v391_v15  ;;  %1513 = vst.msk [vmem:[#allocation2] sm:$0xff] %vm512_vm3, %v3453_v18  ;;  %p3389_p11 = scmp.ne.s32.totalorder %s4030_s14, %s3388_s24  ;;  %p3396_p1 = scmp.lt.s32.totalorder %s3394_s15, %s3388_s24 }
  0x1d   : > { %2978 = vmatmul.mubr.msk.bf16.vlgmr.msra.gmra.mrb[0].mxu0 %vm419_vm2, %v398_v13  ;;  %1514 = vst.msk [vmem:[#allocation2 + $0x8] sm:$0x3] %vm514_vm4, %v3453_v18 }
  0x1e   : > { %2981 = vmatprep.mubr.msk.bf16.mxu0 %vm419_vm2, %v399_v14  ;;  %p3390_p12 = pnand %p3389_p11, %p3554_p5  ;;  %p3397_p2 = por %p3396_p1, %p3395_p0 }
  0x1f   : > { %v3634_v24 = vld [vmem:[#allocation2 + $0x90] sm:$0xff] }
  0x20   : > { %p3391_p13 = pneg %p3390_p12 }
  0x21   : > { %v3636_v25 = vld [vmem:[#allocation2 + $0x91] sm:$0xff] }
  0x22   : > { %v3638_v26 = vld [vmem:[#allocation2 + $0x92] sm:$0xff]  ;;  %p3398_p3 = pnand %p3397_p2, %p3391_p13 }
  0x23   : > { %1531 = vst.msk [vmem:[#allocation2 + $0x90] sm:$0xff] %vm512_vm3, %v3453_v18 }
  0x24   : > { %1532 = vst.msk [vmem:[#allocation2 + $0x98] sm:$0x3] %vm514_vm4, %v3453_v18 }
  0x25   : > { %2982 = vmatmul.mubr.msk.bf16.gmra.mrb[4].mxu0 %vm419_vm2, %v400_v17 }
  0xf0   : > { %v2979_v28 = vpop.f32.mrb[0].mxu0 }
  0xf1   : > { %v3647_v29 = vadd.f32 %v2979_v28, %v2732_v27  ;;  %v473_v30 = vpop.f32.mrb[1].mxu0 }
  0xf2   : > { %v3649_v31 = vadd.f32 %v2732_v27, %v473_v30  ;;  %v2980_v32 = vpop.f32.mrb[2].mxu0  ;;  %v3371_v30 = vld [vmem:[%s4073_s3 + $0x20] sm:$0xff]  }
  0xf3   : > { %v506_v33 = vmax.f32 %v3647_v29, 0.0  ;;  %v3652_v34 = vadd.f32 %v2980_v32, %v2732_v27  ;;  %v476_v35 = vpop.f32.mrb[3].mxu0 }
  0xf4   : > { %v504_v36 = vmax.f32 %v3649_v31, 0.0  ;;  %v3655_v37 = vadd.f32 %v2732_v27, %v476_v35 }
  0xf5   : > { %537 = vst.msk [vmem:[#allocation2 + $0x31] sm:$0xff] %vm512_vm3, %v506_v33  ;;  %v507_v38 = vmax.f32 %v3652_v34, 0.0 }
  0xf6   : > { %535 = vst.msk [vmem:[#allocation2 + $0x11] sm:$0xff] %vm512_vm3, %v504_v36  ;;  %v505_v39 = vmax.f32 %v3655_v37, 0.0 }
  0xf7   : > { %538 = vst.msk [vmem:[#allocation2 + $0x41] sm:$0xff] %vm512_vm3, %v507_v38 }
  0xf8   : > { %536 = vst.msk [vmem:[#allocation2 + $0x21] sm:$0xff] %vm512_vm3, %v505_v39  ;;  %v2983_v40 = vpop.f32.mrb[4].mxu0 }
  0xf9   : > { %v3671_v41 = vadd.f32 %v2983_v40, %v2732_v27  ;;  %v489_v42 = vpop.f32.mrb[5].mxu0 }
  0xfa   : > { %v3673_v43 = vadd.f32 %v2732_v27, %v489_v42  ;;  %v2984_v44 = vpop.f32.mrb[6].mxu0  ;;  %v3372_v42 = vld [vmem:[%s4073_s3 + $0x28] sm:$0xff]  }
  0xfb   : > { %v510_v45 = vmax.f32 %v3671_v41, 0.0  ;;  %v3676_v46 = vadd.f32 %v2984_v44, %v2732_v27  ;;  %v492_v47 = vpop.f32.mrb[7].mxu0 }
  0xfc   : > { %v508_v48 = vmax.f32 %v3673_v43, 0.0  ;;  %v3679_v49 = vadd.f32 %v2732_v27, %v492_v47  ;;  %v3681_v50 = vld [vmem:[#allocation2 + $0x30] sm:$0xff] }
  0xfd   : > { %v3683_v51 = vld [vmem:[#allocation2 + $0x31] sm:$0xff]  ;;  %541 = vst.msk [vmem:[#allocation2 + $0x71] sm:$0xff] %vm512_vm3, %v510_v45  ;;  %v511_v53 = vmax.f32 %v3676_v46, 0.0 }
  0xfe   : > { %v3685_v52 = vld [vmem:[#allocation2 + $0x32] sm:$0xff]  ;;  %539 = vst.msk [vmem:[#allocation2 + $0x51] sm:$0xff] %vm512_vm3, %v508_v48  ;;  %v509_v57 = vmax.f32 %v3679_v49, 0.0  ;;  %v3707_v59 = vld [vmem:[#allocation2 + $0x40] sm:$0xff] }
  0xff   : > { %v3691_v54 = vld [vmem:[#allocation2 + $0x10] sm:$0xff]  ;;  %1520 = vst.msk [vmem:[#allocation2 + $0x38] sm:$0x3] %vm514_vm4, %v3453_v18  ;;  %v3709_v60 = vld [vmem:[#allocation2 + $0x41] sm:$0xff]  ;;  %v880_v40 = vpack.c.bf16 %v3707_v59, %v3681_v50 }
 0x100   : > { %v3693_v55 = vld [vmem:[#allocation2 + $0x11] sm:$0xff]  ;;  %1519 = vst.msk [vmem:[#allocation2 + $0x30] sm:$0xff] %vm512_vm3, %v3453_v18  ;;  %v561_v58 = vpack.c.bf16 %v3691_v54, %v3618_v20  ;;  %v3711_v61 = vld [vmem:[#allocation2 + $0x42] sm:$0xff]  ;;  %542 = vst.msk [vmem:[#allocation2 + $0x81] sm:$0xff] %vm512_vm3, %v511_v53 }
 0x101   : > { %v3695_v56 = vld [vmem:[#allocation2 + $0x12] sm:$0xff]  ;;  %v553_v62 = vld [vmem:[#allocation2 + $0x20] sm:$0xff]  ;;  %1522 = vst.msk [vmem:[#allocation2 + $0x48] sm:$0x3] %vm514_vm4, %v3453_v18  ;;  %v667_v17 = vpack.c.bf16 %v3693_v55, %v3620_v21 }
 0x102   : > { %1515 = vst.msk [vmem:[#allocation2 + $0x10] sm:$0xff] %vm512_vm3, %v3453_v18  ;;  %v3720_v63 = vld [vmem:[#allocation2 + $0x21] sm:$0xff]  ;;  %1521 = vst.msk [vmem:[#allocation2 + $0x40] sm:$0xff] %vm512_vm3, %v3453_v18  ;;  %2987 = vmatprep.mubr.msk.bf16.mxu1 %vm512_vm3, %v561_v58  ;;  %v3733_v1 = vpack.c.bf16 %v3681_v50, %v553_v62  ;;  %v3370_v20 = vld [vmem:[%s4073_s3 + $0x18] sm:$0xff]   ;;  %v773_v27 = vpack.c.bf16 %v3695_v56, %v3622_v22  ;;  %v879_v35 = vpack.c.bf16 %v553_v62, %v3691_v54 }
 0x103   : > { %1516 = vst.msk [vmem:[#allocation2 + $0x18] sm:$0x3] %vm514_vm4, %v3453_v18  ;;  %v3722_v0 = vld [vmem:[#allocation2 + $0x22] sm:$0xff]  ;;  %v668_v19 = vpack.c.bf16 %v3683_v51, %v3720_v63  ;;  %v985_v54 = vpack.c.bf16 %v3720_v63, %v3693_v55  ;;  %v986_v50 = vpack.c.bf16 %v3709_v60, %v3683_v51  ;;  %v3373_v58 = vld [vmem:[%s4073_s3 + $0x30] sm:$0xff]   ;;  %v1092_v51 = vpack.c.bf16 %v3711_v61, %v3685_v52 }
 0x104   : > { %540 = vst.msk [vmem:[#allocation2 + $0x61] sm:$0xff] %vm512_vm3, %v509_v57  ;;  %1517 = vst.msk [vmem:[#allocation2 + $0x20] sm:$0xff] %vm512_vm3, %v3453_v18  ;;  %2988 = vmatmul.mubr.msk.bf16.vlgmr.msra.gmra.mrb[0].mxu1 %vm512_vm3, %v3733_v1  ;;  %v558_v3 = vld [vmem:[#allocation2 + $0x70] sm:$0xff]  ;;  %v774_v28 = vpack.c.bf16 %v3685_v52, %v3722_v0  ;;  %v1091_v62 = vpack.c.bf16 %v3722_v0, %v3695_v56  ;;  %v3375_v52 = vld [vmem:[%s4073_s3 + $0x40] sm:$0xff]  }
 0x105   : > { %1518 = vst.msk [vmem:[#allocation2 + $0x28] sm:$0x3] %vm514_vm4, %v3453_v18  ;;  %2996 = vmatpush3.bf16.msra.mxu1 %v3631_v23  ;;  %v3745_v4 = vld [vmem:[#allocation2 + $0x71] sm:$0xff] }
 0x106   : > { %3005 = vmatprep.subr.bf16.mxu1 %v3369_v2  ;;  %v3747_v5 = vld [vmem:[#allocation2 + $0x72] sm:$0xff] }
 0x107   : > { %v556_v6 = vld [vmem:[#allocation2 + $0x50] sm:$0xff]  ;;  %1528 = vst.msk [vmem:[#allocation2 + $0x78] sm:$0x3] %vm514_vm4, %v3453_v18  ;;  %v3758_v10 = vld [vmem:[#allocation2 + $0x80] sm:$0xff] }
 0x108   : > { %v661_v7 = vld [vmem:[#allocation2 + $0x51] sm:$0xff]  ;;  %1527 = vst.msk [vmem:[#allocation2 + $0x70] sm:$0xff] %vm512_vm3, %v3453_v18  ;;  %v3756_v9 = vpack.c.bf16 %v556_v6, %v3707_v59  ;;  %v3760_v11 = vld [vmem:[#allocation2 + $0x81] sm:$0xff]  ;;  %v882_v47 = vpack.c.bf16 %v3758_v10, %v558_v3 }
 0x109   : > { %v3749_v8 = vld [vmem:[#allocation2 + $0x52] sm:$0xff]  ;;  %v3762_v12 = vld [vmem:[#allocation2 + $0x82] sm:$0xff]  ;;  %v669_v23 = vpack.c.bf16 %v661_v7, %v3709_v60  ;;  %v988_v55 = vpack.c.bf16 %v3760_v11, %v3745_v4  ;;  %v1307_v0 = vpack.c.bf16 %v3636_v25, %v3760_v11 }
 0x10a   : > { %1524 = vst.msk [vmem:[#allocation2 + $0x58] sm:$0x3] %vm514_vm4, %v3453_v18  ;;  %1530 = vst.msk [vmem:[#allocation2 + $0x88] sm:$0x3] %vm514_vm4, %v3453_v18  ;;  %2991 = vmatprep.mubr.msk.bf16.mxu1 %vm512_vm3, %v3756_v9  ;;  %v775_v32 = vpack.c.bf16 %v3749_v8, %v3711_v61  ;;  %v3374_v60 = vld [vmem:[%s4073_s3 + $0x38] sm:$0xff]   ;;  %v1094_v56 = vpack.c.bf16 %v3762_v12, %v3747_v5  ;;  %v1201_v61 = vpack.c.bf16 %v3634_v24, %v3758_v10  ;;  %v3377_v25 = vld [vmem:[%s4075_s5 + $0x8] sm:$0xff]  }
 0x10b   : > { %1523 = vst.msk [vmem:[#allocation2 + $0x50] sm:$0xff] %vm512_vm3, %v3453_v18  ;;  %v557_v13 = vld [vmem:[#allocation2 + $0x60] sm:$0xff]  ;;  %1529 = vst.msk [vmem:[#allocation2 + $0x80] sm:$0xff] %vm512_vm3, %v3453_v18  ;;  %v1413_v24 = vpack.c.bf16 %v3638_v26, %v3762_v12 }
 0x10c   : > { %v662_v14 = vld [vmem:[#allocation2 + $0x61] sm:$0xff]  ;;  %v3774_v16 = vpack.c.bf16 %v558_v3, %v557_v13  ;;  %v881_v44 = vpack.c.bf16 %v557_v13, %v556_v6 }
 0x10d   : > { %v768_v15 = vld [vmem:[#allocation2 + $0x62] sm:$0xff]  ;;  %v670_v21 = vpack.c.bf16 %v3745_v4, %v662_v14  ;;  %v987_v59 = vpack.c.bf16 %v662_v14, %v661_v7 }
 0x10e   : > { %1526 = vst.msk [vmem:[#allocation2 + $0x68] sm:$0x3] %vm514_vm4, %v3453_v18  ;;  %2992 = vmatmul.mubr.msk.bf16.gmra.mrb[4].mxu1 %vm512_vm3, %v3774_v16  ;;  %v776_v22 = vpack.c.bf16 %v3747_v5, %v768_v15  ;;  %v1093_v63 = vpack.c.bf16 %v768_v15, %v3749_v8 }
 0x10f   : > { %1525 = vst.msk [vmem:[#allocation2 + $0x60] sm:$0xff] %vm512_vm3, %v3453_v18  ;;  %2997 = vmatprep.mubr.msk.bf16.mxu1 %vm512_vm3, %v667_v17 }
 0x116   : > { %2998 = vmatmul.mubr.msk.bf16.vlgmr.msra.gmra.mrb[0].mxu1 %vm512_vm3, %v668_v19 }
 0x117   : > { %3006 = vmatpush3.bf16.msra.mxu1 %v3369_v2  ;;  %3001 = vmatprep.mubr.msk.bf16.mxu1 %vm512_vm3, %v669_v23  ;;  %v2739_v2 = vld [vmem:[%s4074_s4] ss:$0 sm:$0xff] }
 0x118   : > { %3015 = vmatprep.subr.bf16.mxu1 %v3370_v20 }
 0x11e   : > { %3002 = vmatmul.mubr.msk.bf16.gmra.mrb[4].mxu1 %vm512_vm3, %v670_v21 }
 0x11f   : > { %3007 = vmatprep.mubr.msk.bf16.mxu1 %vm512_vm3, %v773_v27  ;;  %v1549_v27 = vld [vmem:[#allocation2] sm:$0xff] }
 0x126   : > { %3008 = vmatmul.mubr.msk.bf16.vlgmr.msra.gmra.mrb[0].mxu1 %vm512_vm3, %v774_v28 }
 0x127   : > { %3016 = vmatpush3.bf16.msra.mxu1 %v3370_v20  ;;  %3011 = vmatprep.mubr.msk.bf16.mxu1 %vm512_vm3, %v775_v32 }
 0x128   : > { %3025 = vmatprep.subr.bf16.mxu1 %v3371_v30 }
 0x12e   : > { %3012 = vmatmul.mubr.msk.bf16.gmra.mrb[4].mxu1 %vm512_vm3, %v776_v22 }
 0x12f   : > { %3017 = vmatprep.mubr.msk.bf16.mxu1 %vm512_vm3, %v879_v35 }
 0x136   : > { %3018 = vmatmul.mubr.msk.bf16.vlgmr.msra.gmra.mrb[0].mxu1 %vm512_vm3, %v880_v40 }
 0x137   : > { %3026 = vmatpush3.bf16.msra.mxu1 %v3371_v30  ;;  %3021 = vmatprep.mubr.msk.bf16.mxu1 %vm512_vm3, %v881_v44 }
 0x138   : > { %3035 = vmatprep.subr.bf16.mxu1 %v3372_v42 }
 0x13e   : > { %3022 = vmatmul.mubr.msk.bf16.gmra.mrb[4].mxu1 %vm512_vm3, %v882_v47 }
 0x13f   : > { %3027 = vmatprep.mubr.msk.bf16.mxu1 %vm512_vm3, %v985_v54  ;;  %v3378_v54 = vld [vmem:[%s4075_s5 + $0x10] sm:$0xff]  }
 0x146   : > { %3028 = vmatmul.mubr.msk.bf16.vlgmr.msra.gmra.mrb[0].mxu1 %vm512_vm3, %v986_v50 }
 0x147   : > { %3036 = vmatpush3.bf16.msra.mxu1 %v3372_v42  ;;  %3031 = vmatprep.mubr.msk.bf16.mxu1 %vm512_vm3, %v987_v59 }
 0x148   : > { %3045 = vmatprep.subr.bf16.mxu1 %v3373_v58 }
 0x14e   : > { %3032 = vmatmul.mubr.msk.bf16.gmra.mrb[4].mxu1 %vm512_vm3, %v988_v55  ;;  %v1654_v55 = vld [vmem:[#allocation2 + $0x1] sm:$0xff] }
 0x14f   : > { %3037 = vmatprep.mubr.msk.bf16.mxu1 %vm512_vm3, %v1091_v62 }
 0x156   : > { %3038 = vmatmul.mubr.msk.bf16.vlgmr.msra.gmra.mrb[0].mxu1 %vm512_vm3, %v1092_v51 }
 0x157   : > { %3046 = vmatpush3.bf16.msra.mxu1 %v3373_v58  ;;  %3041 = vmatprep.mubr.msk.bf16.mxu1 %vm512_vm3, %v1093_v63 }
 0x158   : > { %3055 = vmatprep.subr.bf16.mxu1 %v3374_v60 }
 0x15e   : > { %3042 = vmatmul.mubr.msk.bf16.gmra.mrb[4].mxu1 %vm512_vm3, %v1094_v56 }
 0x15f   : > { %3047 = vmatprep.mubr.msk.bf16.mxu1 %vm512_vm3, %v3733_v1  ;;  %v3376_v1 = vld [vmem:[%s4075_s5] sm:$0xff]  }
 0x160   : > { %3075 = vmatprep.subr.bf16.mxu0 %v3376_v1 }
 0x161   : > { %3076 = vmatpush3.bf16.msra.mxu0 %v3376_v1 }
 0x162   : > { %3085 = vmatprep.subr.bf16.mxu0 %v3377_v25 }
 0x166   : > { %3048 = vmatmul.mubr.msk.bf16.vlgmr.msra.gmra.mrb[0].mxu1 %vm512_vm3, %v3756_v9 }
 0x167   : > { %3056 = vmatpush3.bf16.msra.mxu1 %v3374_v60  ;;  %3051 = vmatprep.mubr.msk.bf16.mxu1 %vm512_vm3, %v3774_v16 }
 0x168   : > { %3065 = vmatprep.subr.bf16.mxu1 %v3375_v52 }
 0x16e   : > { %3052 = vmatmul.mubr.msk.bf16.gmra.mrb[4].mxu1 %vm512_vm3, %v1201_v61 }
 0x16f   : > { %3057 = vmatprep.mubr.msk.bf16.mxu1 %vm512_vm3, %v668_v19 }
 0x176   : > { %3058 = vmatmul.mubr.msk.bf16.vlgmr.msra.gmra.mrb[0].mxu1 %vm512_vm3, %v669_v23 }
 0x177   : > { %3066 = vmatpush3.bf16.msra.mxu1 %v3375_v52  ;;  %3061 = vmatprep.mubr.msk.bf16.mxu1 %vm512_vm3, %v670_v21 }
 0x178   : > { %3165 = vmatprep.subr.bf16.mxu1 %v3453_v18 }
 0x17e   : > { %3062 = vmatmul.mubr.msk.bf16.gmra.mrb[4].mxu1 %vm512_vm3, %v1307_v0 }
 0x17f   : > { %3067 = vmatprep.mubr.msk.bf16.mxu1 %vm512_vm3, %v774_v28 }
 0x186   : > { %3068 = vmatmul.mubr.msk.bf16.vlgmr.msra.gmra.mrb[0].mxu1 %vm512_vm3, %v775_v32 }
 0x187   : > { %3071 = vmatprep.mubr.msk.bf16.mxu1 %vm512_vm3, %v776_v22 }
 0x18e   : > { %3072 = vmatmul.mubr.msk.bf16.gmra.mrb[4].mxu1 %vm512_vm3, %v1413_v24 }
 0x18f   : > { %3167 = vmatprep.mubr.msk.bf16.mxu1 %vm3454_vm5, %v3453_v18 }
 0x259   : > { %v3069_v3 = vpop.f32.mrb[0].mxu1 }
 0x25a   : > { %v3179_v4 = vadd.f32 %v3069_v3, %v2739_v2  ;;  %v1466_v26 = vpop.f32.mrb[1].mxu1 }
 0x25b   : > { %v3180_v5 = vadd.f32 %v2739_v2, %v1466_v26  ;;  %v3070_v6 = vpop.f32.mrb[2].mxu1 }
 0x25c   : > { %v1507_v7 = vmax.f32 %v3179_v4, 0.0  ;;  %v3181_v8 = vadd.f32 %v3070_v6, %v2739_v2  ;;  %v1469_v9 = vpop.f32.mrb[3].mxu1  ;;  %v1760_v4 = vld [vmem:[#allocation2 + $0x2] sm:$0xff] }
 0x25d   : > { %v1505_v10 = vmax.f32 %v3180_v5, 0.0  ;;  %v3182_v11 = vadd.f32 %v2739_v2, %v1469_v9 }
 0x25e   : > { %1535 = vst.msk [vmem:[#allocation2 + $0x31] sm:$0xff] %vm512_vm3, %v1507_v7  ;;  %v1508_v12 = vmax.f32 %v3181_v8, 0.0 }
 0x25f   : > { %1533 = vst.msk [vmem:[#allocation2 + $0x11] sm:$0xff] %vm512_vm3, %v1505_v10  ;;  %v1506_v13 = vmax.f32 %v3182_v11, 0.0 }
 0x260   : > { %1536 = vst.msk [vmem:[#allocation2 + $0x41] sm:$0xff] %vm512_vm3, %v1508_v12 }
 0x261   : > { %1534 = vst.msk [vmem:[#allocation2 + $0x21] sm:$0xff] %vm512_vm3, %v1506_v13  ;;  %v3073_v14 = vpop.f32.mrb[4].mxu1  ;;  %v3380_v13 = vld [vmem:[%s4075_s5 + $0x20] sm:$0xff]  }
 0x262   : > { %v3183_v15 = vadd.f32 %v3073_v14, %v2739_v2  ;;  %v1482_v16 = vpop.f32.mrb[5].mxu1 }
 0x263   : > { %v3184_v17 = vadd.f32 %v2739_v2, %v1482_v16  ;;  %v3074_v19 = vpop.f32.mrb[6].mxu1 }
 0x264   : > { %v1511_v20 = vmax.f32 %v3183_v15, 0.0  ;;  %v3185_v23 = vadd.f32 %v3074_v19, %v2739_v2  ;;  %v1485_v21 = vpop.f32.mrb[7].mxu1 }
 0x265   : > { %v1509_v28 = vmax.f32 %v3184_v17, 0.0  ;;  %v3186_v30 = vadd.f32 %v2739_v2, %v1485_v21  ;;  %v1552_v44 = vld [vmem:[#allocation2 + $0x30] sm:$0xff] }
 0x266   : > { %1539 = vst.msk [vmem:[#allocation2 + $0x71] sm:$0xff] %vm512_vm3, %v1511_v20  ;;  %v1512_v32 = vmax.f32 %v3185_v23, 0.0  ;;  %v1550_v22 = vld [vmem:[#allocation2 + $0x10] sm:$0xff]  ;;  %v3381_v23 = vld [vmem:[%s4075_s5 + $0x28] sm:$0xff]  }
 0x267   : > { %1537 = vst.msk [vmem:[#allocation2 + $0x51] sm:$0xff] %vm512_vm3, %v1509_v28  ;;  %v1510_v35 = vmax.f32 %v3186_v30, 0.0  ;;  %v1559_v40 = vpack.c.bf16 %v1550_v22, %v1549_v27  ;;  %v1553_v50 = vld [vmem:[#allocation2 + $0x40] sm:$0xff]  ;;  %v1655_v62 = vld [vmem:[#allocation2 + $0x11] sm:$0xff] }
 0x268   : > { %1540 = vst.msk [vmem:[#allocation2 + $0x81] sm:$0xff] %vm512_vm3, %v1512_v32  ;;  %v1551_v42 = vld [vmem:[#allocation2 + $0x20] sm:$0xff]  ;;  %v1665_v56 = vpack.c.bf16 %v1655_v62, %v1654_v55  ;;  %v1657_v0 = vld [vmem:[#allocation2 + $0x31] sm:$0xff]  ;;  %v1878_v20 = vpack.c.bf16 %v1553_v50, %v1552_v44 }
 0x269   : > { %1538 = vst.msk [vmem:[#allocation2 + $0x61] sm:$0xff] %vm512_vm3, %v1510_v35  ;;  %3077 = vmatprep.mubr.msk.bf16.mxu0 %vm512_vm3, %v1559_v40  ;;  %v3890_v47 = vpack.c.bf16 %v1552_v44, %v1551_v42  ;;  %v1656_v52 = vld [vmem:[#allocation2 + $0x21] sm:$0xff]  ;;  %v1761_v26 = vld [vmem:[#allocation2 + $0x12] sm:$0xff]  ;;  %v1877_v19 = vpack.c.bf16 %v1551_v42, %v1550_v22 }
 0x26a   : > { %v3906_v24 = vpack.c.bf16 %v1657_v0, %v1656_v52  ;;  %v1658_v1 = vld [vmem:[#allocation2 + $0x41] sm:$0xff]  ;;  %v1771_v7 = vpack.c.bf16 %v1761_v26, %v1760_v4  ;;  %v1763_v10 = vld [vmem:[#allocation2 + $0x32] sm:$0xff]  ;;  %v1983_v30 = vpack.c.bf16 %v1656_v52, %v1655_v62 }
 0x26b   : > { %3078 = vmatmul.mubr.msk.bf16.vlgmr.msra.gmra.mrb[8].mxu0 %vm512_vm3, %v3890_v47  ;;  %v1762_v8 = vld [vmem:[#allocation2 + $0x22] sm:$0xff]  ;;  %v1984_v32 = vpack.c.bf16 %v1658_v1, %v1657_v0  ;;  %v3382_v22 = vld [vmem:[%s4075_s5 + $0x30] sm:$0xff]   ;;  %v2801_v0 = vld [vmem:[%s4076_s6] ss:$0 sm:$0xff] }
 0x26c   : > { %3086 = vmatpush3.bf16.msra.mxu0 %v3377_v25  ;;  %v3379_v25 = vld [vmem:[%s4075_s5 + $0x18] sm:$0xff]   ;;  %v3922_v11 = vpack.c.bf16 %v1763_v10, %v1762_v8  ;;  %v1764_v12 = vld [vmem:[#allocation2 + $0x42] sm:$0xff]  ;;  %v2089_v44 = vpack.c.bf16 %v1762_v8, %v1761_v26 }
 0x26d   : > { %3095 = vmatprep.subr.bf16.mxu0 %v3378_v54  ;;  %v1556_v60 = vld [vmem:[#allocation2 + $0x70] sm:$0xff] }
 0x26e   : > { %v1554_v58 = vld [vmem:[#allocation2 + $0x50] sm:$0xff] }
 0x26f   : > { %v3897_v59 = vpack.c.bf16 %v1554_v58, %v1553_v50  ;;  %v1659_v61 = vld [vmem:[#allocation2 + $0x51] sm:$0xff]  ;;  %v1873_v27 = vld [vmem:[#allocation2 + $0x80] sm:$0xff] }
 0x270   : > { %v1555_v51 = vld [vmem:[#allocation2 + $0x60] sm:$0xff]  ;;  %v3911_v2 = vpack.c.bf16 %v1659_v61, %v1658_v1  ;;  %v1661_v5 = vld [vmem:[#allocation2 + $0x71] sm:$0xff]  ;;  %v1880_v28 = vpack.c.bf16 %v1873_v27, %v1556_v60 }
 0x271   : > { %3081 = vmatprep.mubr.msk.bf16.mxu0 %vm512_vm3, %v3897_v59  ;;  %v3901_v63 = vpack.c.bf16 %v1556_v60, %v1555_v51  ;;  %v1660_v3 = vld [vmem:[#allocation2 + $0x61] sm:$0xff]  ;;  %v1765_v9 = vld [vmem:[#allocation2 + $0x52] sm:$0xff]  ;;  %v1879_v21 = vpack.c.bf16 %v1555_v51, %v1554_v58 }
 0x272   : > { %v3917_v6 = vpack.c.bf16 %v1661_v5, %v1660_v3  ;;  %v1773_v14 = vpack.c.bf16 %v1765_v9, %v1764_v12  ;;  %v1766_v15 = vld [vmem:[#allocation2 + $0x62] sm:$0xff]  ;;  %v1767_v16 = vld [vmem:[#allocation2 + $0x72] sm:$0xff]  ;;  %v1985_v35 = vpack.c.bf16 %v1660_v3, %v1659_v61 }
 0x273   : > { %3082 = vmatmul.mubr.msk.bf16.gmra.mrb[12].mxu0 %vm512_vm3, %v3901_v63  ;;  %v1774_v17 = vpack.c.bf16 %v1767_v16, %v1766_v15  ;;  %v1979_v40 = vld [vmem:[#allocation2 + $0x81] sm:$0xff]  ;;  %v3383_v50 = vld [vmem:[%s4075_s5 + $0x38] sm:$0xff]   ;;  %v2091_v58 = vpack.c.bf16 %v1766_v15, %v1765_v9  ;;  %v2191_v60 = vld [vmem:[#allocation2 + $0x90] sm:$0xff] }
 0x274   : > { %3087 = vmatprep.mubr.msk.bf16.mxu0 %vm512_vm3, %v1665_v56  ;;  %v1986_v42 = vpack.c.bf16 %v1979_v40, %v1661_v5  ;;  %v2085_v55 = vld [vmem:[#allocation2 + $0x82] sm:$0xff]  ;;  %v2198_v56 = vpack.c.bf16 %v2191_v60, %v1873_v27 }
 0x275   : > { %v2092_v62 = vpack.c.bf16 %v2085_v55, %v1767_v16  ;;  %v3384_v51 = vld [vmem:[%s4075_s5 + $0x40] sm:$0xff]  }
 0x276   : > { %v3385_v61 = vld [vmem:[%s4077_s7] sm:$0xff]  }
 0x277   : > { %3166 = vmatpush3.bf16.msra.mxu1 %v3385_v61 }
 0x278   : > { %3171 = vmatprep.subr.bf16.mxu1 %v3453_v18 }
 0x27b   : > { %3088 = vmatmul.mubr.msk.bf16.vlgmr.msra.gmra.mrb[8].mxu0 %vm512_vm3, %v3906_v24 }
 0x27c   : > { %3096 = vmatpush3.bf16.msra.mxu0 %v3378_v54  ;;  %3091 = vmatprep.mubr.msk.bf16.mxu0 %vm512_vm3, %v3911_v2  ;;  %v2090_v54 = vpack.c.bf16 %v1764_v12, %v1763_v10 }
 0x27d   : > { %3105 = vmatprep.subr.bf16.mxu0 %v3379_v25 }
 0x283   : > { %3092 = vmatmul.mubr.msk.bf16.gmra.mrb[12].mxu0 %vm512_vm3, %v3917_v6 }
 0x284   : > { %3097 = vmatprep.mubr.msk.bf16.mxu0 %vm512_vm3, %v1771_v7 }
 0x28b   : > { %3098 = vmatmul.mubr.msk.bf16.vlgmr.msra.gmra.mrb[8].mxu0 %vm512_vm3, %v3922_v11 }
 0x28c   : > { %3106 = vmatpush3.bf16.msra.mxu0 %v3379_v25  ;;  %3101 = vmatprep.mubr.msk.bf16.mxu0 %vm512_vm3, %v1773_v14 }
 0x28d   : > { %3115 = vmatprep.subr.bf16.mxu0 %v3380_v13 }
 0x293   : > { %3102 = vmatmul.mubr.msk.bf16.gmra.mrb[12].mxu0 %vm512_vm3, %v1774_v17 }
 0x294   : > { %3107 = vmatprep.mubr.msk.bf16.mxu0 %vm512_vm3, %v1877_v19 }
 0x29b   : > { %3108 = vmatmul.mubr.msk.bf16.vlgmr.msra.gmra.mrb[8].mxu0 %vm512_vm3, %v1878_v20 }
 0x29c   : > { %3116 = vmatpush3.bf16.msra.mxu0 %v3380_v13  ;;  %3111 = vmatprep.mubr.msk.bf16.mxu0 %vm512_vm3, %v1879_v21 }
 0x29d   : > { %3125 = vmatprep.subr.bf16.mxu0 %v3381_v23 }
 0x2a3   : > { %3112 = vmatmul.mubr.msk.bf16.gmra.mrb[12].mxu0 %vm512_vm3, %v1880_v28 }
 0x2a4   : > { %3117 = vmatprep.mubr.msk.bf16.mxu0 %vm512_vm3, %v1983_v30 }
 0x2ab   : > { %3118 = vmatmul.mubr.msk.bf16.vlgmr.msra.gmra.mrb[8].mxu0 %vm512_vm3, %v1984_v32 }
 0x2ac   : > { %3126 = vmatpush3.bf16.msra.mxu0 %v3381_v23  ;;  %3121 = vmatprep.mubr.msk.bf16.mxu0 %vm512_vm3, %v1985_v35 }
 0x2ad   : > { %3135 = vmatprep.subr.bf16.mxu0 %v3382_v22 }
 0x2b3   : > { %3122 = vmatmul.mubr.msk.bf16.gmra.mrb[12].mxu0 %vm512_vm3, %v1986_v42 }
 0x2b4   : > { %3127 = vmatprep.mubr.msk.bf16.mxu0 %vm512_vm3, %v2089_v44 }
 0x2bb   : > { %3128 = vmatmul.mubr.msk.bf16.vlgmr.msra.gmra.mrb[8].mxu0 %vm512_vm3, %v2090_v54 }
 0x2bc   : > { %3136 = vmatpush3.bf16.msra.mxu0 %v3382_v22  ;;  %3131 = vmatprep.mubr.msk.bf16.mxu0 %vm512_vm3, %v2091_v58 }
 0x2bd   : > { %3145 = vmatprep.subr.bf16.mxu0 %v3383_v50 }
 0x2c3   : > { %3132 = vmatmul.mubr.msk.bf16.gmra.mrb[12].mxu0 %vm512_vm3, %v2092_v62 }
 0x2c4   : > { %3137 = vmatprep.mubr.msk.bf16.mxu0 %vm512_vm3, %v3890_v47  ;;  %v2297_v47 = vld [vmem:[#allocation2 + $0x91] sm:$0xff] }
 0x2cb   : > { %3138 = vmatmul.mubr.msk.bf16.vlgmr.msra.gmra.mrb[8].mxu0 %vm512_vm3, %v3897_v59  ;;  %v2304_v59 = vpack.c.bf16 %v2297_v47, %v1979_v40  ;;  %v2544_v47 = vld [vmem:[%s4078_s8] sm:$0x1] }
 0x2cc   : > { %3146 = vmatpush3.bf16.msra.mxu0 %v3383_v50  ;;  %3141 = vmatprep.mubr.msk.bf16.mxu0 %vm512_vm3, %v3901_v63  ;;  %v2403_v63 = vld [vmem:[#allocation2 + $0x92] sm:$0xff] }
 0x2cd   : > { %3155 = vmatprep.subr.bf16.mxu0 %v3384_v51  ;;  %v2410_v52 = vpack.c.bf16 %v2403_v63, %v2085_v55 }
 0x2d3   : > { %3142 = vmatmul.mubr.msk.bf16.gmra.mrb[12].mxu0 %vm512_vm3, %v2198_v56  ;;  %v3387_v56 = vld [vmem:[%s4079_s9 + $0x8] sm:$0xff]  }
 0x2d4   : > { %3147 = vmatprep.mubr.msk.bf16.mxu0 %vm512_vm3, %v3906_v24 }
 0x2db   : > { %3148 = vmatmul.mubr.msk.bf16.vlgmr.msra.gmra.mrb[8].mxu0 %vm512_vm3, %v3911_v2 }
 0x2dc   : > { %3156 = vmatpush3.bf16.msra.mxu0 %v3384_v51  ;;  %3151 = vmatprep.mubr.msk.bf16.mxu0 %vm512_vm3, %v3917_v6  ;;  %v3386_v51 = vld [vmem:[%s4079_s9] sm:$0xff]  }
 0x2e3   : > { %3152 = vmatmul.mubr.msk.bf16.gmra.mrb[12].mxu0 %vm512_vm3, %v2304_v59 }
 0x2e4   : > { %3157 = vmatprep.mubr.msk.bf16.mxu0 %vm512_vm3, %v3922_v11 }
 0x2eb   : > { %3158 = vmatmul.mubr.msk.bf16.vlgmr.msra.gmra.mrb[8].mxu0 %vm512_vm3, %v1773_v14 }
 0x2ec   : > { %3161 = vmatprep.mubr.msk.bf16.mxu0 %vm512_vm3, %v1774_v17 }
 0x2f3   : > { %3162 = vmatmul.mubr.msk.bf16.gmra.mrb[12].mxu0 %vm512_vm3, %v2410_v52 }
 0x3be   : > { %v3159_v24 = vpop.f32.mrb[8].mxu0 }
 0x3bf   : > { %v3187_v1 = vadd.f32 %v3159_v24, %v2801_v0  ;;  %v2463_v25 = vpop.f32.mrb[9].mxu0 }
 0x3c0   : > { %v3188_v2 = vadd.f32 %v2801_v0, %v2463_v25  ;;  %v3160_v3 = vpop.f32.mrb[10].mxu0 }
 0x3c1   : > { %v3189_v4 = vadd.f32 %v3160_v3, %v2801_v0  ;;  %v2466_v26 = vpop.f32.mrb[11].mxu0  ;;  %v2504_v5 = vadd.f32 %v3187_v1, %v506_v33 }
 0x3c2   : > { %v2502_v6 = vadd.f32 %v3188_v2, %v504_v36  ;;  %v3190_v7 = vadd.f32 %v2801_v0, %v2466_v26 }
 0x3c3   : > { %v2505_v9 = vadd.f32 %v3189_v4, %v507_v38  ;;  %v2512_v11 = vmax.f32 %v2504_v5, 0.0 }
 0x3c4   : > { %v2510_v8 = vmax.f32 %v2502_v6, 0.0  ;;  %v2503_v10 = vadd.f32 %v3190_v7, %v505_v39 }
 0x3c5   : > { %v2513_v29 = vmax.f32 %v2505_v9, 0.0  ;;  %v2521_v34 = vsel %vm512_vm3, %v2512_v11, 0.0 }
 0x3c6   : > { %v2511_v12 = vmax.f32 %v2503_v10, 0.0  ;;  %v3163_v13 = vpop.f32.mrb[12].mxu0  ;;  %v2518_v16 = vsel %vm512_vm3, %v2510_v8, 0.0 }
 0x3c7   : > { %v3191_v14 = vadd.f32 %v3163_v13, %v2801_v0  ;;  %v2479_v15 = vpop.f32.mrb[13].mxu0  ;;  %v2523_v21 = vsel %vm512_vm3, %v2513_v29, 0.0 }
 0x3c8   : > { %v2519_v33 = vsel %vm512_vm3, %v2511_v12, 0.0  ;;  %v3192_v31 = vadd.f32 %v2801_v0, %v2479_v15  ;;  %v3164_v36 = vpop.f32.mrb[14].mxu0 }
 0x3c9   : > { %v2520_v17 = vadd.f32 %v2519_v33, %v2518_v16  ;;  %v3193_v19 = vadd.f32 %v3164_v36, %v2801_v0  ;;  %v2482_v20 = vpop.f32.mrb[15].mxu0  ;;  %v2508_v37 = vadd.f32 %v3191_v14, %v510_v45 }
 0x3ca   : > { %v2506_v38 = vadd.f32 %v3192_v31, %v508_v48  ;;  %v3194_v39 = vadd.f32 %v2801_v0, %v2482_v20 }
 0x3cb   : > { %v2522_v23 = vadd.f32 %v2521_v34, %v2520_v17  ;;  %v2509_v28 = vadd.f32 %v3193_v19, %v511_v53  ;;  %v2516_v22 = vmax.f32 %v2508_v37, 0.0 }
 0x3cc   : > { %v2514_v27 = vmax.f32 %v2506_v38, 0.0  ;;  %v2507_v30 = vadd.f32 %v3194_v39, %v509_v57 }
 0x3cd   : > { %v2524_v32 = vadd.f32 %v2523_v21, %v2522_v23  ;;  %v2517_v40 = vmax.f32 %v2509_v28, 0.0  ;;  %v2529_v42 = vsel %vm512_vm3, %v2516_v22, 0.0 }
 0x3ce   : > { %v2525_v35 = vsel %vm512_vm3, %v2514_v27, 0.0  ;;  %v2515_v41 = vmax.f32 %v2507_v30, 0.0 }
 0x3cf   : > { %v2526_v45 = vadd.f32 %v2525_v35, %v2524_v32  ;;  %v2531_v54 = vsel %vm512_vm3, %v2517_v40, 0.0 }
 0x3d0   : > { %v2527_v43 = vsel %vm512_vm3, %v2515_v41, 0.0 }
 0x3d1   : > { %v2528_v48 = vadd.f32 %v2527_v43, %v2526_v45 }
 0x3d3   : > { %v2530_v44 = vadd.f32 %v2529_v42, %v2528_v48 }
 0x3d5   : > { %v2532_v46 = vadd.f32 %v2531_v54, %v2530_v44 }
 0x3d7   : > { %v2533_v53 = vrot.slane %v2532_v46, 4 }
 0x3d9   : > { %v2534_v50 = vadd.f32 %v2533_v53, %v2532_v46 }
 0x3db   : > { %v2535_v49 = vrot.slane %v2534_v50, 2 }
 0x3dd   : > { %v2536_v57 = vadd.f32 %v2535_v49, %v2534_v50 }
 0x3df   : > { %v2537_v58 = vrot.slane %v2536_v57, 1 }
 0x3e1   : > { %v2538_v55 = vadd.f32 %v2537_v58, %v2536_v57 }
 0x3e3   : > { %v2540_v62 = vmul.f32 0.015625, %v2538_v55 }
 0x3e5   : > { %v2543_v60 = vpack.c.bf16 %v2540_v62, %v2540_v62 }
 0x3e7   : > { %3168 = vmatmul.mubr.msk.bf16.vlgmr.msra.gmra.mrb[8].mxu1 %vm512_vm3, %v2543_v60 }
 0x3e8   : > { %3172 = vmatpush3.bf16.msra.mxu1 %v3386_v51  ;;  %3175 = vmatprep.mubr.msk.bf16.mxu1 %vm3454_vm5, %v3453_v18 }
 0x3e9   : > { %3173 = vmatprep.subr.bf16.mxu1 %v3453_v18  ;;  %v2599_v18 = vld [vmem:[%s4080_s10] sm:$0x1] }
 0x3ec   : > { %3174 = vmatpush3.bf16.msra.mxu1 %v3387_v56 }
 0x4ba   : > { %v2588_v59 = vpop.f32.mrb[8].mxu1 }
 0x4bb   : > { %v2589_v63 = vadd.f32 %v2588_v59, %v2544_v47  ;;  %v3169_v52 = vpop.f32.mrb[9].mxu1 }
 0x4bc   : > { %v2591_v61 = vpop.f32.mrb[10].mxu1 }
 0x4bd   : > { %v2598_v0 = vpack.c.bf16 %v2589_v63, %v2589_v63  ;;  %v3170_v24 = vpop.f32.mrb[11].mxu1 }
 0x4bf   : > { %3176 = vmatmul.mubr.msk.bf16.vlgmr.msra.gmra.mrb[12].mxu1 %vm2612_vm6, %v2598_v0 }
 0x592   : > { %v2650_v1 = vpop.f32.mrb[12].mxu1 }
 0x593   : > { %v2651_v25 = vadd.f32 %v2650_v1, %v2599_v18  ;;  %v3177_v2 = vpop.f32.mrb[13].mxu1 }
 0x594   : > { %v2653_v3 = vpop.f32.mrb[14].mxu1 }
 0x595   : > { %v3178_v4 = vpop.f32.mrb[15].mxu1  ;;  %2657 = vst.msk [vmem:[%s378_s13] sm:$0x1] %vm2656_vm7, %v2651_v25 }
 0x596   : > { %3401 = shalt.err (!%p3398_p3)
}
 0x597   : > { %s3402_s25 = scalar_lea.hbm %s4028_s22, 16  ;;  %s3406_s16 = scalar_lea.hbm %s4081_s11, 32 }
 0x598   : > { %p3403_p4 = scmp.ne.s32.totalorder %s4028_s22, %s3402_s25  ;;  %p3407_p9 = scmp.lt.u32.totalorder %s4028_s22, %s4081_s11 }
 0x599   : > { %p3408_p10 = scmp.lt.u32.totalorder %s3406_s16, %s3402_s25  ;;  %p3410_p12 = scmp.lt.u32.totalorder %s3402_s25, %s4028_s22 }
 0x59a   : > { %p3404_p7 = pnand %p3403_p4, %p3554_p5 }
 0x59b   : > { %p3409_p11 = por %p3408_p10, %p3407_p9 }
 0x59c   : > { %p3405_p8 = pneg %p3404_p7 }
 0x59d   : > { %p3411_p13 = por %p3410_p12, %p3409_p11 }
 0x59f   : > { %p3412_p0 = pnand %p3411_p13, %p3405_p8 }
 0x5a1   : > { %3415 = shalt.err (!%p3412_p0)
}
 0x5a2   : > { %3323 = dma.vmem_to_hbm [thread:$0]  (%p3554_p5), %s4030_s14, 16, %s4028_s22, %s2659_s21  }
 0x5a3 PF: > { %p3329_p1 = scmp.ge.s32.totalorder %s3450_s20, 2  ;;  %s2683_s24 = sand.u32 1, %s3438_s17  }
 0x5a4   : > { %s2684_s15 = scalar_lea.sflag [#allocation4], %s2683_s24 }
 0x5a5   : > { %p3326_p2 = pnand %p3329_p1, %p3558_p6 }
 0x5a7   : > { %3433 = dma.done.wait (!%p3326_p2), %s2684_s15, 16  }
 0x5a8   : > { %3435 = vsyncadd (!%p3326_p2), %s2684_s15, 4294967280  ;;  %p21_p3 = scmp.ge.s32.totalorder %s3541_s23, 4   ;;  %s4084_s17 = smov %s3442_s18 }
 0x5a9   : > { %s4085_s18 = smov %s3446_s19  ;;  %s4086_s19 = smov %s3552_s26 }
 0x5aa   : > { %s4087_s20 = smov %s3541_s23  ;;  %23 = sbr.rel (!%p21_p3) target bundleno = 3 (0x3), region = 117 }
 0x5b1   :  { %2688 = vsyncpa [#allocation4], 1 }
 0x5b2   :  { %2690 = vsyncpa [#allocation4 + $0x1], 1 }

// kernel: vision_language_model.3
= control target key start
LH: loop header
LB: loop body
LE: loop exit
PB: predicated region body
PF: predicated region fallthrough
CT: control target
= control target key end

     0   :  { %s3825_s0 = inlined_call_operand.vmem [shape: f32[2,8,32], index: 0, kind: input, shape index: {}]   ;;  %s3826_s1 = inlined_call_operand.vmem [shape: f32[2,8,8], index: 1, kind: input, shape index: {}]   ;;  %s3827_s2 = inlined_call_operand.vmem [shape: f32[2,1,32], index: 2, kind: input, shape index: {}]   ;;  %s3828_s3 = inlined_call_operand.vmem [shape: f32[2,1,32], index: 3, kind: input, shape index: {}]   ;;  %s3829_s4 = inlined_call_operand.vmem [shape: bf16[2,32,96], index: 4, kind: input, shape index: {}]   ;;  %s3830_s5 = inlined_call_operand.vmem [shape: f32[2,1,96], index: 5, kind: input, shape index: {}]   ;;  %s3831_s6 = inlined_call_operand.vmem [shape: bf16[2,32,32], index: 6, kind: input, shape index: {}]   ;;  %s3832_s7 = inlined_call_operand.vmem [shape: f32[2,1,32], index: 7, kind: input, shape index: {}]   ;;  %s3833_s8 = inlined_call_operand.vmem [shape: f32[2,1,32], index: 8, kind: input, shape index: {}]   ;;  %s3834_s9 = inlined_call_operand.vmem [shape: f32[2,1,32], index: 9, kind: input, shape index: {}]   ;;  %s3835_s10 = inlined_call_operand.vmem [shape: bf16[2,32,128], index: 10, kind: input, shape index: {}]   ;;  %s3836_s11 = inlined_call_operand.vmem [shape: f32[2,1,128], index: 11, kind: input, shape index: {}]   ;;  %s3837_s12 = inlined_call_operand.vmem [shape: bf16[2,128,32], index: 12, kind: input, shape index: {}]   ;;  %s3838_s13 = inlined_call_operand.vmem [shape: f32[2,1,32], index: 13, kind: input, shape index: {}]   ;;  %s3839_s14 = inlined_call_operand.vmem [shape: f32[1,32], index: 14, kind: input, shape index: {}]   ;;  %s3840_s15 = inlined_call_operand.vmem [shape: f32[1,32], index: 15, kind: input, shape index: {}]   ;;  %s3841_s16 = inlined_call_operand.vmem [shape: bf16[32,128], index: 16, kind: input, shape index: {}]   ;;  %s3842_s17 = inlined_call_operand.vmem [shape: s32[2,8,1], index: 17, kind: input, shape index: {}]   ;;  %s3843_s18 = inlined_call_operand.hbm [shape: f32[2,8,128], index: 18, kind: output, shape index: {0}]   ;;  %s3844_s19 = inlined_call_operand.vmem [shape: f32[2,1,1], index: 19, kind: output, shape index: {1}]  }
   0x1   :  { %3867 = sst [smem:[#allocation11_spill]] %s3825_s0 }
   0x2   :  { %3868 = sst [smem:[#allocation12_spill]] %s3826_s1 }
   0x3   :  { %3869 = sst [smem:[#allocation13_spill]] %s3827_s2 }
   0x4   :  { %3870 = sst [smem:[#allocation14_spill]] %s3828_s3 }
   0x5   :  { %3871 = sst [smem:[#allocation15_spill]] %s3829_s4 }
   0x6   :  { %3872 = sst [smem:[#allocation16_spill]] %s3830_s5 }
   0x7   :  { %3873 = sst [smem:[#allocation17_spill]] %s3831_s6 }
   0x8   :  { %25 = vsyncpa [#allocation3], 0 }
   0x9   :  { %27 = vsyncpa [#allocation3 + $0x1], 0  ;;  %s3308_s0 = smov 0   ;;  %s3310_s30 = smov 0  }
   0xa   :  { %s3312_s20 = smov 0   ;;  %s3314_s21 = smov 0  }
   0xb LB: > { %3874 = sst [smem:[#allocation5_spill]] %s3176_s0  ;;  %s3329_s1 = sadd.s32 4294967295, %s3188_s21   ;;  %s3188_s21 = sphi %s3314_s21, %s3906_s21   ;;  %s3184_s20 = sphi %s3312_s20, %s3908_s20   ;;  %s3180_s30 = sphi %s3310_s30, %s3910_s30   ;;  %s3176_s0 = sphi %s3308_s0, %s3909_s0  }
   0xc   : > { %3875 = sst [smem:[#allocation6_spill]] %s3184_s20  ;;  %s2605_s22 = sadd.s32 4294967294, %s3188_s21  }
   0xd   : > { %3876 = sst [smem:[#allocation7_spill]] %s3188_s21  ;;  %s3333_s2 = sadd.s32 1, %s3188_s21  }
   0xe   : > { %3877 = sst [smem:[#allocation8_spill]] %s3333_s2  ;;  %s433_s23 = sadd.s32 1, %s3184_s20 }
   0xf   : > { %s430_s24 = ssub.s32 %s3188_s21, %s3333_s2  ;;  %p443_p0 = scmp.ne.s32.totalorder %s3184_s20, %s3180_s30 }
  0x10   : > { %p431_p1 = scmp.eq.s32.totalorder %s430_s24, 0  ;;  %p444_p2 = scmp.eq.s32.totalorder %s3329_s1, 1 }
  0x11   : > { %p449_p3 = scmp.ne.s32.totalorder %s3180_s30, %s3176_s0  ;;  %p450_p4 = scmp.eq.s32.totalorder %s2605_s22, 1 }
  0x12   : > { %s3344_s25 = scalar_select %p431_p1, %s3184_s20, %s433_s23  }
  0x13   : > { %p3346_p5 = por %p444_p2, %p443_p0  ;;  %p3350_p6 = por %p450_p4, %p449_p3 }
  0x14   : > { %3878 = sst [smem:[#allocation9_spill]] %s3344_s25  ;;  %p2608_p7 = scmp.ge.s32.totalorder %s3188_s21, 1 }
  0x15   : > { %s3880_s26 = scalar_select %p3350_p6, 1, 0 }
  0x16   : > { %p560_p8 = scmp.lt.s32.totalorder %s3188_s21, 3 }
  0x17   : > { %3881 = sst [smem:[#allocation10_spill]] %s3880_s26 }
  0x18   : > { %p561_p9 = pnand %p2608_p7, %p560_p8 }
  0x19   : > { %p626_p10 = scmp.lt.s32.totalorder (!%p561_p9), %s3329_s1, 1  ;;  %vm646_vm0 = vcmask (!%p561_p9), 261120   ;;  %s3882_s23 = sld [smem:[#allocation11_spill]] (!%p561_p9)  ;;  %v3190_v8 = vmov (!%p561_p9), 0.0   ;;  %vm3191_vm1 = vmmov (!%p561_p9), 0   ;;  %vm746_vm2 = vcmask (!%p561_p9), 64512  }
  0x1a   : > { %564 = sbr.rel (%p561_p9) target bundleno = 6560 (0x19a0), region = 92  ;;  %s3883_s4 = sld [smem:[#allocation15_spill]] (!%p561_p9)  ;;  %2796 = vmatprep.subr.bf16.mxu1 (!%p561_p9), %v3190_v8  ;;  %2800 = vmatprep.mubr.msk.bf16.mxu1 (!%p561_p9), %vm3191_vm1, %v3190_v8  ;;  %vm812_vm3 = vcmask (!%p561_p9), 1043456   ;;  %vm1205_vm4 = vcmask (!%p561_p9), 130048   ;;  %vm1207_vm5 = vcmask (!%p561_p9), 195584  }
  0x1b   : > { %2810 = vmatprep.subr.bf16.mxu0 (!%p561_p9), %v3190_v8  ;;  %2812 = vmatprep.mubr.msk.bf16.mxu0 (!%p561_p9), %vm3191_vm1, %v3190_v8  ;;  %s3885_s22 = sld [smem:[#allocation14_spill]] (!%p561_p9)  ;;  %s3886_s5 = sld [smem:[#allocation16_spill]] (!%p561_p9) }
  0x1c   : > { %s3851_s20 = smov (!%p561_p9), 120   ;;  %s3861_s25 = smov (!%p561_p9), 96  }
  0x1d   : > { %s3853_s2 = smov (!%p561_p9), 80   ;;  %s3855_s26 = smov (!%p561_p9), 112  }
  0x1e   : > { %s3852_s29 = smov (!%p561_p9), 72   ;;  %s3888_s6 = sld [smem:[#allocation17_spill]] (!%p561_p9) }
  0x1f   : > { %s3890_s0 = smov (!%p561_p9), 88   ;;  %s3891_s21 = smov (!%p561_p9), 120  }
  0x20   : > { %v3046_v7 = vld [vmem:[%s3883_s4] sm:$0xff] (!%p561_p9)   ;;  %v3047_v9 = vld [vmem:[%s3883_s4 + $0x8] sm:$0xff] (!%p561_p9)  }
  0x21   : > { %s3358_s27 = scalar_select %p626_p10, %s3329_s1, 1  ;;  %2797 = vmatpush3.bf16.msra.mxu1 %v3046_v7  ;;  %v2614_v16 = vld [vmem:[%s3885_s22] ss:$0 sm:$0xff] }
  0x22   : > { %2798 = vmatprep.subr.bf16.mxu1 %v3190_v8  ;;  %v2615_v20 = vld [vmem:[%s3886_s5] ss:$0 sm:$0xff] }
  0x23   : > { %s3361_s28 = sshll.u32 %s3358_s27, 3 }
  0x24   : > { %s629_s24 = scalar_lea.vmem %s3882_s23, %s3361_s28  ;;  %s3884_s23 = sld [smem:[#allocation13_spill]] }
  0x25   : > { %v3367_v0 = vld [vmem:[%s629_s24] sm:$0xff]  ;;  %2799 = vmatpush3.bf16.msra.mxu1 %v3047_v9  ;;  %s3860_s24 = smov 88  }
  0x26   : > { %v647_v1 = vsel %vm646_vm0, %v3367_v0, 0.0  ;;  %2804 = vmatprep.subr.bf16.mxu1 %v3190_v8 }
  0x27   : > { %648 = vadd.xlane.f32.xlu0 %v647_v1 }
  0x2a   : > { %v2613_v14 = vld [vmem:[%s3884_s23] ss:$0 sm:$0xff] }
  0xb4   : > { %v649_v2 = vpop.xlane.xlu0 %648 }
  0xb5   : > { %v651_v3 = vmul.f32 0.03125, %v649_v2 }
  0xb7   : > { %v652_v4 = vsub.f32 %v3367_v0, %v651_v3 }
  0xb9   : > { %v653_v5 = vmul.f32 %v652_v4, %v652_v4 }
  0xbb   : > { %v654_v6 = vsel %vm646_vm0, %v653_v5, 0.0 }
  0xbc   : > { %655 = vadd.xlane.f32.xlu0 %v654_v6 }
 0x149   : > { %v656_v10 = vpop.xlane.xlu0 %655 }
 0x14a   : > { %v657_v11 = vmul.f32 0.03125, %v656_v10 }
 0x14c   : > { %v658_v12 = vadd.f32 1e-05, %v657_v11 }
 0x14e   : > { %3076 = vrsqrt.f32 %v658_v12 }
 0x158   : > { %v3077_v13 = vpop.eup %3076 }
 0x159   : > { %v660_v15 = vmul.f32 %v3077_v13, %v652_v4 }
 0x15b   : > { %v667_v17 = vmul.f32 %v2613_v14, %v660_v15 }
 0x15d   : > { %v674_v18 = vadd.f32 %v2614_v16, %v667_v17 }
 0x15f   : > { %v679_v19 = vpack.c.bf16 %v674_v18, %v674_v18 }
 0x161   : > { %2801 = vmatmul.mubr.msk.bf16.vlgmr.msra.gmra.mrb[0].mxu1 %vm646_vm0, %v679_v19 }
 0x162   : > { %2806 = vmatprep.mubr.msk.bf16.mxu1 %vm3191_vm1, %v3190_v8 }
 0x234   : > { %v736_v21 = vpop.f32.mrb[0].mxu1 }
 0x235   : > { %v737_v22 = vadd.f32 %v2615_v20, %v736_v21  ;;  %v2802_v23 = vpop.f32.mrb[1].mxu1 }
 0x236   : > { %v739_v24 = vpop.f32.mrb[2].mxu1 }
 0x237   : > { %v3399_v25 = vpack.c.bf16 %v737_v22, %v737_v22  ;;  %v2803_v26 = vpop.f32.mrb[3].mxu1 }
 0x239   : > { %856 = vrot.lane.b32.xlu0 %v3399_v25, %s3851_s20  ;;  %744 = vrot.lane.b32.xlu1 %v3399_v25, %s3861_s25  ;;  %s3854_s20 = smov 104   ;;  %s3863_s25 = smov 16  }
 0x23d   : > { %858 = vrot.lane.b32.xlu1 %v3399_v25, %s3860_s24  ;;  %s3889_s24 = smov 96  }
 0x241   : > { %970 = vrot.lane.b32.xlu1 %v3399_v25, %s3853_s2  ;;  %s3857_s2 = smov 56  }
 0x245   : > { %968 = vrot.lane.b32.xlu1 %v3399_v25, %s3855_s26 }
 0x249   : > { %1082 = vrot.lane.b32.xlu1 %v3399_v25, %s3852_s29  ;;  %s3856_s29 = smov 40  }
 0x24d   : > { %1080 = vrot.lane.b32.xlu1 %v3399_v25, %s3854_s20  ;;  %s3887_s20 = sld [smem:[#allocation12_spill]] }
 0x253   : > { %s633_s26 = scalar_lea.vmem %s3887_s20, %s3361_s28  ;;  %s3859_s20 = smov 64  }
 0x254   : > { %v3440_v38 = vld [vmem:[%s633_s26] sm:$0xff]  ;;  %s3858_s26 = smov 48  }
 0x2ab   : > { %v745_v27 = vpop.permute.xlu1 %744  ;;  %v857_v32 = vpop.permute.xlu0 %856 }
 0x2ac   : > { %v751_v28 = vsel %vm746_vm2, %v745_v27, 0 }
 0x2ad   : > { %2805 = vmatpush3.bf16.xpose.msra.mxu1 %v751_v28 }
 0x2ae   : > { %2816 = vmatprep.subr.bf16.mxu1 %v3190_v8 }
 0x2af   : > { %v859_v29 = vpop.permute.xlu1 %858 }
 0x2b0   : > { %v864_v30 = vsel %vm746_vm2, %v859_v29, 0 }
 0x2b3   : > { %v971_v31 = vpop.permute.xlu1 %970 }
 0x2b4   : > { %2807 = vmatmul.mubr.msk.bf16.vlgmr.msra.gmra.mrb[4].mxu1 %vm746_vm2, %v3399_v25  ;;  %v976_v34 = vsel %vm746_vm2, %v971_v31, 0 }
 0x2b5   : > { %2817 = vmatpush3.bf16.xpose.msra.mxu1 %v864_v30  ;;  %2818 = vmatprep.mubr.msk.bf16.mxu1 %vm3191_vm1, %v3190_v8 }
 0x2b6   : > { %2828 = vmatprep.subr.bf16.mxu1 %v3190_v8 }
 0x2b7   : > { %v969_v33 = vpop.permute.xlu1 %968 }
 0x2bb   : > { %v1083_v35 = vpop.permute.xlu1 %1082 }
 0x2bc   : > { %2819 = vmatmul.mubr.msk.bf16.vlgmr.msra.gmra.mrb[8].mxu1 %vm746_vm2, %v857_v32  ;;  %v1088_v36 = vsel %vm746_vm2, %v1083_v35, 0 }
 0x2bd   : > { %2829 = vmatpush3.bf16.xpose.msra.mxu1 %v976_v34  ;;  %2830 = vmatprep.mubr.msk.bf16.mxu1 %vm3191_vm1, %v3190_v8 }
 0x2be   : > { %2840 = vmatprep.subr.bf16.mxu1 %v3190_v8 }
 0x2bf   : > { %v1081_v37 = vpop.permute.xlu1 %1080 }
 0x2c4   : > { %2831 = vmatmul.mubr.msk.bf16.vlgmr.msra.gmra.mrb[12].mxu1 %vm746_vm2, %v969_v33 }
 0x2c5   : > { %2841 = vmatpush3.bf16.xpose.msra.mxu1 %v1088_v36  ;;  %2842 = vmatprep.mubr.msk.bf16.mxu1 %vm3191_vm1, %v3190_v8 }
 0x2c6   : > { %2852 = vmatprep.subr.bf16.mxu1 %v3190_v8 }
 0x2cc   : > { %2843 = vmatmul.mubr.msk.bf16.vlgmr.msra.gmra.mrb[16].mxu1 %vm746_vm2, %v1081_v37 }
 0x2cd   : > { %2856 = vmatprep.mubr.msk.bf16.mxu1 %vm3191_vm1, %v3190_v8 }
 0x387   : > { %v787_v39 = vpop.f32.mrb[4].mxu1 }
 0x388   : > { %v793_v40 = vmul.f32 0.35355338, %v787_v39  ;;  %v2808_v41 = vpop.f32.mrb[5].mxu1 }
 0x389   : > { %v790_v42 = vpop.f32.mrb[6].mxu1 }
 0x38a   : > { %v2809_v43 = vpop.f32.mrb[7].mxu1  ;;  %v794_v44 = vadd.f32 %v793_v40, %v3440_v38 }
 0x38c   : > { %v795_v45 = vsel %vm746_vm2, %v794_v44, -inf }
 0x38d   : > { %796 = vmax.xlane.f32.xlu1 %v795_v45 }
 0x38f   : > { %v900_v46 = vpop.f32.mrb[8].mxu1 }
 0x390   : > { %v906_v47 = vmul.f32 0.35355338, %v900_v46  ;;  %v2820_v48 = vpop.f32.mrb[9].mxu1 }
 0x391   : > { %v903_v49 = vpop.f32.mrb[10].mxu1 }
 0x392   : > { %v2821_v50 = vpop.f32.mrb[11].mxu1  ;;  %v907_v51 = vadd.f32 %v906_v47, %v3440_v38 }
 0x394   : > { %v908_v52 = vsel %vm746_vm2, %v907_v51, -inf }
 0x395   : > { %909 = vmax.xlane.f32.xlu0 %v908_v52 }
 0x397   : > { %v1012_v53 = vpop.f32.mrb[12].mxu1 }
 0x398   : > { %v1018_v54 = vmul.f32 0.35355338, %v1012_v53  ;;  %v2832_v55 = vpop.f32.mrb[13].mxu1 }
 0x399   : > { %v1015_v56 = vpop.f32.mrb[14].mxu1 }
 0x39a   : > { %v2833_v57 = vpop.f32.mrb[15].mxu1  ;;  %v1019_v58 = vadd.f32 %v1018_v54, %v3440_v38 }
 0x39c   : > { %v1020_v59 = vsel %vm746_vm2, %v1019_v58, -inf }
 0x39d   : > { %1021 = vmax.xlane.f32.xlu1 %v1020_v59  ;;  %v3049_v59 = vld [vmem:[%s3888_s6 + $0x8] sm:$0xff]  }
 0x39f   : > { %v1124_v60 = vpop.f32.mrb[16].mxu1 }
 0x3a0   : > { %v1130_v61 = vmul.f32 0.35355338, %v1124_v60  ;;  %v2844_v62 = vpop.f32.mrb[17].mxu1 }
 0x3a1   : > { %v1127_v63 = vpop.f32.mrb[18].mxu1 }
 0x3a2   : > { %v2845_v1 = vpop.f32.mrb[19].mxu1  ;;  %v1131_v2 = vadd.f32 %v1130_v61, %v3440_v38 }
 0x3a4   : > { %v1132_v3 = vsel %vm746_vm2, %v1131_v2, -inf }
 0x3a5   : > { %1133 = vmax.xlane.f32.xlu0 %v1132_v3 }
 0x41a   : > { %v797_v4 = vpop.xlane.xlu1 %796 }
 0x41b   : > { %v798_v5 = vsub.f32 %v794_v44, %v797_v4 }
 0x41d   : > { %v799_v6 = vmul.f32 1.442695, %v798_v5 }
 0x41f   : > { %3078 = vpow2.f32 %v799_v6 }
 0x422   : > { %v910_v7 = vpop.xlane.xlu0 %909 }
 0x423   : > { %v911_v9 = vsub.f32 %v907_v51, %v910_v7 }
 0x425   : > { %v912_v10 = vmul.f32 1.442695, %v911_v9 }
 0x427   : > { %3080 = vpow2.f32 %v912_v10 }
 0x429   : > { %v3079_v11 = vpop.eup %3078 }
 0x42a   : > { %v801_v12 = vsel %vm746_vm2, %v3079_v11, 0.0  ;;  %v1022_v20 = vpop.xlane.xlu1 %1021 }
 0x42b   : > { %802 = vadd.xlane.f32.xlu1 %v801_v12  ;;  %v1023_v21 = vsub.f32 %v1019_v58, %v1022_v20  ;;  %v3048_v58 = vld [vmem:[%s3888_s6] sm:$0xff]  }
 0x42c   : > { %2853 = vmatpush3.bf16.msra.mxu1 %v3048_v58 }
 0x42d   : > { %v1024_v22 = vmul.f32 1.442695, %v1023_v21  ;;  %2854 = vmatprep.subr.bf16.mxu1 %v3190_v8 }
 0x430   : > { %2855 = vmatpush3.bf16.msra.mxu1 %v3049_v59 }
 0x431   : > { %v3081_v13 = vpop.eup %3080  ;;  %2868 = vmatprep.subr.bf16.mxu1 %v3190_v8 }
 0x432   : > { %v1134_v14 = vpop.xlane.xlu0 %1133  ;;  %v914_v15 = vsel %vm746_vm2, %v3081_v13, 0.0 }
 0x433   : > { %v1135_v16 = vsub.f32 %v1131_v2, %v1134_v14  ;;  %915 = vadd.xlane.f32.xlu0 %v914_v15  ;;  %v2630_v14 = vld [vmem:[%s3832_s7] ss:$0 sm:$0xff] }
 0x435   : > { %v1136_v17 = vmul.f32 1.442695, %v1135_v16 }
 0x437   : > { %3082 = vpow2.f32 %v1136_v17 }
 0x438   : > { %3084 = vpow2.f32 %v1024_v22 }
 0x43c   : > { %807 = vrot.lane.b32.xlu1 %v3399_v25, %s3859_s20  ;;  %s3892_s20 = smov 112  }
 0x441   : > { %v3083_v18 = vpop.eup %3082 }
 0x442   : > { %v1138_v19 = vsel %vm746_vm2, %v3083_v18, 0.0  ;;  %v3085_v23 = vpop.eup %3084 }
 0x443   : > { %1139 = vadd.xlane.f32.xlu0 %v1138_v19  ;;  %v1026_v24 = vsel %vm746_vm2, %v3085_v23, 0.0 }
 0x459   : > { %920 = vrot.lane.b32.xlu0 %v3399_v25, %s3857_s2  ;;  %s3862_s2 = smov 24  }
 0x460   : > { %1027 = vadd.xlane.f32.xlu1 %v1026_v24 }
 0x471   : > { %1032 = vrot.lane.b32.xlu1 %v3399_v25, %s3858_s26  ;;  %s3895_s26 = smov 80  }
 0x475   : > { %1144 = vrot.lane.b32.xlu1 %v3399_v25, %s3856_s29  ;;  %s3864_s29 = smov 8  }
 0x4b8   : > { %v803_v26 = vpop.xlane.xlu1 %802 }
 0x4b9   : > { %3086 = vrcp.f32 %v803_v26 }
 0x4bc   : > { %v808_v27 = vpop.permute.xlu1 %807 }
 0x4bd   : > { %v814_v28 = vsel %vm812_vm3, %v808_v27, 0  ;;  %v3051_v27 = vld [vmem:[%s3835_s10 + $0x8] sm:$0xff]  }
 0x4be   : > { %2811 = vmatpush3.bf16.msra.mxu0 %v814_v28  ;;  %v3052_v28 = vld [vmem:[%s3837_s12] sm:$0xff]  }
 0x4bf   : > { %2822 = vmatprep.subr.bf16.mxu0 %v3190_v8 }
 0x4c0   : > { %v916_v30 = vpop.xlane.xlu0 %915 }
 0x4c1   : > { %3088 = vrcp.f32 %v916_v30 }
 0x4c3   : > { %v3087_v29 = vpop.eup %3086 }
 0x4c4   : > { %v805_v31 = vmul.f32 %v3087_v29, %v3079_v11 }
 0x4c6   : > { %v806_v32 = vpack.c.bf16 %v805_v31, %v805_v31 }
 0x4c8   : > { %2813 = vmatmul.mubr.msk.bf16.vlgmr.msra.gmra.mrb[0].mxu0 %vm746_vm2, %v806_v32 }
 0x4c9   : > { %2824 = vmatprep.mubr.msk.bf16.mxu0 %vm3191_vm1, %v3190_v8 }
 0x4cb   : > { %v3089_v25 = vpop.eup %3088 }
 0x4cc   : > { %v918_v34 = vmul.f32 %v3089_v25, %v3081_v13  ;;  %v2631_v25 = vld [vmem:[%s3833_s8] ss:$0 sm:$0xff] }
 0x4ce   : > { %v919_v37 = vpack.c.bf16 %v918_v34, %v918_v34  ;;  %v2632_v34 = vld [vmem:[%s3834_s9] ss:$0 sm:$0xff] }
 0x4d0   : > { %v1140_v33 = vpop.xlane.xlu0 %1139 }
 0x4d4   : > { %v921_v35 = vpop.permute.xlu0 %920 }
 0x4d5   : > { %v926_v36 = vsel %vm812_vm3, %v921_v35, 0 }
 0x4d6   : > { %2823 = vmatpush3.bf16.msra.mxu0 %v926_v36 }
 0x4d7   : > { %2834 = vmatprep.subr.bf16.mxu0 %v3190_v8 }
 0x4d9   : > { %2825 = vmatmul.mubr.msk.bf16.vlgmr.msra.gmra.mrb[4].mxu0 %vm746_vm2, %v919_v37 }
 0x4da   : > { %2836 = vmatprep.mubr.msk.bf16.mxu0 %vm3191_vm1, %v3190_v8 }
 0x4ed   : > { %v1028_v39 = vpop.xlane.xlu1 %1027 }
 0x4ee   : > { %3090 = vrcp.f32 %v1028_v39  ;;  %v3053_v39 = vld [vmem:[%s3837_s12 + $0x8] sm:$0xff]  }
 0x4ef   : > { %3092 = vrcp.f32 %v1140_v33 }
 0x4f1   : > { %v1033_v40 = vpop.permute.xlu1 %1032 }
 0x4f2   : > { %v1038_v41 = vsel %vm812_vm3, %v1033_v40, 0  ;;  %v3054_v40 = vld [vmem:[%s3837_s12 + $0x10] sm:$0xff]  }
 0x4f3   : > { %2835 = vmatpush3.bf16.msra.mxu0 %v1038_v41  ;;  %v3055_v41 = vld [vmem:[%s3837_s12 + $0x18] sm:$0xff]  }
 0x4f4   : > { %2846 = vmatprep.subr.bf16.mxu0 %v3190_v8 }
 0x4f5   : > { %v1145_v44 = vpop.permute.xlu1 %1144 }
 0x4f6   : > { %v1150_v47 = vsel %vm812_vm3, %v1145_v44, 0  ;;  %v3058_v44 = vld [vmem:[%s3837_s12 + $0x30] sm:$0xff]  }
 0x4f8   : > { %v3091_v42 = vpop.eup %3090 }
 0x4f9   : > { %v1030_v43 = vmul.f32 %v3091_v42, %v3085_v23  ;;  %v3093_v46 = vpop.eup %3092  ;;  %v3056_v42 = vld [vmem:[%s3837_s12 + $0x20] sm:$0xff]  }
 0x4fa   : > { %v1142_v48 = vmul.f32 %v3093_v46, %v3083_v18  ;;  %v2633_v46 = vld [vmem:[%s3836_s11] ss:$0 sm:$0xff] }
 0x4fb   : > { %v1031_v45 = vpack.c.bf16 %v1030_v43, %v1030_v43  ;;  %v3057_v43 = vld [vmem:[%s3837_s12 + $0x28] sm:$0xff]  }
 0x4fc   : > { %v1143_v49 = vpack.c.bf16 %v1142_v48, %v1142_v48 }
 0x4fd   : > { %2837 = vmatmul.mubr.msk.bf16.vlgmr.msra.gmra.mrb[8].mxu0 %vm746_vm2, %v1031_v45  ;;  %v3059_v45 = vld [vmem:[%s3837_s12 + $0x38] sm:$0xff]  }
 0x4fe   : > { %2847 = vmatpush3.bf16.msra.mxu0 %v1150_v47  ;;  %2848 = vmatprep.mubr.msk.bf16.mxu0 %vm3191_vm1, %v3190_v8 }
 0x4ff   : > { %2860 = vmatprep.subr.bf16.mxu0 %v3190_v8 }
 0x505   : > { %2849 = vmatmul.mubr.msk.bf16.vlgmr.msra.gmra.mrb[12].mxu0 %vm746_vm2, %v1143_v49 }
 0x506   : > { %2864 = vmatprep.mubr.msk.bf16.mxu0 %vm3191_vm1, %v3190_v8 }
 0x59b   : > { %v850_v50 = vpop.f32.mrb[0].mxu0 }
 0x59c   : > { %v2814_v51 = vpop.f32.mrb[1].mxu0 }
 0x59d   : > { %v853_v52 = vpop.f32.mrb[2].mxu0 }
 0x59e   : > { %v2815_v53 = vpop.f32.mrb[3].mxu0 }
 0x5ac   : > { %v962_v54 = vpop.f32.mrb[4].mxu0 }
 0x5ad   : > { %1193 = vrot.lane.b32.xlu0 %v962_v54, %s3864_s29  ;;  %v2826_v55 = vpop.f32.mrb[5].mxu0  ;;  %s3894_s29 = smov 64  }
 0x5ae   : > { %v965_v56 = vpop.f32.mrb[6].mxu0 }
 0x5af   : > { %v2827_v57 = vpop.f32.mrb[7].mxu0 }
 0x5d0   : > { %v1074_v60 = vpop.f32.mrb[8].mxu0 }
 0x5d1   : > { %1197 = vrot.lane.b32.xlu1 %v1074_v60, %s3863_s25  ;;  %v2838_v61 = vpop.f32.mrb[9].mxu0  ;;  %s3893_s25 = smov 104  }
 0x5d2   : > { %v1077_v62 = vpop.f32.mrb[10].mxu0 }
 0x5d3   : > { %v2839_v63 = vpop.f32.mrb[11].mxu0 }
 0x5d4   : > { %v2645_v63 = vld [vmem:[%s3838_s13] ss:$0 sm:$0xff] }
 0x5d8   : > { %v1186_v1 = vpop.f32.mrb[12].mxu0 }
 0x5d9   : > { %1201 = vrot.lane.b32.xlu0 %v1186_v1, %s3862_s2  ;;  %v2850_v2 = vpop.f32.mrb[13].mxu0  ;;  %s3896_s2 = smov 72  }
 0x5da   : > { %v1189_v3 = vpop.f32.mrb[14].mxu0 }
 0x5db   : > { %v2851_v4 = vpop.f32.mrb[15].mxu0 }
 0x61f   : > { %v1194_v5 = vpop.permute.xlu0 %1193 }
 0x620   : > { %v1204_v7 = vsel %vm746_vm2, %v850_v50, %v1194_v5 }
 0x643   : > { %v1198_v6 = vpop.permute.xlu1 %1197 }
 0x644   : > { %v1206_v9 = vsel %vm1205_vm4, %v1204_v7, %v1198_v6 }
 0x64b   : > { %v1202_v10 = vpop.permute.xlu0 %1201 }
 0x64c   : > { %v1208_v11 = vsel %vm1207_vm5, %v1206_v9, %v1202_v10 }
 0x64d   : > { %v1213_v12 = vpack.c.bf16 %v1208_v11, %v1208_v11 }
 0x64f   : > { %2857 = vmatmul.mubr.msk.bf16.vlgmr.msra.gmra.mrb[20].mxu1 %vm646_vm0, %v1213_v12 }
 0x650   : > { %2884 = vmatprep.mubr.msk.bf16.mxu1 %vm3191_vm1, %v3190_v8  ;;  %2869 = vmatpush3.bf16.msra.mxu1 %v3052_v28 }
 0x651   : > { %2870 = vmatprep.subr.bf16.mxu1 %v3190_v8 }
 0x654   : > { %2871 = vmatpush3.bf16.msra.mxu1 %v3053_v39 }
 0x655   : > { %2872 = vmatprep.subr.bf16.mxu1 %v3190_v8 }
 0x658   : > { %2873 = vmatpush3.bf16.msra.mxu1 %v3054_v40 }
 0x659   : > { %2874 = vmatprep.subr.bf16.mxu1 %v3190_v8 }
 0x65c   : > { %2875 = vmatpush3.bf16.msra.mxu1 %v3055_v41 }
 0x65d   : > { %2876 = vmatprep.subr.bf16.mxu1 %v3190_v8 }
 0x660   : > { %2877 = vmatpush3.bf16.msra.mxu1 %v3056_v42 }
 0x661   : > { %2878 = vmatprep.subr.bf16.mxu1 %v3190_v8 }
 0x664   : > { %2879 = vmatpush3.bf16.msra.mxu1 %v3057_v43 }
 0x665   : > { %2880 = vmatprep.subr.bf16.mxu1 %v3190_v8 }
 0x668   : > { %2881 = vmatpush3.bf16.msra.mxu1 %v3058_v44 }
 0x669   : > { %2882 = vmatprep.subr.bf16.mxu1 %v3190_v8 }
 0x66c   : > { %2883 = vmatpush3.bf16.msra.mxu1 %v3059_v45 }
 0x66d   : > { %2914 = vmatprep.subr.bf16.mxu1 %v3190_v8 }
 0x722   : > { %v1263_v13 = vpop.f32.mrb[20].mxu1 }
 0x723   : > { %v1269_v15 = vadd.f32 %v1263_v13, %v3367_v0  ;;  %v2858_v16 = vpop.f32.mrb[21].mxu1  ;;  %v3050_v0 = vld [vmem:[%s3835_s10] sm:$0xff]   ;;  %v3060_v13 = vld [vmem:[%s3883_s4 + $0x10] sm:$0xff]  }
 0x724   : > { %v1266_v17 = vpop.f32.mrb[22].mxu1  ;;  %2861 = vmatpush3.bf16.msra.mxu0 %v3050_v0 }
 0x725   : > { %v3503_v18 = vadd.f32 %v2630_v14, %v1269_v15  ;;  %v2859_v19 = vpop.f32.mrb[23].mxu1  ;;  %2862 = vmatprep.subr.bf16.mxu0 %v3190_v8  ;;  %v3061_v14 = vld [vmem:[%s3883_s4 + $0x18] sm:$0xff]   ;;  %s3207_s4 = smov [#allocation2]  }
 0x726   : > { %v2648_v19 = vld [vmem:[%s3884_s23 + $0x1] ss:$0 sm:$0xff] }
 0x727   : > { %v1280_v20 = vsel %vm646_vm0, %v3503_v18, 0.0 }
 0x728   : > { %1281 = vadd.xlane.f32.xlu1 %v1280_v20  ;;  %2863 = vmatpush3.bf16.msra.mxu0 %v3051_v27 }
 0x729   : > { %2888 = vmatprep.subr.bf16.mxu0 %v3190_v8 }
 0x7b5   : > { %v1282_v21 = vpop.xlane.xlu1 %1281 }
 0x7b6   : > { %v1283_v22 = vmul.f32 0.03125, %v1282_v21  ;;  %v2649_v21 = vld [vmem:[%s3885_s22 + $0x1] ss:$0 sm:$0xff] }
 0x7b8   : > { %v1284_v23 = vsub.f32 %v3503_v18, %v1283_v22 }
 0x7ba   : > { %v1285_v24 = vmul.f32 %v1284_v23, %v1284_v23 }
 0x7bc   : > { %v1286_v26 = vsel %vm646_vm0, %v1285_v24, 0.0 }
 0x7bd   : > { %1287 = vadd.xlane.f32.xlu0 %v1286_v26  ;;  %v2655_v26 = vld [vmem:[%s3886_s5 + $0x1] ss:$0 sm:$0xff]  ;;  %s3130_s5 = sshll.u32 %s3207_s4, 4  ;;  %s3131_s5 = int_to_ptr.vmem [resolvable:$false] %s3130_s5 }
 0x84a   : > { %v1288_v29 = vpop.xlane.xlu0 %1287 }
 0x84b   : > { %v1289_v30 = vmul.f32 0.03125, %v1288_v29 }
 0x84d   : > { %v1290_v31 = vadd.f32 1e-05, %v1289_v30 }
 0x84f   : > { %3094 = vrsqrt.f32 %v1290_v31 }
 0x859   : > { %v3095_v32 = vpop.eup %3094 }
 0x85a   : > { %v1292_v33 = vmul.f32 %v3095_v32, %v1284_v23 }
 0x85c   : > { %v1299_v35 = vmul.f32 %v2631_v25, %v1292_v33 }
 0x85e   : > { %v1306_v36 = vadd.f32 %v2632_v34, %v1299_v35 }
 0x860   : > { %v1311_v37 = vpack.c.bf16 %v1306_v36, %v1306_v36 }
 0x862   : > { %2865 = vmatmul.mubr.msk.bf16.vlgmr.msra.gmra.mrb[16].mxu0 %vm646_vm0, %v1311_v37 }
 0x863   : > { %2892 = vmatprep.mubr.msk.bf16.mxu0 %vm3191_vm1, %v3190_v8  ;;  %2889 = vmatpush3.bf16.msra.mxu0 %v3060_v13 }
 0x864   : > { %2890 = vmatprep.subr.bf16.mxu0 %v3190_v8 }
 0x867   : > { %2891 = vmatpush3.bf16.msra.mxu0 %v3061_v14 }
 0x868   : > { %2896 = vmatprep.subr.bf16.mxu0 %v3190_v8 }
 0x935   : > { %v1368_v47 = vpop.f32.mrb[16].mxu0 }
 0x936   : > { %v1369_v48 = vadd.f32 %v2633_v46, %v1368_v47  ;;  %v2866_v49 = vpop.f32.mrb[17].mxu0 }
 0x937   : > { %v1371_v50 = vpop.f32.mrb[18].mxu0 }
 0x938   : > { %v1375_v51 = vmul.f32 0.044715, %v1369_v48  ;;  %v2867_v52 = vpop.f32.mrb[19].mxu0  ;;  %v1374_v58 = vmul.f32 0.5, %v1369_v48 }
 0x93a   : > { %v1376_v53 = vmul.f32 %v1375_v51, %v1369_v48 }
 0x93c   : > { %v1377_v54 = vmul.f32 %v1376_v53, %v1369_v48 }
 0x93e   : > { %v1378_v55 = vadd.f32 %v1377_v54, %v1369_v48 }
 0x940   : > { %v1379_v56 = vmul.f32 0.7978846, %v1378_v55 }
 0x942   : > { %3096 = vtanh.f32 %v1379_v56 }
 0x94c   : > { %v3097_v57 = vpop.eup %3096 }
 0x94d   : > { %v1381_v59 = vadd.f32 1.0, %v3097_v57 }
 0x94f   : > { %v1382_v60 = vmul.f32 %v1381_v59, %v1374_v58 }
 0x951   : > { %v1399_v61 = vpack.c.bf16 %v1382_v60, %v1382_v60 }
 0x953   : > { %2885 = vmatmul.mubr.bf16.vlgmr.msra.gmra.mrb[24].mxu1 %v1399_v61 }
 0x954   : > { %2916 = vmatprep.mubr.msk.bf16.mxu1 %vm3191_vm1, %v3190_v8 }
 0xa26   : > { %v1482_v62 = vpop.f32.mrb[24].mxu1 }
 0xa27   : > { %v1488_v1 = vadd.f32 %v1482_v62, %v3503_v18  ;;  %v2886_v2 = vpop.f32.mrb[25].mxu1 }
 0xa28   : > { %v1485_v3 = vpop.f32.mrb[26].mxu1 }
 0xa29   : > { %v3567_v4 = vadd.f32 %v2645_v63, %v1488_v1  ;;  %v2887_v5 = vpop.f32.mrb[27].mxu1 }
 0xa2b   : > { %v1501_v6 = vsel %vm646_vm0, %v3567_v4, 0.0 }
 0xa2c   : > { %1502 = vadd.xlane.f32.xlu0 %v1501_v6 }
 0xab9   : > { %v1503_v7 = vpop.xlane.xlu0 %1502 }
 0xaba   : > { %v1504_v9 = vmul.f32 0.03125, %v1503_v7 }
 0xabc   : > { %v1505_v10 = vsub.f32 %v3567_v4, %v1504_v9 }
 0xabe   : > { %v1506_v11 = vmul.f32 %v1505_v10, %v1505_v10 }
 0xac0   : > { %v1507_v12 = vsel %vm646_vm0, %v1506_v11, 0.0 }
 0xac1   : > { %1508 = vadd.xlane.f32.xlu1 %v1507_v12 }
 0xb4e   : > { %v1509_v15 = vpop.xlane.xlu1 %1508 }
 0xb4f   : > { %v1510_v16 = vmul.f32 0.03125, %v1509_v15 }
 0xb51   : > { %v1511_v17 = vadd.f32 1e-05, %v1510_v16 }
 0xb53   : > { %3098 = vrsqrt.f32 %v1511_v17 }
 0xb5d   : > { %v3099_v18 = vpop.eup %3098 }
 0xb5e   : > { %v1513_v20 = vmul.f32 %v3099_v18, %v1505_v10 }
 0xb60   : > { %v1520_v22 = vmul.f32 %v2648_v19, %v1513_v20 }
 0xb62   : > { %v1527_v23 = vadd.f32 %v2649_v21, %v1520_v22 }
 0xb64   : > { %v1533_v24 = vpack.c.bf16 %v1527_v23, %v1527_v23 }
 0xb66   : > { %2893 = vmatmul.mubr.msk.bf16.vlgmr.msra.gmra.mrb[20].mxu0 %vm646_vm0, %v1533_v24 }
 0xb67   : > { %2898 = vmatprep.mubr.msk.bf16.mxu0 %vm3191_vm1, %v3190_v8 }
 0xc39   : > { %v1591_v0 = vpop.f32.mrb[20].mxu0 }
 0xc3a   : > { %v1592_v27 = vadd.f32 %v2655_v26, %v1591_v0  ;;  %v2894_v28 = vpop.f32.mrb[21].mxu0 }
 0xc3b   : > { %v1594_v29 = vpop.f32.mrb[22].mxu0 }
 0xc3c   : > { %v3593_v30 = vpack.c.bf16 %v1592_v27, %v1592_v27  ;;  %v2895_v31 = vpop.f32.mrb[23].mxu0 }
 0xc3e   : > { %1599 = vrot.lane.b32.xlu0 %v3593_v30, %s3889_s24  ;;  %s3897_s24 = smov 48  }
 0xc42   : > { %1711 = vrot.lane.b32.xlu0 %v3593_v30, %s3890_s0  ;;  %s3898_s0 = smov 56  }
 0xc46   : > { %1709 = vrot.lane.b32.xlu0 %v3593_v30, %s3891_s21  ;;  %s3899_s21 = smov 40  }
 0xc4a   : > { %1821 = vrot.lane.b32.xlu0 %v3593_v30, %s3892_s20 }
 0xc4e   : > { %1933 = vrot.lane.b32.xlu0 %v3593_v30, %s3893_s25 }
 0xcb0   : > { %v1600_v32 = vpop.permute.xlu0 %1599 }
 0xcb1   : > { %v1605_v25 = vsel %vm746_vm2, %v1600_v32, 0 }
 0xcb2   : > { %2897 = vmatpush3.bf16.xpose.msra.mxu0 %v1605_v25 }
 0xcb3   : > { %2902 = vmatprep.subr.bf16.mxu0 %v3190_v8 }
 0xcb4   : > { %v1712_v51 = vpop.permute.xlu0 %1711 }
 0xcb5   : > { %v1717_v53 = vsel %vm746_vm2, %v1712_v51, 0 }
 0xcb8   : > { %v1710_v55 = vpop.permute.xlu0 %1709 }
 0xcb9   : > { %2899 = vmatmul.mubr.msk.bf16.vlgmr.msra.gmra.mrb[24].mxu0 %vm746_vm2, %v3593_v30 }
 0xcba   : > { %2904 = vmatprep.mubr.msk.bf16.mxu0 %vm3191_vm1, %v3190_v8 }
 0xcbc   : > { %v1822_v58 = vpop.permute.xlu0 %1821 }
 0xcc0   : > { %v1934_v60 = vpop.permute.xlu0 %1933 }
 0xd8c   : > { %v1641_v33 = vpop.f32.mrb[24].mxu0 }
 0xd8d   : > { %v1647_v34 = vmul.f32 0.35355338, %v1641_v33  ;;  %v2900_v35 = vpop.f32.mrb[25].mxu0 }
 0xd8e   : > { %v1644_v36 = vpop.f32.mrb[26].mxu0 }
 0xd8f   : > { %v2901_v37 = vpop.f32.mrb[27].mxu0  ;;  %v1648_v39 = vadd.f32 %v1647_v34, %v3440_v38 }
 0xd91   : > { %v1649_v40 = vsel %vm746_vm2, %v1648_v39, -inf }
 0xd92   : > { %1650 = vmax.xlane.f32.xlu1 %v1649_v40 }
 0xe1f   : > { %v1651_v41 = vpop.xlane.xlu1 %1650 }
 0xe20   : > { %v1652_v42 = vsub.f32 %v1648_v39, %v1651_v41 }
 0xe22   : > { %v1653_v43 = vmul.f32 1.442695, %v1652_v42 }
 0xe24   : > { %3100 = vpow2.f32 %v1653_v43 }
 0xe2e   : > { %v3101_v44 = vpop.eup %3100 }
 0xe2f   : > { %v1655_v45 = vsel %vm746_vm2, %v3101_v44, 0.0 }
 0xe30   : > { %1656 = vadd.xlane.f32.xlu1 %v1655_v45 }
 0xe41   : > { %1661 = vrot.lane.b32.xlu1 %v3593_v30, %s3894_s29  ;;  %s3900_s29 = smov 8  }
 0xe45   : > { %1823 = vrot.lane.b32.xlu1 %v3593_v30, %s3895_s26  ;;  %s3901_s26 = smov 16  }
 0xe49   : > { %1935 = vrot.lane.b32.xlu1 %v3593_v30, %s3896_s2 }
 0xebd   : > { %v1657_v46 = vpop.xlane.xlu1 %1656 }
 0xebe   : > { %3102 = vrcp.f32 %v1657_v46 }
 0xec1   : > { %v1662_v47 = vpop.permute.xlu1 %1661 }
 0xec2   : > { %v1667_v48 = vsel %vm812_vm3, %v1662_v47, 0 }
 0xec3   : > { %2903 = vmatpush3.bf16.msra.mxu0 %v1667_v48 }
 0xec4   : > { %2908 = vmatprep.subr.bf16.mxu0 %v3190_v8 }
 0xec5   : > { %v1824_v54 = vpop.permute.xlu1 %1823 }
 0xec6   : > { %v1829_v56 = vsel %vm746_vm2, %v1824_v54, 0 }
 0xec8   : > { %v3103_v49 = vpop.eup %3102 }
 0xec9   : > { %v1659_v50 = vmul.f32 %v3103_v49, %v3101_v44  ;;  %v1936_v57 = vpop.permute.xlu1 %1935 }
 0xeca   : > { %v1941_v59 = vsel %vm746_vm2, %v1936_v57, 0  ;;  %v3062_v57 = vld [vmem:[%s3888_s6 + $0x10] sm:$0xff]  }
 0xecb   : > { %v1660_v52 = vpack.c.bf16 %v1659_v50, %v1659_v50 }
 0xecd   : > { %2905 = vmatmul.mubr.msk.bf16.vlgmr.msra.gmra.mrb[28].mxu0 %vm746_vm2, %v1660_v52 }
 0xece   : > { %2909 = vmatpush3.bf16.xpose.msra.mxu0 %v1717_v53  ;;  %2910 = vmatprep.mubr.msk.bf16.mxu0 %vm3191_vm1, %v3190_v8 }
 0xecf   : > { %2920 = vmatprep.subr.bf16.mxu0 %v3190_v8 }
 0xed5   : > { %2911 = vmatmul.mubr.msk.bf16.vlgmr.msra.gmra.mrb[32].mxu0 %vm746_vm2, %v1710_v55 }
 0xed6   : > { %2921 = vmatpush3.bf16.xpose.msra.mxu0 %v1829_v56  ;;  %2922 = vmatprep.mubr.msk.bf16.mxu0 %vm3191_vm1, %v3190_v8 }
 0xed7   : > { %2932 = vmatprep.subr.bf16.mxu0 %v3190_v8 }
 0xedd   : > { %2923 = vmatmul.mubr.msk.bf16.vlgmr.msra.gmra.mrb[36].mxu0 %vm746_vm2, %v1822_v58 }
 0xede   : > { %2933 = vmatpush3.bf16.xpose.msra.mxu0 %v1941_v59  ;;  %2934 = vmatprep.mubr.msk.bf16.mxu0 %vm3191_vm1, %v3190_v8 }
 0xedf   : > { %2944 = vmatprep.subr.bf16.mxu0 %v3190_v8 }
 0xee5   : > { %2935 = vmatmul.mubr.msk.bf16.vlgmr.msra.gmra.mrb[40].mxu0 %vm746_vm2, %v1934_v60 }
 0xee6   : > { %2948 = vmatprep.mubr.msk.bf16.mxu0 %vm3191_vm1, %v3190_v8  ;;  %2945 = vmatpush3.bf16.msra.mxu0 %v3062_v57 }
 0xee7   : > { %2946 = vmatprep.subr.bf16.mxu0 %v3190_v8 }
 0xfa0   : > { %v3640_v61 = vpop.f32.mrb[28].mxu0 }
 0xfa1   : > { %v2906_v62 = vpop.f32.mrb[29].mxu0 }
 0xfa2   : > { %v1706_v63 = vpop.f32.mrb[30].mxu0 }
 0xfa3   : > { %v2907_v1 = vpop.f32.mrb[31].mxu0 }
 0xfa8   : > { %v1753_v2 = vpop.f32.mrb[32].mxu0 }
 0xfa9   : > { %v1759_v3 = vmul.f32 0.35355338, %v1753_v2  ;;  %v2912_v5 = vpop.f32.mrb[33].mxu0 }
 0xfaa   : > { %v1756_v6 = vpop.f32.mrb[34].mxu0  ;;  %v3063_v5 = vld [vmem:[%s3888_s6 + $0x18] sm:$0xff]   ;;  %s3132_s6 = scalar_lea.vmem %s3131_s5, 256 }
 0xfab   : > { %v2913_v7 = vpop.f32.mrb[35].mxu0  ;;  %v1760_v9 = vadd.f32 %v1759_v3, %v3440_v38  ;;  %2947 = vmatpush3.bf16.msra.mxu0 %v3063_v5 }
 0xfac   : > { %2960 = vmatprep.subr.bf16.mxu0 %v3190_v8 }
 0xfad   : > { %v1761_v10 = vsel %vm746_vm2, %v1760_v9, -inf }
 0xfae   : > { %1762 = vmax.xlane.f32.xlu1 %v1761_v10 }
 0xfb0   : > { %v1865_v11 = vpop.f32.mrb[36].mxu0 }
 0xfb1   : > { %v1871_v12 = vmul.f32 0.35355338, %v1865_v11  ;;  %v2924_v13 = vpop.f32.mrb[37].mxu0 }
 0xfb2   : > { %v1868_v14 = vpop.f32.mrb[38].mxu0 }
 0xfb3   : > { %v2925_v15 = vpop.f32.mrb[39].mxu0  ;;  %v1872_v16 = vadd.f32 %v1871_v12, %v3440_v38 }
 0xfb5   : > { %v1873_v17 = vsel %vm746_vm2, %v1872_v16, -inf }
 0xfb6   : > { %1874 = vmax.xlane.f32.xlu0 %v1873_v17 }
 0xfb8   : > { %v1977_v18 = vpop.f32.mrb[40].mxu0 }
 0xfb9   : > { %v1983_v19 = vmul.f32 0.35355338, %v1977_v18  ;;  %v2936_v20 = vpop.f32.mrb[41].mxu0 }
 0xfba   : > { %v1980_v21 = vpop.f32.mrb[42].mxu0 }
 0xfbb   : > { %v2937_v22 = vpop.f32.mrb[43].mxu0  ;;  %v1984_v23 = vadd.f32 %v1983_v19, %v3440_v38  ;;  %v2675_v19 = vld [vmem:[%s3832_s7 + $0x1] ss:$0 sm:$0xff] }
 0xfbd   : > { %v1985_v24 = vsel %vm746_vm2, %v1984_v23, -inf }
 0xfbe   : > { %1986 = vmax.xlane.f32.xlu0 %v1985_v24 }
0x103b   : > { %v1763_v26 = vpop.xlane.xlu1 %1762 }
0x103c   : > { %v1764_v0 = vsub.f32 %v1760_v9, %v1763_v26 }
0x103e   : > { %v1765_v27 = vmul.f32 1.442695, %v1764_v0 }
0x1040   : > { %3104 = vpow2.f32 %v1765_v27 }
0x1043   : > { %v1875_v28 = vpop.xlane.xlu0 %1874 }
0x1044   : > { %v1876_v29 = vsub.f32 %v1872_v16, %v1875_v28 }
0x1046   : > { %v1877_v31 = vmul.f32 1.442695, %v1876_v29 }
0x1048   : > { %3106 = vpow2.f32 %v1877_v31  ;;  %v3065_v31 = vld [vmem:[%s3835_s10 + $0x18] sm:$0xff]  }
0x104a   : > { %v3105_v32 = vpop.eup %3104 }
0x104b   : > { %v1767_v25 = vsel %vm746_vm2, %v3105_v32, 0.0  ;;  %v1987_v38 = vpop.xlane.xlu0 %1986 }
0x104c   : > { %1768 = vadd.xlane.f32.xlu1 %v1767_v25  ;;  %v1988_v35 = vsub.f32 %v1984_v23, %v1987_v38 }
0x104e   : > { %v1989_v36 = vmul.f32 1.442695, %v1988_v35  ;;  %v2678_v35 = vld [vmem:[%s3833_s8 + $0x1] ss:$0 sm:$0xff] }
0x1050   : > { %3108 = vpow2.f32 %v1989_v36 }
0x1052   : > { %v3107_v33 = vpop.eup %3106 }
0x1053   : > { %v1879_v34 = vsel %vm746_vm2, %v3107_v33, 0.0 }
0x1054   : > { %1880 = vadd.xlane.f32.xlu0 %v1879_v34 }
0x105a   : > { %v3109_v37 = vpop.eup %3108 }
0x105b   : > { %v1991_v39 = vsel %vm746_vm2, %v3109_v37, 0.0 }
0x105d   : > { %1885 = vrot.lane.b32.xlu1 %v3593_v30, %s3897_s24 }
0x106a   : > { %1773 = vrot.lane.b32.xlu0 %v3593_v30, %s3898_s0  ;;  %s3902_s0 = smov 24  }
0x1081   : > { %1992 = vadd.xlane.f32.xlu1 %v1991_v39 }
0x1092   : > { %1997 = vrot.lane.b32.xlu1 %v3593_v30, %s3899_s21  ;;  %s618_s21 = sand.u32 1, %s3180_s30  }
0x1093   : > { %s2609_s20 = sshll.u32 %s618_s21, 3 }
0x1094   : > { %s620_s25 = scalar_lea.vmem [#allocation2], %s2609_s20 }
0x10d9   : > { %v1769_v40 = vpop.xlane.xlu1 %1768 }
0x10da   : > { %3110 = vrcp.f32 %v1769_v40 }
0x10dd   : > { %v1886_v46 = vpop.permute.xlu1 %1885 }
0x10de   : > { %v1891_v48 = vsel %vm812_vm3, %v1886_v46, 0  ;;  %v3071_v46 = vld [vmem:[%s3837_s12 + $0x68] sm:$0xff]  }
0x10e1   : > { %v1881_v41 = vpop.xlane.xlu0 %1880 }
0x10e2   : > { %3112 = vrcp.f32 %v1881_v41 }
0x10e4   : > { %v3111_v42 = vpop.eup %3110 }
0x10e5   : > { %v1771_v43 = vmul.f32 %v3111_v42, %v3105_v32  ;;  %v1774_v44 = vpop.permute.xlu0 %1773  ;;  %v3066_v32 = vld [vmem:[%s3837_s12 + $0x40] sm:$0xff]   ;;  %v3067_v42 = vld [vmem:[%s3837_s12 + $0x48] sm:$0xff]  }
0x10e6   : > { %v1779_v45 = vsel %vm812_vm3, %v1774_v44, 0  ;;  %v3069_v44 = vld [vmem:[%s3837_s12 + $0x58] sm:$0xff]  }
0x10e7   : > { %2915 = vmatpush3.bf16.msra.mxu1 %v1779_v45  ;;  %v1772_v47 = vpack.c.bf16 %v1771_v43, %v1771_v43  ;;  %v3068_v43 = vld [vmem:[%s3837_s12 + $0x50] sm:$0xff]   ;;  %v3070_v45 = vld [vmem:[%s3837_s12 + $0x60] sm:$0xff]  }
0x10e8   : > { %2926 = vmatprep.subr.bf16.mxu1 %v3190_v8 }
0x10ea   : > { %2917 = vmatmul.mubr.msk.bf16.vlgmr.msra.gmra.mrb[28].mxu1 %vm746_vm2, %v1772_v47  ;;  %v3072_v47 = vld [vmem:[%s3837_s12 + $0x70] sm:$0xff]  }
0x10eb   : > { %2927 = vmatpush3.bf16.msra.mxu1 %v1891_v48  ;;  %2928 = vmatprep.mubr.msk.bf16.mxu1 %vm3191_vm1, %v3190_v8  ;;  %v3073_v48 = vld [vmem:[%s3837_s12 + $0x78] sm:$0xff]  }
0x10ec   : > { %v3113_v30 = vpop.eup %3112  ;;  %2938 = vmatprep.subr.bf16.mxu1 %v3190_v8 }
0x10ed   : > { %v1883_v49 = vmul.f32 %v3113_v30, %v3107_v33  ;;  %v2685_v30 = vld [vmem:[%s3836_s11 + $0x1] ss:$0 sm:$0xff] }
0x10ef   : > { %v1884_v50 = vpack.c.bf16 %v1883_v49, %v1883_v49 }
0x10f2   : > { %2929 = vmatmul.mubr.msk.bf16.vlgmr.msra.gmra.mrb[32].mxu1 %vm746_vm2, %v1884_v50 }
0x10f3   : > { %2940 = vmatprep.mubr.msk.bf16.mxu1 %vm3191_vm1, %v3190_v8 }
0x110e   : > { %v1993_v51 = vpop.xlane.xlu1 %1992 }
0x110f   : > { %3114 = vrcp.f32 %v1993_v51 }
0x1112   : > { %v1998_v52 = vpop.permute.xlu1 %1997 }
0x1113   : > { %v2003_v53 = vsel %vm812_vm3, %v1998_v52, 0 }
0x1114   : > { %2939 = vmatpush3.bf16.msra.mxu1 %v2003_v53 }
0x1115   : > { %2952 = vmatprep.subr.bf16.mxu1 %v3190_v8 }
0x1119   : > { %v3115_v54 = vpop.eup %3114 }
0x111a   : > { %v1995_v55 = vmul.f32 %v3115_v54, %v3109_v37  ;;  %v2679_v37 = vld [vmem:[%s3834_s9 + $0x1] ss:$0 sm:$0xff] }
0x111c   : > { %v1996_v56 = vpack.c.bf16 %v1995_v55, %v1995_v55 }
0x111e   : > { %2941 = vmatmul.mubr.msk.bf16.vlgmr.msra.gmra.mrb[36].mxu1 %vm746_vm2, %v1996_v56 }
0x111f   : > { %2956 = vmatprep.mubr.msk.bf16.mxu1 %vm3191_vm1, %v3190_v8 }
0x11bd   : > { %v1815_v58 = vpop.f32.mrb[28].mxu1 }
0x11be   : > { %2046 = vrot.lane.b32.xlu0 %v1815_v58, %s3900_s29  ;;  %v2918_v59 = vpop.f32.mrb[29].mxu1  ;;  %s2722_s29 = sshll.u32 %s3329_s1, 7 }
0x11bf   : > { %v1818_v60 = vpop.f32.mrb[30].mxu1 }
0x11c0   : > { %v2919_v62 = vpop.f32.mrb[31].mxu1 }
0x11c5   : > { %v1927_v63 = vpop.f32.mrb[32].mxu1 }
0x11c6   : > { %2050 = vrot.lane.b32.xlu1 %v1927_v63, %s3901_s26  ;;  %v2930_v1 = vpop.f32.mrb[33].mxu1  ;;  %s637_s26 = scalar_lea.vmem %s3842_s17, %s3361_s28  ;;  %s2484_s28 = scalar_lea.sflag [#allocation3], %s618_s21 }
0x11c7   : > { %v1930_v2 = vpop.f32.mrb[34].mxu1 }
0x11c8   : > { %v2931_v3 = vpop.f32.mrb[35].mxu1 }
0x11c9   : > { %v2714_v3 = vld [vmem:[%s3838_s13 + $0x1] ss:$0 sm:$0xff] }
0x11f1   : > { %v2039_v6 = vpop.f32.mrb[36].mxu1 }
0x11f2   : > { %2054 = vrot.lane.b32.xlu0 %v2039_v6, %s3902_s0  ;;  %v2942_v7 = vpop.f32.mrb[37].mxu1  ;;  %s3783_s0 = scalar_lea.hbm %s3843_s18, %s2722_s29 }
0x11f3   : > { %v2042_v9 = vpop.f32.mrb[38].mxu1 }
0x11f4   : > { %v2943_v10 = vpop.f32.mrb[39].mxu1 }
0x1230   : > { %v2047_v11 = vpop.permute.xlu0 %2046 }
0x1231   : > { %v2057_v13 = vsel %vm746_vm2, %v3640_v61, %v2047_v11 }
0x1238   : > { %v2051_v12 = vpop.permute.xlu1 %2050 }
0x1239   : > { %v2058_v14 = vsel %vm1205_vm4, %v2057_v13, %v2051_v12 }
0x1264   : > { %v2055_v15 = vpop.permute.xlu0 %2054 }
0x1265   : > { %v2059_v16 = vsel %vm1207_vm5, %v2058_v14, %v2055_v15 }
0x1266   : > { %v2065_v17 = vpack.c.bf16 %v2059_v16, %v2059_v16 }
0x1268   : > { %2949 = vmatmul.mubr.msk.bf16.vlgmr.msra.gmra.mrb[44].mxu0 %vm646_vm0, %v2065_v17  ;;  %v3074_v17 = vld [vmem:[%s3841_s16] sm:$0xff]  }
0x1269   : > { %2976 = vmatprep.mubr.msk.bf16.mxu0 %vm3191_vm1, %v3190_v8  ;;  %2961 = vmatpush3.bf16.msra.mxu0 %v3066_v32 }
0x126a   : > { %2962 = vmatprep.subr.bf16.mxu0 %v3190_v8 }
0x126d   : > { %2963 = vmatpush3.bf16.msra.mxu0 %v3067_v42 }
0x126e   : > { %2964 = vmatprep.subr.bf16.mxu0 %v3190_v8 }
0x1271   : > { %2965 = vmatpush3.bf16.msra.mxu0 %v3068_v43 }
0x1272   : > { %2966 = vmatprep.subr.bf16.mxu0 %v3190_v8 }
0x1275   : > { %2967 = vmatpush3.bf16.msra.mxu0 %v3069_v44 }
0x1276   : > { %2968 = vmatprep.subr.bf16.mxu0 %v3190_v8 }
0x1279   : > { %2969 = vmatpush3.bf16.msra.mxu0 %v3070_v45 }
0x127a   : > { %2970 = vmatprep.subr.bf16.mxu0 %v3190_v8 }
0x127d   : > { %2971 = vmatpush3.bf16.msra.mxu0 %v3071_v46 }
0x127e   : > { %2972 = vmatprep.subr.bf16.mxu0 %v3190_v8 }
0x1281   : > { %2973 = vmatpush3.bf16.msra.mxu0 %v3072_v47 }
0x1282   : > { %2974 = vmatprep.subr.bf16.mxu0 %v3190_v8 }
0x1285   : > { %2975 = vmatpush3.bf16.msra.mxu0 %v3073_v48 }
0x133b   : > { %v2115_v18 = vpop.f32.mrb[44].mxu0 }
0x133c   : > { %v2121_v20 = vadd.f32 %v2115_v18, %v3567_v4  ;;  %v2950_v21 = vpop.f32.mrb[45].mxu0  ;;  %v3064_v4 = vld [vmem:[%s3835_s10 + $0x10] sm:$0xff]   ;;  %v3075_v18 = vld [vmem:[%s3841_s16 + $0x8] sm:$0xff]  }
0x133d   : > { %v2118_v61 = vpop.f32.mrb[46].mxu0  ;;  %2953 = vmatpush3.bf16.msra.mxu1 %v3064_v4  ;;  %v2447_v4 = vlaneseq }
0x133e   : > { %v3694_v22 = vadd.f32 %v2675_v19, %v2121_v20  ;;  %v2951_v23 = vpop.f32.mrb[47].mxu0  ;;  %2954 = vmatprep.subr.bf16.mxu1 %v3190_v8  ;;  %v3206_v19 = vmov 0   ;;  %v3768_v20 = vld [vmem:[%s637_s26] sm:$0xff]  ;;  %s2500_s26 = sshll.u32 %s620_s25, 4  ;;  %s2501_s26 = int_to_ptr.vmem [resolvable:$true] %s2500_s26 }
0x133f   : > { %3044 = vset.pattern.permute.xlu1 %v3206_v19  ;;  %3045 = vset.pattern.permute.xlu0 %v3206_v19  ;;  %s3126_s20 = scalar_lea.vmem %s2501_s26, 128  ;;  %p3133_p0 = scmp.lt.s32.totalorder %s2501_s26, %s3131_s5 }
0x1340   : > { %v2135_v24 = vsel %vm646_vm0, %v3694_v22, 0.0  ;;  %p3127_p11 = scmp.ne.s32.totalorder %s2501_s26, %s3126_s20  ;;  %p3134_p1 = scmp.lt.s32.totalorder %s3132_s6, %s3126_s20 }
0x1341   : > { %2136 = vadd.xlane.f32.xlu1 %v2135_v24  ;;  %2955 = vmatpush3.bf16.msra.mxu1 %v3065_v31  ;;  %v2715_v24 = vld [vmem:[%s3839_s14] ss:$0 sm:$0xff]  ;;  %v2448_v31 = vand.u32 127, %v2447_v4 }
0x1342   : > { %2980 = vmatprep.subr.bf16.mxu1 %v3190_v8  ;;  %p3128_p12 = pnand %p3127_p11, %p3346_p5  ;;  %p3135_p2 = por %p3134_p1, %p3133_p0 }
0x1343   : > { %vm2449_vm6 = vcmp.lt.s32.totalorder %v2448_v31, 64 }
0x1344   : > { %p3129_p13 = pneg %p3128_p12 }
0x1346   : > { %p3136_p3 = pnand %p3135_p2, %p3129_p13 }
0x13ce   : > { %v2137_v26 = vpop.xlane.xlu1 %2136 }
0x13cf   : > { %v2138_v0 = vmul.f32 0.03125, %v2137_v26 }
0x13d1   : > { %v2139_v27 = vsub.f32 %v3694_v22, %v2138_v0  ;;  %v2716_v0 = vld [vmem:[%s3840_s15] ss:$0 sm:$0xff] }
0x13d3   : > { %v2140_v28 = vmul.f32 %v2139_v27, %v2139_v27 }
0x13d5   : > { %v2141_v29 = vsel %vm646_vm0, %v2140_v28, 0.0 }
0x13d6   : > { %2142 = vadd.xlane.f32.xlu0 %v2141_v29 }
0x1463   : > { %v2143_v25 = vpop.xlane.xlu0 %2142 }
0x1464   : > { %v2144_v33 = vmul.f32 0.03125, %v2143_v25 }
0x1466   : > { %v2145_v34 = vadd.f32 1e-05, %v2144_v33 }
0x1468   : > { %3116 = vrsqrt.f32 %v2145_v34 }
0x1472   : > { %v3117_v38 = vpop.eup %3116 }
0x1473   : > { %v2147_v36 = vmul.f32 %v3117_v38, %v2139_v27 }
0x1475   : > { %v2154_v39 = vmul.f32 %v2678_v35, %v2147_v36 }
0x1477   : > { %v2161_v40 = vadd.f32 %v2679_v37, %v2154_v39 }
0x1479   : > { %v2167_v41 = vpack.c.bf16 %v2161_v40, %v2161_v40 }
0x147b   : > { %2957 = vmatmul.mubr.msk.bf16.vlgmr.msra.gmra.mrb[40].mxu1 %vm646_vm0, %v2167_v41 }
0x147c   : > { %2984 = vmatprep.mubr.msk.bf16.mxu1 %vm3191_vm1, %v3190_v8  ;;  %2981 = vmatpush3.bf16.msra.mxu1 %v3074_v17 }
0x147d   : > { %2982 = vmatprep.subr.bf16.mxu1 %v3190_v8 }
0x1480   : > { %2983 = vmatpush3.bf16.msra.mxu1 %v3075_v18 }
0x154e   : > { %v2225_v49 = vpop.f32.mrb[40].mxu1 }
0x154f   : > { %v2226_v50 = vadd.f32 %v2685_v30, %v2225_v49  ;;  %v2958_v51 = vpop.f32.mrb[41].mxu1 }
0x1550   : > { %v2228_v52 = vpop.f32.mrb[42].mxu1 }
0x1551   : > { %v2232_v53 = vmul.f32 0.044715, %v2226_v50  ;;  %v2959_v54 = vpop.f32.mrb[43].mxu1  ;;  %v2231_v60 = vmul.f32 0.5, %v2226_v50 }
0x1553   : > { %v2233_v55 = vmul.f32 %v2232_v53, %v2226_v50 }
0x1555   : > { %v2234_v56 = vmul.f32 %v2233_v55, %v2226_v50 }
0x1557   : > { %v2235_v57 = vadd.f32 %v2234_v56, %v2226_v50 }
0x1559   : > { %v2236_v58 = vmul.f32 0.7978846, %v2235_v57 }
0x155b   : > { %3118 = vtanh.f32 %v2236_v58 }
0x1565   : > { %v3119_v59 = vpop.eup %3118 }
0x1566   : > { %v2238_v62 = vadd.f32 1.0, %v3119_v59 }
0x1568   : > { %v2239_v63 = vmul.f32 %v2238_v62, %v2231_v60 }
0x156a   : > { %v2257_v1 = vpack.c.bf16 %v2239_v63, %v2239_v63 }
0x156c   : > { %2977 = vmatmul.mubr.bf16.vlgmr.msra.gmra.mrb[48].mxu0 %v2257_v1 }
0x163f   : > { %v2340_v2 = vpop.f32.mrb[48].mxu0 }
0x1640   : > { %v2346_v5 = vadd.f32 %v2340_v2, %v3694_v22  ;;  %v2978_v6 = vpop.f32.mrb[49].mxu0 }
0x1641   : > { %v2343_v7 = vpop.f32.mrb[50].mxu0 }
0x1642   : > { %v2979_v9 = vpop.f32.mrb[51].mxu0  ;;  %v2355_v10 = vadd.f32 %v2714_v3, %v2346_v5 }
0x1644   : > { %v2358_v11 = vsel %vm646_vm0, %v2355_v10, 0.0 }
0x1645   : > { %2359 = vadd.xlane.f32.xlu0 %v2358_v11 }
0x16d2   : > { %v2360_v12 = vpop.xlane.xlu0 %2359 }
0x16d3   : > { %v2361_v13 = vmul.f32 0.03125, %v2360_v12 }
0x16d5   : > { %v2362_v14 = vsub.f32 %v2355_v10, %v2361_v13 }
0x16d7   : > { %v2363_v15 = vmul.f32 %v2362_v14, %v2362_v14 }
0x16d9   : > { %v2364_v16 = vsel %vm646_vm0, %v2363_v15, 0.0 }
0x16da   : > { %2365 = vadd.xlane.f32.xlu1 %v2364_v16 }
0x16eb   : > { %2462 = vperm.xlu1 %3044, %v3768_v20  }
0x1767   : > { %v2366_v21 = vpop.xlane.xlu1 %2365 }
0x1768   : > { %v2367_v61 = vmul.f32 0.03125, %v2366_v21 }
0x176a   : > { %v2368_v22 = vadd.f32 1e-05, %v2367_v61 }
0x176b   : > { %v2463_v39 = vpop.permute.xlu1 %2462 }
0x176c   : > { %3120 = vrsqrt.f32 %v2368_v22  ;;  %vm2464_vm7 = vcmp.eq.s32.totalorder %v2448_v31, %v2463_v39 }
0x1776   : > { %v3121_v23 = vpop.eup %3120 }
0x1777   : > { %v2370_v26 = vmul.f32 %v3121_v23, %v2362_v14 }
0x1779   : > { %v2377_v27 = vmul.f32 %v2715_v24, %v2370_v26 }
0x177b   : > { %v2384_v28 = vadd.f32 %v2716_v0, %v2377_v27 }
0x177d   : > { %v2389_v29 = vpack.c.bf16 %v2384_v28, %v2384_v28 }
0x177f   : > { %2985 = vmatmul.mubr.msk.bf16.vlgmr.msra.gmra.mrb[44].mxu1 %vm646_vm0, %v2389_v29 }
0x1852   : > { %v2439_v32 = vpop.f32.mrb[44].mxu1 }
0x1853   : > { %2445 = vst [vmem:[%s620_s25] sm:$0xff] %v2439_v32  ;;  %v2986_v25 = vpop.f32.mrb[45].mxu1  ;;  %v2450_v33 = vsel %vm2449_vm6, %v2439_v32, -1e+09 }
0x1854   : > { %2451 = vmax.xlane.f32.xlu0 %v2450_v33  ;;  %v2442_v34 = vpop.f32.mrb[46].mxu1  ;;  %v2465_v41 = vsel %vm2464_vm7, %v2450_v33, 0.0 }
0x1855   : > { %v2987_v38 = vpop.f32.mrb[47].mxu1 }
0x18e1   : > { %v2452_v35 = vpop.xlane.xlu0 %2451 }
0x18e2   : > { %v2453_v36 = vsub.f32 %v2450_v33, %v2452_v35 }
0x18e4   : > { %v2454_v37 = vmul.f32 1.442695, %v2453_v36 }
0x18e6   : > { %3122 = vpow2.f32 %v2454_v37 }
0x18f0   : > { %v3123_v40 = vpop.eup %3122 }
0x18f1   : > { %2456 = vadd.xlane.f32.xlu0 %v3123_v40 }
0x18f5   : > { %2466 = vadd.xlane.f32.xlu0 %v2465_v41 }
0x18f6   : > { %3139 = shalt.err (!%p3136_p3)
}
0x18f7   : > { %s3140_s1 = scalar_lea.hbm %s3783_s0, 128  ;;  %s3144_s4 = scalar_lea.hbm %s3843_s18, 256 }
0x18f8   : > { %p3141_p4 = scmp.ne.s32.totalorder %s3783_s0, %s3140_s1  ;;  %p3145_p9 = scmp.lt.u32.totalorder %s3783_s0, %s3843_s18 }
0x18f9   : > { %p3146_p10 = scmp.lt.u32.totalorder %s3144_s4, %s3140_s1  ;;  %p3148_p12 = scmp.lt.u32.totalorder %s3140_s1, %s3783_s0 }
0x18fa   : > { %p3142_p7 = pnand %p3141_p4, %p3346_p5 }
0x18fb   : > { %p3147_p11 = por %p3146_p10, %p3145_p9 }
0x18fc   : > { %p3143_p8 = pneg %p3142_p7 }
0x18fd   : > { %p3149_p13 = por %p3148_p12, %p3147_p11 }
0x18ff   : > { %p3150_p0 = pnand %p3149_p13, %p3143_p8 }
0x1901   : > { %3153 = shalt.err (!%p3150_p0)
}
0x1902   : > { %2988 = dma.vmem_to_hbm [thread:$0]  (%p3346_p5), %s2501_s26, 128, %s3783_s0, %s2484_s28   ;;  %vm2468_vm8 = vcmp.ge.s32.totalorder %v3768_v20, 0  ;;  %vm2473_vm9 = vcmask 7168   ;;  %vm2481_vm10 = vcmask 0  }
0x1903   : > { %v2720_v46 = vsel %vm2468_vm8, 1.0, %v3190_v8  ;;  %s640_s26 = scalar_lea.vmem %s3844_s19, %s3358_s27 }
0x197e   : > { %v2457_v42 = vpop.xlane.xlu0 %2456 }
0x197f   : > { %3124 = vlog2.f32 %v2457_v42 }
0x1982   : > { %v2467_v47 = vpop.xlane.xlu0 %2466 }
0x1989   : > { %v3125_v43 = vpop.eup %3124 }
0x198a   : > { %v2459_v44 = vmul.f32 0.6931472, %v3125_v43 }
0x198c   : > { %v2460_v45 = vadd.f32 %v2459_v44, %v2452_v35 }
0x198e   : > { %v2471_v48 = vsub.f32 %v2460_v45, %v2467_v47 }
0x1990   : > { %v2472_v30 = vmul.f32 %v2720_v46, %v2471_v48 }
0x1992   : > { %v2474_v49 = vsel %vm2473_vm9, %v2472_v30, 0.0 }
0x1993   : > { %v2475_v50 = vrot.slane %v2474_v49, 4 }
0x1995   : > { %v2476_v51 = vadd.f32 %v2475_v50, %v2474_v49 }
0x1997   : > { %v2477_v52 = vrot.slane %v2476_v51, 2 }
0x1999   : > { %v2478_v53 = vadd.f32 %v2477_v52, %v2476_v51 }
0x199b   : > { %v2479_v54 = vrot.slane %v2478_v53, 1 }
0x199d   : > { %v2480_v55 = vadd.f32 %v2479_v54, %v2478_v53 }
0x199f   : > { %2482 = vst.msk [vmem:[%s640_s26] sm:$0x1] %vm2481_vm10, %v2480_v55 }
0x19a0 PF: > { %s3903_s2 = sld [smem:[#allocation7_spill]]  ;;  %s3904_s24 = sld [smem:[#allocation5_spill]] }
0x19a6   : > { %p2994_p5 = scmp.ge.s32.totalorder %s3903_s2, 2  ;;  %s2515_s28 = sand.u32 1, %s3904_s24  }
0x19a7   : > { %s2516_s20 = scalar_lea.sflag [#allocation3], %s2515_s28 }
0x19a8   : > { %p2991_p1 = pnand %p2994_p5, %p3350_p6 }
0x19aa   : > { %3171 = dma.done.wait (!%p2991_p1), %s2516_s20, 128  }
0x19ab   : > { %3173 = vsyncadd (!%p2991_p1), %s2516_s20, 4294967168  ;;  %s3906_s21 = sld [smem:[#allocation8_spill]]  ;;  %s3907_s1 = sld [smem:[#allocation6_spill]] }
0x19ac   : > { %s3908_s20 = sld [smem:[#allocation9_spill]]  ;;  %s3909_s0 = smov %s3180_s30 }
0x19b1   : > { %p30_p2 = scmp.ge.s32.totalorder %s3906_s21, 4   ;;  %s3910_s30 = smov %s3907_s1 }
0x19b3   :  { %32 = sbr.rel (!%p30_p2) target bundleno = 11 (0xb), region = 157 }
0x19ba   :  { %2527 = vsyncpa [#allocation3], 1 }
0x19bb   :  { %2529 = vsyncpa [#allocation3 + $0x1], 1 }

</bundles_post_ra>
